<compile_context>
chip_gen: v6e
topology: v6e:2x2x1
jax: 0.10.0
libtpu: 0.0.40
codegen_flags: <defaults>
</compile_context>

<pallas_src>
import math

import jax
import jax.numpy as jnp
from jax.experimental import pallas as pl
from jax.experimental.pallas import tpu as pltpu

# ----------------------------- config ---------------------------------------
B = 2              # batch
S_DEC = 1          # incremental decode: one new token
PAST = 8           # cached self-attention length
KV = PAST + S_DEC  # grown self-attention cache length
S_ENC = 8          # encoder sequence length
D = 32             # d_model
H = 4              # attention heads
DH = D // H        # head dim
F = 64             # ffn dim
V = 128            # vocab
L = 2              # decoder layers
EPS = 1e-5
BS = B * S_DEC
SCALE = 1.0 / (DH ** 0.5)
POS_OFFSET = 2     # HF BartLearnedPositionalEmbedding offset

assert S_DEC == 1, "decoder-with-past performs single-token incremental decoding"
assert L == 2, "fused kernel signature below is written out for L == 2"


# --------------------------- fused Pallas kernel -----------------------------
def _decoder_step_kernel(
    # ---------------- inputs --------------------------------------------------
    ids_ref,          # SMEM [BS] int32 token ids
    encmask_ref,      # [B, S_ENC] f32 (1 = attend, 0 = masked)
    embed_ref,        # [V, D]  tied embedding table (gather + LM head)
    pos_ref,          # [S_DEC, D] positional embedding row for this step
    pool_ref,         # [D, H]  per-head score pooling matrix (block one-hot)
    expand_ref,       # [H, D]  per-head prob -> lane expansion matrix (pool.T)
    ln_emb_g_ref, ln_emb_b_ref,          # [1, D]
    qkv_w_ref, qkv_b_ref,                # [L, D, 3D], [L, 1, 3D]  fused self QKV
    so_w_ref, so_b_ref,                  # [L, D, D], [L, 1, D]
    cq_w_ref, cq_b_ref,                  # [L, D, D], [L, 1, D]
    co_w_ref, co_b_ref,                  # [L, D, D], [L, 1, D]
    fc1_w_ref, fc1_b_ref,                # [L, D, F], [L, 1, F]
    fc2_w_ref, fc2_b_ref,                # [L, F, D], [L, 1, D]
    ln_g_ref, ln_b_ref,                  # [L, 3, 1, D]  (self, cross, final)
    sk0_ref, sv0_ref, ck0_ref, cv0_ref,  # layer 0: self [B,PAST,D]x2, cross [B,S_ENC,D]x2
    sk1_ref, sv1_ref, ck1_ref, cv1_ref,  # layer 1 caches (same, lane-dense layout)
    # ---------------- outputs -------------------------------------------------
    logits_ref,                          # [BS, V]
    nk0_ref, nv0_ref,                    # layer 0 grown self K/V: [B, KV, D]
    nk1_ref, nv1_ref,                    # layer 1 grown self K/V
):
    f32 = jnp.float32

    def layer_norm(x, g, b):
        mu = jnp.mean(x, axis=-1, keepdims=True)
        xc = x - mu
        var = jnp.mean(xc * xc, axis=-1, keepdims=True)
        return xc * jax.lax.rsqrt(var + EPS) * g + b

    # head pool/expand matrices broadcast ONCE (hoisted out of the layer loop).
    pool_b = jnp.broadcast_to(pool_ref[...][None, :, :], (B, D, H))       # [B, D, H]
    expand_b = jnp.broadcast_to(expand_ref[...][None, :, :], (B, H, D))   # [B, H, D]

    def attend(q, k, v, bias=None):
        # q: [B, D] pre-scaled query (heads merged on lanes)
        # k, v: [B, K, D] lane-dense caches; bias: [B, K] additive mask or None.
        # All heads processed at once:
        #   s[b,k,h] = sum_{d in head h} q[b,d] * k[b,k,d]      (pool matmul)
        #   o[b,d]   = sum_k p[b,k,head(d)] * v[b,k,d]          (expand matmul + reduce)
        prod = q[:, None, :] * k                                          # [B, K, D]
        s = jnp.einsum("bkd,bdh->bkh", prod, pool_b,
                       preferred_element_type=f32)                        # [B, K, H]
        if bias is not None:
            s = s + bias[:, :, None]
        s = s - jnp.max(s, axis=1, keepdims=True)                         # softmax over K
        e = jnp.exp(s)
        p = e * pl.reciprocal(jnp.sum(e, axis=1, keepdims=True), approx=True)
        p_lanes = jnp.einsum("bkh,bhd->bkd", p, expand_b,
                             preferred_element_type=f32)                  # [B, K, D]
        return jnp.sum(p_lanes * v, axis=1)                               # [B, D]

    # ---- embedding: SMEM ids -> dynamic row gather (no one-hot matmul) -------
    tok = jnp.concatenate(
        [embed_ref[pl.ds(ids_ref[i], 1), :] for i in range(BS)], axis=0)  # [BS, D]
    x = tok + pos_ref[...]                     # scale_embedding=False -> no sqrt(D)
    hidden = layer_norm(x, ln_emb_g_ref[...], ln_emb_b_ref[...])          # [BS, D]

    enc_bias = (1.0 - encmask_ref[...]) * -1e9                            # [B, S_ENC]

    cache_refs = (
        (sk0_ref, sv0_ref, ck0_ref, cv0_ref, nk0_ref, nv0_ref),
        (sk1_ref, sv1_ref, ck1_ref, cv1_ref, nk1_ref, nv1_ref),
    )

    for l, (sk_ref, sv_ref, ck_ref, cv_ref, nk_ref, nv_ref) in enumerate(cache_refs):
        # ================= self-attention (fused QKV, all heads batched) ======
        residual = hidden
        qkv = jnp.dot(hidden, qkv_w_ref[l], preferred_element_type=f32) + qkv_b_ref[l]
        q = qkv[:, 0:D] * SCALE                                           # [B, D]
        k_new = qkv[:, D:2 * D]
        v_new = qkv[:, 2 * D:3 * D]
        # grown K/V built as register values: no store->load round trip via nk_ref
        k_full = jnp.concatenate([sk_ref[...], k_new[:, None, :]], axis=1)  # [B, KV, D]
        v_full = jnp.concatenate([sv_ref[...], v_new[:, None, :]], axis=1)
        o = attend(q, k_full, v_full)                                     # [B, D]
        attn = jnp.dot(o, so_w_ref[l], preferred_element_type=f32) + so_b_ref[l]
        hidden = layer_norm(residual + attn, ln_g_ref[l, 0], ln_b_ref[l, 0])
        # cache writeback: one lane-dense slab store per tensor, off the compute path
        nk_ref[...] = k_full
        nv_ref[...] = v_full

        # ================= cross-attention (K/V from cache, heads batched) ====
        residual = hidden
        q = (jnp.dot(hidden, cq_w_ref[l], preferred_element_type=f32)
             + cq_b_ref[l]) * SCALE
        o = attend(q, ck_ref[...], cv_ref[...], bias=enc_bias)
        attn = jnp.dot(o, co_w_ref[l], preferred_element_type=f32) + co_b_ref[l]
        hidden = layer_norm(residual + attn, ln_g_ref[l, 1], ln_b_ref[l, 1])

        # ================= feed-forward ========================================
        residual = hidden
        ff = jnp.dot(hidden, fc1_w_ref[l], preferred_element_type=f32) + fc1_b_ref[l]
        ff = jax.nn.gelu(ff, approximate=True)   # TODO(synk): exact erf GELU in HF BART
        ff = jnp.dot(ff, fc2_w_ref[l], preferred_element_type=f32) + fc2_b_ref[l]
        hidden = layer_norm(residual + ff, ln_g_ref[l, 2], ln_b_ref[l, 2])

    # ===== tied LM head: contract directly against embed (no .T copy) =========
    logits_ref[...] = jnp.einsum("td,vd->tv", hidden, embed_ref[...],
                                 preferred_element_type=f32).astype(logits_ref.dtype)


# --------------------------- parameters --------------------------------------
def make_params(key):
    def dense(k, shape, scale=0.02):
        return scale * jax.random.normal(k, shape, dtype=jnp.float32)

    keys = iter(jax.random.split(key, 32))
    # block one-hot matrices turning per-head reductions into tiny MXU matmuls
    head_pool = (jnp.arange(D)[:, None] // DH
                 == jnp.arange(H)[None, :]).astype(jnp.float32)          # [D, H]
    return {
        "embed": dense(next(keys), (V, D)),          # tied: gather AND LM head
        "pos_embed": dense(next(keys), (PAST + S_DEC + POS_OFFSET, D)),
        "head_pool": head_pool,
        "head_expand": head_pool.T,                  # transposed ONCE here
        "ln_emb_g": jnp.ones((1, D), jnp.float32),
        "ln_emb_b": jnp.zeros((1, D), jnp.float32),
        # per-layer weights stacked on a leading L axis; static layer indexing in-kernel
        "qkv_w": dense(next(keys), (L, D, 3 * D)),
        "qkv_b": jnp.zeros((L, 1, 3 * D), jnp.float32),
        "so_w": dense(next(keys), (L, D, D)),
        "so_b": jnp.zeros((L, 1, D), jnp.float32),
        "cq_w": dense(next(keys), (L, D, D)),
        "cq_b": jnp.zeros((L, 1, D), jnp.float32),
        "co_w": dense(next(keys), (L, D, D)),
        "co_b": jnp.zeros((L, 1, D), jnp.float32),
        "fc1_w": dense(next(keys), (L, D, F)),
        "fc1_b": jnp.zeros((L, 1, F), jnp.float32),
        "fc2_w": dense(next(keys), (L, F, D)),
        "fc2_b": jnp.zeros((L, 1, D), jnp.float32),
        "ln_g": jnp.ones((L, 3, 1, D), jnp.float32),   # (self, cross, final)
        "ln_b": jnp.zeros((L, 3, 1, D), jnp.float32),
    }


# --------------------------- forward (jitted wrapper) -------------------------
@jax.jit
def bart_decoder_forward(params, input_ids, attention_mask, encoder_output,
                         past_key_values):
    # encoder_output intentionally unused, mirroring the ONNX decoder-with-past
    # (cross-attention K/V come from past_key_values).
    del encoder_output
    b, s = input_ids.shape

    ids = input_ids.reshape(b * s).astype(jnp.int32)                      # SMEM ids
    mask_f32 = attention_mask.astype(jnp.float32)                         # [B, S_ENC]
    pos = params["pos_embed"][POS_OFFSET + PAST:POS_OFFSET + PAST + S_DEC]  # [S_DEC, D]

    cache_args = []
    for (sk, sv, ck, cv) in past_key_values:
        cache_args.extend([sk, sv, ck, cv])

    inputs = [ids, mask_f32, params["embed"], pos,
              params["head_pool"], params["head_expand"],
              params["ln_emb_g"], params["ln_emb_b"],
              params["qkv_w"], params["qkv_b"], params["so_w"], params["so_b"],
              params["cq_w"], params["cq_b"], params["co_w"], params["co_b"],
              params["fc1_w"], params["fc1_b"], params["fc2_w"], params["fc2_b"],
              params["ln_g"], params["ln_b"]] + cache_args

    out_shape = (
        jax.ShapeDtypeStruct((b * s, V), jnp.float32),    # logits
        jax.ShapeDtypeStruct((B, KV, D), jnp.float32),    # layer 0 grown self K
        jax.ShapeDtypeStruct((B, KV, D), jnp.float32),    # layer 0 grown self V
        jax.ShapeDtypeStruct((B, KV, D), jnp.float32),    # layer 1 grown self K
        jax.ShapeDtypeStruct((B, KV, D), jnp.float32),    # layer 1 grown self V
    )

    vmem = pl.BlockSpec(memory_space=pltpu.MemorySpace.VMEM)
    smem = pl.BlockSpec(memory_space=pltpu.MemorySpace.SMEM)
    in_specs = [smem] + [vmem] * (len(inputs) - 1)
    out_specs = (vmem,) * len(out_shape)

    # advisory cost estimate for the XLA scheduler around the custom call
    flops_layer = (
        2 * BS * D * (3 * D)                 # fused QKV projection
        + 2 * B * KV * D * H                 # self-attn score pooling matmul
        + 2 * B * KV * H * D                 # self-attn prob expansion matmul
        + 4 * B * KV * D                     # self-attn elementwise mul + reduce
        + 2 * BS * D * D                     # self-attn output projection
        + 2 * BS * D * D                     # cross-attn q projection
        + 2 * B * S_ENC * D * H              # cross score pooling
        + 2 * B * S_ENC * H * D              # cross prob expansion
        + 4 * B * S_ENC * D
        + 2 * BS * D * D                     # cross output projection
        + 2 * BS * D * F + 2 * BS * F * D)   # FFN
    flops = L * flops_layer + 2 * BS * D * V
    transcendentals = L * (B * H * (KV + S_ENC) + BS * F) + 8 * BS
    bytes_accessed = (
        sum(math.prod(x.shape) * jnp.dtype(x.dtype).itemsize for x in inputs)
        + sum(math.prod(o.shape) * jnp.dtype(o.dtype).itemsize for o in out_shape))

    outs = pl.pallas_call(
        _decoder_step_kernel,
        out_shape=out_shape,
        in_specs=in_specs,
        out_specs=out_specs,
        compiler_params=pltpu.CompilerParams(vmem_limit_bytes=32 * 1024 * 1024),
        cost_estimate=pl.CostEstimate(flops=flops,
                                      transcendentals=transcendentals,
                                      bytes_accessed=bytes_accessed),
    )(*inputs)

    logits = outs[0].reshape(b, s, V)
    new_past = tuple(
        (outs[1 + 2 * l], outs[2 + 2 * l],
         past_key_values[l][2], past_key_values[l][3])   # cross K/V: zero-copy pass-through
        for l in range(L))
    return logits, new_past


# ------------------------------ main ------------------------------------------
if __name__ == "__main__":
    key = jax.random.PRNGKey(0)
    kp, ki, ke, kpkv = jax.random.split(key, 4)

    params = make_params(kp)
    input_ids = jax.random.randint(ki, (B, S_DEC), 0, V, dtype=jnp.int32)
    attention_mask = jnp.ones((B, S_ENC), dtype=jnp.int32)
    encoder_output = jax.random.normal(ke, (B, S_ENC, D), dtype=jnp.float32)

    # past_key_values per layer: (self K, self V, cross K, cross V), lane-dense [*, *, D]
    pkv_keys = jax.random.split(kpkv, L * 4)
    past_key_values = tuple(
        (
            0.02 * jax.random.normal(pkv_keys[4 * i + 0], (B, PAST, D), jnp.float32),
            0.02 * jax.random.normal(pkv_keys[4 * i + 1], (B, PAST, D), jnp.float32),
            0.02 * jax.random.normal(pkv_keys[4 * i + 2], (B, S_ENC, D), jnp.float32),
            0.02 * jax.random.normal(pkv_keys[4 * i + 3], (B, S_ENC, D), jnp.float32),
        )
        for i in range(L)
    )

    logits, new_past = bart_decoder_forward(
        params, input_ids, attention_mask, encoder_output, past_key_values)
    jax.block_until_ready(logits)
    jax.block_until_ready(new_past)

    assert logits.shape == (B, S_DEC, V)
    assert len(new_past) == L and all(len(t) == 4 for t in new_past)
    assert new_past[0][0].shape == (B, PAST + S_DEC, D)    # self K grown by 1
    assert new_past[0][2].shape == (B, S_ENC, D)           # cross K unchanged
    # old cache rows must be copied bit-exactly into the grown cache
    assert bool(jnp.array_equal(new_past[0][0][:, :PAST, :], past_key_values[0][0]))
    assert bool(jnp.array_equal(new_past[1][1][:, :PAST, :], past_key_values[1][1]))
    assert bool(jnp.all(jnp.isfinite(logits)))
    print("KERNEL_OK")
</pallas_src>

<mosaic_0001>
module attributes {stable_mosaic.version = 11 : i64} {
  func.func @_decoder_step_kernel(%arg0: memref<2xi32, #tpu.memory_space<smem>>, %arg1: memref<2x8xf32, #tpu.memory_space<vmem>>, %arg2: memref<128x32xf32, #tpu.memory_space<vmem>>, %arg3: memref<1x32xf32, #tpu.memory_space<vmem>>, %arg4: memref<32x4xf32, #tpu.memory_space<vmem>>, %arg5: memref<4x32xf32, #tpu.memory_space<vmem>>, %arg6: memref<1x32xf32, #tpu.memory_space<vmem>>, %arg7: memref<1x32xf32, #tpu.memory_space<vmem>>, %arg8: memref<2x32x96xf32, #tpu.memory_space<vmem>>, %arg9: memref<2x1x96xf32, #tpu.memory_space<vmem>>, %arg10: memref<2x32x32xf32, #tpu.memory_space<vmem>>, %arg11: memref<2x1x32xf32, #tpu.memory_space<vmem>>, %arg12: memref<2x32x32xf32, #tpu.memory_space<vmem>>, %arg13: memref<2x1x32xf32, #tpu.memory_space<vmem>>, %arg14: memref<2x32x32xf32, #tpu.memory_space<vmem>>, %arg15: memref<2x1x32xf32, #tpu.memory_space<vmem>>, %arg16: memref<2x32x64xf32, #tpu.memory_space<vmem>>, %arg17: memref<2x1x64xf32, #tpu.memory_space<vmem>>, %arg18: memref<2x64x32xf32, #tpu.memory_space<vmem>>, %arg19: memref<2x1x32xf32, #tpu.memory_space<vmem>>, %arg20: memref<2x3x1x32xf32, #tpu.memory_space<vmem>>, %arg21: memref<2x3x1x32xf32, #tpu.memory_space<vmem>>, %arg22: memref<2x8x32xf32, #tpu.memory_space<vmem>>, %arg23: memref<2x8x32xf32, #tpu.memory_space<vmem>>, %arg24: memref<2x8x32xf32, #tpu.memory_space<vmem>>, %arg25: memref<2x8x32xf32, #tpu.memory_space<vmem>>, %arg26: memref<2x8x32xf32, #tpu.memory_space<vmem>>, %arg27: memref<2x8x32xf32, #tpu.memory_space<vmem>>, %arg28: memref<2x8x32xf32, #tpu.memory_space<vmem>>, %arg29: memref<2x8x32xf32, #tpu.memory_space<vmem>>, %arg30: memref<2x128xf32, #tpu.memory_space<vmem>>, %arg31: memref<2x9x32xf32, #tpu.memory_space<vmem>>, %arg32: memref<2x9x32xf32, #tpu.memory_space<vmem>>, %arg33: memref<2x9x32xf32, #tpu.memory_space<vmem>>, %arg34: memref<2x9x32xf32, #tpu.memory_space<vmem>>) attributes {dimension_semantics = [], scalar_prefetch = 0 : i64, scratch_operands = 0 : i64, tpu.core_type = #tpu.core_type<tc>} {
    %c0 = arith.constant 0 : index
    %c0_0 = arith.constant 0 : index
    %0 = vector.load %arg4[%c0, %c0_0] : memref<32x4xf32, #tpu.memory_space<vmem>>, vector<32x4xf32>
    %1 = vector.shape_cast %0 : vector<32x4xf32> to vector<1x32x4xf32>
    %2 = vector.shape_cast %1 : vector<1x32x4xf32> to vector<1x32x4xf32>
    %3 = vector.broadcast %2 : vector<1x32x4xf32> to vector<2x32x4xf32>
    %c0_1 = arith.constant 0 : index
    %c0_2 = arith.constant 0 : index
    %4 = vector.load %arg5[%c0_1, %c0_2] : memref<4x32xf32, #tpu.memory_space<vmem>>, vector<4x32xf32>
    %5 = vector.shape_cast %4 : vector<4x32xf32> to vector<1x4x32xf32>
    %6 = vector.shape_cast %5 : vector<1x4x32xf32> to vector<1x4x32xf32>
    %7 = vector.broadcast %6 : vector<1x4x32xf32> to vector<2x4x32xf32>
    %c0_3 = arith.constant 0 : index
    %8 = memref.load %arg0[%c0_3] : memref<2xi32, #tpu.memory_space<smem>>
    %9 = arith.index_cast %8 : i32 to index
    %c0_4 = arith.constant 0 : index
    %10 = vector.load %arg2[%9, %c0_4] : memref<128x32xf32, #tpu.memory_space<vmem>>, vector<1x32xf32>
    %c1 = arith.constant 1 : index
    %11 = memref.load %arg0[%c1] : memref<2xi32, #tpu.memory_space<smem>>
    %12 = arith.index_cast %11 : i32 to index
    %c0_5 = arith.constant 0 : index
    %13 = vector.load %arg2[%12, %c0_5] : memref<128x32xf32, #tpu.memory_space<vmem>>, vector<1x32xf32>
    %14 = tpu.concatenate %10, %13 in 0 : vector<1x32xf32>, vector<1x32xf32> -> vector<2x32xf32>
    %c0_6 = arith.constant 0 : index
    %c0_7 = arith.constant 0 : index
    %15 = vector.load %arg3[%c0_6, %c0_7] : memref<1x32xf32, #tpu.memory_space<vmem>>, vector<1x32xf32>
    %16 = vector.broadcast %15 : vector<1x32xf32> to vector<2x32xf32>
    %17 = arith.addf %14, %16 : vector<2x32xf32>
    %c0_8 = arith.constant 0 : index
    %c0_9 = arith.constant 0 : index
    %18 = vector.load %arg6[%c0_8, %c0_9] : memref<1x32xf32, #tpu.memory_space<vmem>>, vector<1x32xf32>
    %c0_10 = arith.constant 0 : index
    %c0_11 = arith.constant 0 : index
    %19 = vector.load %arg7[%c0_10, %c0_11] : memref<1x32xf32, #tpu.memory_space<vmem>>, vector<1x32xf32>
    %cst = arith.constant dense<0.000000e+00> : vector<2xf32>
    %20 = vector.multi_reduction <add>, %17, %cst [1] : vector<2x32xf32> to vector<2xf32>
    %21 = vector.shape_cast %20 : vector<2xf32> to vector<2x1xf32>
    %cst_12 = arith.constant 3.200000e+01 : f32
    %22 = vector.broadcast %cst_12 : f32 to vector<2x1xf32>
    %23 = arith.divf %21, %22 : vector<2x1xf32>
    %24 = vector.broadcast %23 : vector<2x1xf32> to vector<2x32xf32>
    %25 = arith.subf %17, %24 : vector<2x32xf32>
    %26 = arith.mulf %25, %25 : vector<2x32xf32>
    %cst_13 = arith.constant dense<0.000000e+00> : vector<2xf32>
    %27 = vector.multi_reduction <add>, %26, %cst_13 [1] : vector<2x32xf32> to vector<2xf32>
    %28 = vector.shape_cast %27 : vector<2xf32> to vector<2x1xf32>
    %cst_14 = arith.constant 3.200000e+01 : f32
    %29 = vector.broadcast %cst_14 : f32 to vector<2x1xf32>
    %30 = arith.divf %28, %29 : vector<2x1xf32>
    %cst_15 = arith.constant 9.99999974E-6 : f32
    %31 = vector.broadcast %cst_15 : f32 to vector<2x1xf32>
    %32 = arith.addf %30, %31 : vector<2x1xf32>
    %33 = math.rsqrt %32 : vector<2x1xf32>
    %34 = vector.broadcast %33 : vector<2x1xf32> to vector<2x32xf32>
    %35 = arith.mulf %25, %34 : vector<2x32xf32>
    %36 = vector.broadcast %18 : vector<1x32xf32> to vector<2x32xf32>
    %37 = arith.mulf %35, %36 : vector<2x32xf32>
    %38 = vector.broadcast %19 : vector<1x32xf32> to vector<2x32xf32>
    %39 = arith.addf %37, %38 : vector<2x32xf32>
    %c0_16 = arith.constant 0 : index
    %c0_17 = arith.constant 0 : index
    %40 = vector.load %arg1[%c0_16, %c0_17] : memref<2x8xf32, #tpu.memory_space<vmem>>, vector<2x8xf32>
    %cst_18 = arith.constant 1.000000e+00 : f32
    %41 = vector.broadcast %cst_18 : f32 to vector<2x8xf32>
    %42 = arith.subf %41, %40 : vector<2x8xf32>
    %cst_19 = arith.constant -1.000000e+09 : f32
    %43 = vector.broadcast %cst_19 : f32 to vector<2x8xf32>
    %44 = arith.mulf %42, %43 : vector<2x8xf32>
    %c0_20 = arith.constant 0 : index
    %c0_21 = arith.constant 0 : index
    %c0_22 = arith.constant 0 : index
    %45 = vector.load %arg8[%c0_20, %c0_21, %c0_22] : memref<2x32x96xf32, #tpu.memory_space<vmem>>, vector<1x32x96xf32>
    %46 = vector.shape_cast %45 : vector<1x32x96xf32> to vector<32x96xf32>
    %cst_23 = arith.constant dense<0.000000e+00> : vector<2x96xf32>
    %47 = tpu.matmul %39, %46, %cst_23 {dimension_numbers = #tpu.dot_dimension_numbers<[1], [0], [0], [1], [0, 0, 1, 1], [], []>} : vector<2x32xf32>, vector<32x96xf32>, vector<2x96xf32> -> vector<2x96xf32>
    %c0_24 = arith.constant 0 : index
    %c0_25 = arith.constant 0 : index
    %c0_26 = arith.constant 0 : index
    %48 = vector.load %arg9[%c0_24, %c0_25, %c0_26] : memref<2x1x96xf32, #tpu.memory_space<vmem>>, vector<1x1x96xf32>
    %49 = vector.shape_cast %48 : vector<1x1x96xf32> to vector<1x96xf32>
    %50 = vector.broadcast %49 : vector<1x96xf32> to vector<2x96xf32>
    %51 = arith.addf %47, %50 : vector<2x96xf32>
    %52 = vector.extract_strided_slice %51 {offsets = [0, 0], sizes = [2, 32], strides = [1, 1]} : vector<2x96xf32> to vector<2x32xf32>
    %cst_27 = arith.constant 0.353553385 : f32
    %53 = vector.broadcast %cst_27 : f32 to vector<2x32xf32>
    %54 = arith.mulf %52, %53 : vector<2x32xf32>
    %55 = vector.extract_strided_slice %51 {offsets = [0, 32], sizes = [2, 32], strides = [1, 1]} : vector<2x96xf32> to vector<2x32xf32>
    %56 = vector.extract_strided_slice %51 {offsets = [0, 64], sizes = [2, 32], strides = [1, 1]} : vector<2x96xf32> to vector<2x32xf32>
    %c0_28 = arith.constant 0 : index
    %c0_29 = arith.constant 0 : index
    %c0_30 = arith.constant 0 : index
    %57 = vector.load %arg22[%c0_28, %c0_29, %c0_30] : memref<2x8x32xf32, #tpu.memory_space<vmem>>, vector<2x8x32xf32>
    %58 = vector.shape_cast %55 : vector<2x32xf32> to vector<2x1x32xf32>
    %59 = tpu.concatenate %57, %58 in 1 : vector<2x8x32xf32>, vector<2x1x32xf32> -> vector<2x9x32xf32>
    %c0_31 = arith.constant 0 : index
    %c0_32 = arith.constant 0 : index
    %c0_33 = arith.constant 0 : index
    %60 = vector.load %arg23[%c0_31, %c0_32, %c0_33] : memref<2x8x32xf32, #tpu.memory_space<vmem>>, vector<2x8x32xf32>
    %61 = vector.shape_cast %56 : vector<2x32xf32> to vector<2x1x32xf32>
    %62 = tpu.concatenate %60, %61 in 1 : vector<2x8x32xf32>, vector<2x1x32xf32> -> vector<2x9x32xf32>
    %63 = vector.shape_cast %54 : vector<2x32xf32> to vector<2x1x32xf32>
    %64 = vector.broadcast %63 : vector<2x1x32xf32> to vector<2x9x32xf32>
    %65 = arith.mulf %64, %59 : vector<2x9x32xf32>
    "tpu.trace_start"() <{level = 10 : i32, message = "bkd,bdh->bkh"}> : () -> ()
    %cst_34 = arith.constant dense<0.000000e+00> : vector<2x9x4xf32>
    %66 = tpu.matmul %65, %3, %cst_34 {dimension_numbers = #tpu.dot_dimension_numbers<[2], [1], [1], [2], [0, 0, 0, 1, 1, 2], [0], [0]>} : vector<2x9x32xf32>, vector<2x32x4xf32>, vector<2x9x4xf32> -> vector<2x9x4xf32>
    "tpu.trace_stop"() : () -> ()
    %cst_35 = arith.constant dense<0xFF800000> : vector<2x4xf32>
    %67 = vector.multi_reduction <maximumf>, %66, %cst_35 [1] : vector<2x9x4xf32> to vector<2x4xf32>
    %68 = vector.shape_cast %67 : vector<2x4xf32> to vector<2x1x4xf32>
    %69 = vector.broadcast %68 : vector<2x1x4xf32> to vector<2x9x4xf32>
    %70 = arith.subf %66, %69 : vector<2x9x4xf32>
    %71 = math.exp %70 : vector<2x9x4xf32>
    %cst_36 = arith.constant dense<0.000000e+00> : vector<2x4xf32>
    %72 = vector.multi_reduction <add>, %71, %cst_36 [1] : vector<2x9x4xf32> to vector<2x4xf32>
    %73 = vector.shape_cast %72 : vector<2x4xf32> to vector<2x1x4xf32>
    %74 = tpu.reciprocal %73 {approx = true} : vector<2x1x4xf32> -> vector<2x1x4xf32>
    %75 = vector.broadcast %74 : vector<2x1x4xf32> to vector<2x9x4xf32>
    %76 = arith.mulf %71, %75 : vector<2x9x4xf32>
    "tpu.trace_start"() <{level = 10 : i32, message = "bkh,bhd->bkd"}> : () -> ()
    %cst_37 = arith.constant dense<0.000000e+00> : vector<2x9x32xf32>
    %77 = tpu.matmul %76, %7, %cst_37 {dimension_numbers = #tpu.dot_dimension_numbers<[2], [1], [1], [2], [0, 0, 0, 1, 1, 2], [0], [0]>} : vector<2x9x4xf32>, vector<2x4x32xf32>, vector<2x9x32xf32> -> vector<2x9x32xf32>
    "tpu.trace_stop"() : () -> ()
    %78 = arith.mulf %77, %62 : vector<2x9x32xf32>
    %cst_38 = arith.constant dense<0.000000e+00> : vector<2x32xf32>
    %79 = vector.multi_reduction <add>, %78, %cst_38 [1] : vector<2x9x32xf32> to vector<2x32xf32>
    %c0_39 = arith.constant 0 : index
    %c0_40 = arith.constant 0 : index
    %c0_41 = arith.constant 0 : index
    %80 = vector.load %arg10[%c0_39, %c0_40, %c0_41] : memref<2x32x32xf32, #tpu.memory_space<vmem>>, vector<1x32x32xf32>
    %81 = vector.shape_cast %80 : vector<1x32x32xf32> to vector<32x32xf32>
    %cst_42 = arith.constant dense<0.000000e+00> : vector<2x32xf32>
    %82 = tpu.matmul %79, %81, %cst_42 {dimension_numbers = #tpu.dot_dimension_numbers<[1], [0], [0], [1], [0, 0, 1, 1], [], []>} : vector<2x32xf32>, vector<32x32xf32>, vector<2x32xf32> -> vector<2x32xf32>
    %c0_43 = arith.constant 0 : index
    %c0_44 = arith.constant 0 : index
    %c0_45 = arith.constant 0 : index
    %83 = vector.load %arg11[%c0_43, %c0_44, %c0_45] : memref<2x1x32xf32, #tpu.memory_space<vmem>>, vector<1x1x32xf32>
    %84 = vector.shape_cast %83 : vector<1x1x32xf32> to vector<1x32xf32>
    %85 = vector.broadcast %84 : vector<1x32xf32> to vector<2x32xf32>
    %86 = arith.addf %82, %85 : vector<2x32xf32>
    %87 = arith.addf %39, %86 : vector<2x32xf32>
    %c0_46 = arith.constant 0 : index
    %c0_47 = arith.constant 0 : index
    %c0_48 = arith.constant 0 : index
    %c0_49 = arith.constant 0 : index
    %88 = vector.load %arg20[%c0_46, %c0_47, %c0_48, %c0_49] : memref<2x3x1x32xf32, #tpu.memory_space<vmem>>, vector<1x1x1x32xf32>
    %89 = vector.shape_cast %88 : vector<1x1x1x32xf32> to vector<1x32xf32>
    %c0_50 = arith.constant 0 : index
    %c0_51 = arith.constant 0 : index
    %c0_52 = arith.constant 0 : index
    %c0_53 = arith.constant 0 : index
    %90 = vector.load %arg21[%c0_50, %c0_51, %c0_52, %c0_53] : memref<2x3x1x32xf32, #tpu.memory_space<vmem>>, vector<1x1x1x32xf32>
    %91 = vector.shape_cast %90 : vector<1x1x1x32xf32> to vector<1x32xf32>
    %cst_54 = arith.constant dense<0.000000e+00> : vector<2xf32>
    %92 = vector.multi_reduction <add>, %87, %cst_54 [1] : vector<2x32xf32> to vector<2xf32>
    %93 = vector.shape_cast %92 : vector<2xf32> to vector<2x1xf32>
    %cst_55 = arith.constant 3.200000e+01 : f32
    %94 = vector.broadcast %cst_55 : f32 to vector<2x1xf32>
    %95 = arith.divf %93, %94 : vector<2x1xf32>
    %96 = vector.broadcast %95 : vector<2x1xf32> to vector<2x32xf32>
    %97 = arith.subf %87, %96 : vector<2x32xf32>
    %98 = arith.mulf %97, %97 : vector<2x32xf32>
    %cst_56 = arith.constant dense<0.000000e+00> : vector<2xf32>
    %99 = vector.multi_reduction <add>, %98, %cst_56 [1] : vector<2x32xf32> to vector<2xf32>
    %100 = vector.shape_cast %99 : vector<2xf32> to vector<2x1xf32>
    %cst_57 = arith.constant 3.200000e+01 : f32
    %101 = vector.broadcast %cst_57 : f32 to vector<2x1xf32>
    %102 = arith.divf %100, %101 : vector<2x1xf32>
    %cst_58 = arith.constant 9.99999974E-6 : f32
    %103 = vector.broadcast %cst_58 : f32 to vector<2x1xf32>
    %104 = arith.addf %102, %103 : vector<2x1xf32>
    %105 = math.rsqrt %104 : vector<2x1xf32>
    %106 = vector.broadcast %105 : vector<2x1xf32> to vector<2x32xf32>
    %107 = arith.mulf %97, %106 : vector<2x32xf32>
    %108 = vector.broadcast %89 : vector<1x32xf32> to vector<2x32xf32>
    %109 = arith.mulf %107, %108 : vector<2x32xf32>
    %110 = vector.broadcast %91 : vector<1x32xf32> to vector<2x32xf32>
    %111 = arith.addf %109, %110 : vector<2x32xf32>
    %c0_59 = arith.constant 0 : index
    %c0_60 = arith.constant 0 : index
    %c0_61 = arith.constant 0 : index
    %112 = vector.load %arg31[%c0_59, %c0_60, %c0_61] : memref<2x9x32xf32, #tpu.memory_space<vmem>>, vector<2x9x32xf32>
    tpu.vector_store %arg31[%c0_59, %c0_60, %c0_61], %59 {strides = array<i32>} : memref<2x9x32xf32, #tpu.memory_space<vmem>>, vector<2x9x32xf32>,
    %c0_62 = arith.constant 0 : index
    %c0_63 = arith.constant 0 : index
    %c0_64 = arith.constant 0 : index
    %113 = vector.load %arg32[%c0_62, %c0_63, %c0_64] : memref<2x9x32xf32, #tpu.memory_space<vmem>>, vector<2x9x32xf32>
    tpu.vector_store %arg32[%c0_62, %c0_63, %c0_64], %62 {strides = array<i32>} : memref<2x9x32xf32, #tpu.memory_space<vmem>>, vector<2x9x32xf32>,
    %c0_65 = arith.constant 0 : index
    %c0_66 = arith.constant 0 : index
    %c0_67 = arith.constant 0 : index
    %114 = vector.load %arg12[%c0_65, %c0_66, %c0_67] : memref<2x32x32xf32, #tpu.memory_space<vmem>>, vector<1x32x32xf32>
    %115 = vector.shape_cast %114 : vector<1x32x32xf32> to vector<32x32xf32>
    %cst_68 = arith.constant dense<0.000000e+00> : vector<2x32xf32>
    %116 = tpu.matmul %111, %115, %cst_68 {dimension_numbers = #tpu.dot_dimension_numbers<[1], [0], [0], [1], [0, 0, 1, 1], [], []>} : vector<2x32xf32>, vector<32x32xf32>, vector<2x32xf32> -> vector<2x32xf32>
    %c0_69 = arith.constant 0 : index
    %c0_70 = arith.constant 0 : index
    %c0_71 = arith.constant 0 : index
    %117 = vector.load %arg13[%c0_69, %c0_70, %c0_71] : memref<2x1x32xf32, #tpu.memory_space<vmem>>, vector<1x1x32xf32>
    %118 = vector.shape_cast %117 : vector<1x1x32xf32> to vector<1x32xf32>
    %119 = vector.broadcast %118 : vector<1x32xf32> to vector<2x32xf32>
    %120 = arith.addf %116, %119 : vector<2x32xf32>
    %cst_72 = arith.constant 0.353553385 : f32
    %121 = vector.broadcast %cst_72 : f32 to vector<2x32xf32>
    %122 = arith.mulf %120, %121 : vector<2x32xf32>
    %c0_73 = arith.constant 0 : index
    %c0_74 = arith.constant 0 : index
    %c0_75 = arith.constant 0 : index
    %123 = vector.load %arg24[%c0_73, %c0_74, %c0_75] : memref<2x8x32xf32, #tpu.memory_space<vmem>>, vector<2x8x32xf32>
    %c0_76 = arith.constant 0 : index
    %c0_77 = arith.constant 0 : index
    %c0_78 = arith.constant 0 : index
    %124 = vector.load %arg25[%c0_76, %c0_77, %c0_78] : memref<2x8x32xf32, #tpu.memory_space<vmem>>, vector<2x8x32xf32>
    %125 = vector.shape_cast %122 : vector<2x32xf32> to vector<2x1x32xf32>
    %126 = vector.broadcast %125 : vector<2x1x32xf32> to vector<2x8x32xf32>
    %127 = arith.mulf %126, %123 : vector<2x8x32xf32>
    "tpu.trace_start"() <{level = 10 : i32, message = "bkd,bdh->bkh"}> : () -> ()
    %cst_79 = arith.constant dense<0.000000e+00> : vector<2x8x4xf32>
    %128 = tpu.matmul %127, %3, %cst_79 {dimension_numbers = #tpu.dot_dimension_numbers<[2], [1], [1], [2], [0, 0, 0, 1, 1, 2], [0], [0]>} : vector<2x8x32xf32>, vector<2x32x4xf32>, vector<2x8x4xf32> -> vector<2x8x4xf32>
    "tpu.trace_stop"() : () -> ()
    %129 = vector.shape_cast %44 : vector<2x8xf32> to vector<2x8x1xf32>
    %130 = vector.broadcast %129 : vector<2x8x1xf32> to vector<2x8x4xf32>
    %131 = arith.addf %128, %130 : vector<2x8x4xf32>
    %cst_80 = arith.constant dense<0xFF800000> : vector<2x4xf32>
    %132 = vector.multi_reduction <maximumf>, %131, %cst_80 [1] : vector<2x8x4xf32> to vector<2x4xf32>
    %133 = vector.shape_cast %132 : vector<2x4xf32> to vector<2x1x4xf32>
    %134 = vector.broadcast %133 : vector<2x1x4xf32> to vector<2x8x4xf32>
    %135 = arith.subf %131, %134 : vector<2x8x4xf32>
    %136 = math.exp %135 : vector<2x8x4xf32>
    %cst_81 = arith.constant dense<0.000000e+00> : vector<2x4xf32>
    %137 = vector.multi_reduction <add>, %136, %cst_81 [1] : vector<2x8x4xf32> to vector<2x4xf32>
    %138 = vector.shape_cast %137 : vector<2x4xf32> to vector<2x1x4xf32>
    %139 = tpu.reciprocal %138 {approx = true} : vector<2x1x4xf32> -> vector<2x1x4xf32>
    %140 = vector.broadcast %139 : vector<2x1x4xf32> to vector<2x8x4xf32>
    %141 = arith.mulf %136, %140 : vector<2x8x4xf32>
    "tpu.trace_start"() <{level = 10 : i32, message = "bkh,bhd->bkd"}> : () -> ()
    %cst_82 = arith.constant dense<0.000000e+00> : vector<2x8x32xf32>
    %142 = tpu.matmul %141, %7, %cst_82 {dimension_numbers = #tpu.dot_dimension_numbers<[2], [1], [1], [2], [0, 0, 0, 1, 1, 2], [0], [0]>} : vector<2x8x4xf32>, vector<2x4x32xf32>, vector<2x8x32xf32> -> vector<2x8x32xf32>
    "tpu.trace_stop"() : () -> ()
    %143 = arith.mulf %142, %124 : vector<2x8x32xf32>
    %cst_83 = arith.constant dense<0.000000e+00> : vector<2x32xf32>
    %144 = vector.multi_reduction <add>, %143, %cst_83 [1] : vector<2x8x32xf32> to vector<2x32xf32>
    %c0_84 = arith.constant 0 : index
    %c0_85 = arith.constant 0 : index
    %c0_86 = arith.constant 0 : index
    %145 = vector.load %arg14[%c0_84, %c0_85, %c0_86] : memref<2x32x32xf32, #tpu.memory_space<vmem>>, vector<1x32x32xf32>
    %146 = vector.shape_cast %145 : vector<1x32x32xf32> to vector<32x32xf32>
    %cst_87 = arith.constant dense<0.000000e+00> : vector<2x32xf32>
    %147 = tpu.matmul %144, %146, %cst_87 {dimension_numbers = #tpu.dot_dimension_numbers<[1], [0], [0], [1], [0, 0, 1, 1], [], []>} : vector<2x32xf32>, vector<32x32xf32>, vector<2x32xf32> -> vector<2x32xf32>
    %c0_88 = arith.constant 0 : index
    %c0_89 = arith.constant 0 : index
    %c0_90 = arith.constant 0 : index
    %148 = vector.load %arg15[%c0_88, %c0_89, %c0_90] : memref<2x1x32xf32, #tpu.memory_space<vmem>>, vector<1x1x32xf32>
    %149 = vector.shape_cast %148 : vector<1x1x32xf32> to vector<1x32xf32>
    %150 = vector.broadcast %149 : vector<1x32xf32> to vector<2x32xf32>
    %151 = arith.addf %147, %150 : vector<2x32xf32>
    %152 = arith.addf %111, %151 : vector<2x32xf32>
    %c0_91 = arith.constant 0 : index
    %c1_92 = arith.constant 1 : index
    %c0_93 = arith.constant 0 : index
    %c0_94 = arith.constant 0 : index
    %153 = vector.load %arg20[%c0_91, %c1_92, %c0_93, %c0_94] : memref<2x3x1x32xf32, #tpu.memory_space<vmem>>, vector<1x1x1x32xf32>
    %154 = vector.shape_cast %153 : vector<1x1x1x32xf32> to vector<1x32xf32>
    %c0_95 = arith.constant 0 : index
    %c1_96 = arith.constant 1 : index
    %c0_97 = arith.constant 0 : index
    %c0_98 = arith.constant 0 : index
    %155 = vector.load %arg21[%c0_95, %c1_96, %c0_97, %c0_98] : memref<2x3x1x32xf32, #tpu.memory_space<vmem>>, vector<1x1x1x32xf32>
    %156 = vector.shape_cast %155 : vector<1x1x1x32xf32> to vector<1x32xf32>
    %cst_99 = arith.constant dense<0.000000e+00> : vector<2xf32>
    %157 = vector.multi_reduction <add>, %152, %cst_99 [1] : vector<2x32xf32> to vector<2xf32>
    %158 = vector.shape_cast %157 : vector<2xf32> to vector<2x1xf32>
    %cst_100 = arith.constant 3.200000e+01 : f32
    %159 = vector.broadcast %cst_100 : f32 to vector<2x1xf32>
    %160 = arith.divf %158, %159 : vector<2x1xf32>
    %161 = vector.broadcast %160 : vector<2x1xf32> to vector<2x32xf32>
    %162 = arith.subf %152, %161 : vector<2x32xf32>
    %163 = arith.mulf %162, %162 : vector<2x32xf32>
    %cst_101 = arith.constant dense<0.000000e+00> : vector<2xf32>
    %164 = vector.multi_reduction <add>, %163, %cst_101 [1] : vector<2x32xf32> to vector<2xf32>
    %165 = vector.shape_cast %164 : vector<2xf32> to vector<2x1xf32>
    %cst_102 = arith.constant 3.200000e+01 : f32
    %166 = vector.broadcast %cst_102 : f32 to vector<2x1xf32>
    %167 = arith.divf %165, %166 : vector<2x1xf32>
    %cst_103 = arith.constant 9.99999974E-6 : f32
    %168 = vector.broadcast %cst_103 : f32 to vector<2x1xf32>
    %169 = arith.addf %167, %168 : vector<2x1xf32>
    %170 = math.rsqrt %169 : vector<2x1xf32>
    %171 = vector.broadcast %170 : vector<2x1xf32> to vector<2x32xf32>
    %172 = arith.mulf %162, %171 : vector<2x32xf32>
    %173 = vector.broadcast %154 : vector<1x32xf32> to vector<2x32xf32>
    %174 = arith.mulf %172, %173 : vector<2x32xf32>
    %175 = vector.broadcast %156 : vector<1x32xf32> to vector<2x32xf32>
    %176 = arith.addf %174, %175 : vector<2x32xf32>
    %c0_104 = arith.constant 0 : index
    %c0_105 = arith.constant 0 : index
    %c0_106 = arith.constant 0 : index
    %177 = vector.load %arg16[%c0_104, %c0_105, %c0_106] : memref<2x32x64xf32, #tpu.memory_space<vmem>>, vector<1x32x64xf32>
    %178 = vector.shape_cast %177 : vector<1x32x64xf32> to vector<32x64xf32>
    %cst_107 = arith.constant dense<0.000000e+00> : vector<2x64xf32>
    %179 = tpu.matmul %176, %178, %cst_107 {dimension_numbers = #tpu.dot_dimension_numbers<[1], [0], [0], [1], [0, 0, 1, 1], [], []>} : vector<2x32xf32>, vector<32x64xf32>, vector<2x64xf32> -> vector<2x64xf32>
    %c0_108 = arith.constant 0 : index
    %c0_109 = arith.constant 0 : index
    %c0_110 = arith.constant 0 : index
    %180 = vector.load %arg17[%c0_108, %c0_109, %c0_110] : memref<2x1x64xf32, #tpu.memory_space<vmem>>, vector<1x1x64xf32>
    %181 = vector.shape_cast %180 : vector<1x1x64xf32> to vector<1x64xf32>
    %182 = vector.broadcast %181 : vector<1x64xf32> to vector<2x64xf32>
    %183 = arith.addf %179, %182 : vector<2x64xf32>
    %184 = arith.mulf %183, %183 : vector<2x64xf32>
    %185 = arith.mulf %183, %184 : vector<2x64xf32>
    %cst_111 = arith.constant 4.471500e-02 : f32
    %186 = vector.broadcast %cst_111 : f32 to vector<2x64xf32>
    %187 = arith.mulf %186, %185 : vector<2x64xf32>
    %188 = arith.addf %183, %187 : vector<2x64xf32>
    %cst_112 = arith.constant 0.797884583 : f32
    %189 = vector.broadcast %cst_112 : f32 to vector<2x64xf32>
    %190 = arith.mulf %189, %188 : vector<2x64xf32>
    %191 = math.tanh %190 : vector<2x64xf32>
    %cst_113 = arith.constant 1.000000e+00 : f32
    %192 = vector.broadcast %cst_113 : f32 to vector<2x64xf32>
    %193 = arith.addf %192, %191 : vector<2x64xf32>
    %cst_114 = arith.constant 5.000000e-01 : f32
    %194 = vector.broadcast %cst_114 : f32 to vector<2x64xf32>
    %195 = arith.mulf %194, %193 : vector<2x64xf32>
    %196 = arith.mulf %183, %195 : vector<2x64xf32>
    %c0_115 = arith.constant 0 : index
    %c0_116 = arith.constant 0 : index
    %c0_117 = arith.constant 0 : index
    %197 = vector.load %arg18[%c0_115, %c0_116, %c0_117] : memref<2x64x32xf32, #tpu.memory_space<vmem>>, vector<1x64x32xf32>
    %198 = vector.shape_cast %197 : vector<1x64x32xf32> to vector<64x32xf32>
    %cst_118 = arith.constant dense<0.000000e+00> : vector<2x32xf32>
    %199 = tpu.matmul %196, %198, %cst_118 {dimension_numbers = #tpu.dot_dimension_numbers<[1], [0], [0], [1], [0, 0, 1, 1], [], []>} : vector<2x64xf32>, vector<64x32xf32>, vector<2x32xf32> -> vector<2x32xf32>
    %c0_119 = arith.constant 0 : index
    %c0_120 = arith.constant 0 : index
    %c0_121 = arith.constant 0 : index
    %200 = vector.load %arg19[%c0_119, %c0_120, %c0_121] : memref<2x1x32xf32, #tpu.memory_space<vmem>>, vector<1x1x32xf32>
    %201 = vector.shape_cast %200 : vector<1x1x32xf32> to vector<1x32xf32>
    %202 = vector.broadcast %201 : vector<1x32xf32> to vector<2x32xf32>
    %203 = arith.addf %199, %202 : vector<2x32xf32>
    %204 = arith.addf %176, %203 : vector<2x32xf32>
    %c0_122 = arith.constant 0 : index
    %c2 = arith.constant 2 : index
    %c0_123 = arith.constant 0 : index
    %c0_124 = arith.constant 0 : index
    %205 = vector.load %arg20[%c0_122, %c2, %c0_123, %c0_124] : memref<2x3x1x32xf32, #tpu.memory_space<vmem>>, vector<1x1x1x32xf32>
    %206 = vector.shape_cast %205 : vector<1x1x1x32xf32> to vector<1x32xf32>
    %c0_125 = arith.constant 0 : index
    %c2_126 = arith.constant 2 : index
    %c0_127 = arith.constant 0 : index
    %c0_128 = arith.constant 0 : index
    %207 = vector.load %arg21[%c0_125, %c2_126, %c0_127, %c0_128] : memref<2x3x1x32xf32, #tpu.memory_space<vmem>>, vector<1x1x1x32xf32>
    %208 = vector.shape_cast %207 : vector<1x1x1x32xf32> to vector<1x32xf32>
    %cst_129 = arith.constant dense<0.000000e+00> : vector<2xf32>
    %209 = vector.multi_reduction <add>, %204, %cst_129 [1] : vector<2x32xf32> to vector<2xf32>
    %210 = vector.shape_cast %209 : vector<2xf32> to vector<2x1xf32>
    %cst_130 = arith.constant 3.200000e+01 : f32
    %211 = vector.broadcast %cst_130 : f32 to vector<2x1xf32>
    %212 = arith.divf %210, %211 : vector<2x1xf32>
    %213 = vector.broadcast %212 : vector<2x1xf32> to vector<2x32xf32>
    %214 = arith.subf %204, %213 : vector<2x32xf32>
    %215 = arith.mulf %214, %214 : vector<2x32xf32>
    %cst_131 = arith.constant dense<0.000000e+00> : vector<2xf32>
    %216 = vector.multi_reduction <add>, %215, %cst_131 [1] : vector<2x32xf32> to vector<2xf32>
    %217 = vector.shape_cast %216 : vector<2xf32> to vector<2x1xf32>
    %cst_132 = arith.constant 3.200000e+01 : f32
    %218 = vector.broadcast %cst_132 : f32 to vector<2x1xf32>
    %219 = arith.divf %217, %218 : vector<2x1xf32>
    %cst_133 = arith.constant 9.99999974E-6 : f32
    %220 = vector.broadcast %cst_133 : f32 to vector<2x1xf32>
    %221 = arith.addf %219, %220 : vector<2x1xf32>
    %222 = math.rsqrt %221 : vector<2x1xf32>
    %223 = vector.broadcast %222 : vector<2x1xf32> to vector<2x32xf32>
    %224 = arith.mulf %214, %223 : vector<2x32xf32>
    %225 = vector.broadcast %206 : vector<1x32xf32> to vector<2x32xf32>
    %226 = arith.mulf %224, %225 : vector<2x32xf32>
    %227 = vector.broadcast %208 : vector<1x32xf32> to vector<2x32xf32>
    %228 = arith.addf %226, %227 : vector<2x32xf32>
    %c1_134 = arith.constant 1 : index
    %c0_135 = arith.constant 0 : index
    %c0_136 = arith.constant 0 : index
    %229 = vector.load %arg8[%c1_134, %c0_135, %c0_136] : memref<2x32x96xf32, #tpu.memory_space<vmem>>, vector<1x32x96xf32>
    %230 = vector.shape_cast %229 : vector<1x32x96xf32> to vector<32x96xf32>
    %cst_137 = arith.constant dense<0.000000e+00> : vector<2x96xf32>
    %231 = tpu.matmul %228, %230, %cst_137 {dimension_numbers = #tpu.dot_dimension_numbers<[1], [0], [0], [1], [0, 0, 1, 1], [], []>} : vector<2x32xf32>, vector<32x96xf32>, vector<2x96xf32> -> vector<2x96xf32>
    %c1_138 = arith.constant 1 : index
    %c0_139 = arith.constant 0 : index
    %c0_140 = arith.constant 0 : index
    %232 = vector.load %arg9[%c1_138, %c0_139, %c0_140] : memref<2x1x96xf32, #tpu.memory_space<vmem>>, vector<1x1x96xf32>
    %233 = vector.shape_cast %232 : vector<1x1x96xf32> to vector<1x96xf32>
    %234 = vector.broadcast %233 : vector<1x96xf32> to vector<2x96xf32>
    %235 = arith.addf %231, %234 : vector<2x96xf32>
    %236 = vector.extract_strided_slice %235 {offsets = [0, 0], sizes = [2, 32], strides = [1, 1]} : vector<2x96xf32> to vector<2x32xf32>
    %cst_141 = arith.constant 0.353553385 : f32
    %237 = vector.broadcast %cst_141 : f32 to vector<2x32xf32>
    %238 = arith.mulf %236, %237 : vector<2x32xf32>
    %239 = vector.extract_strided_slice %235 {offsets = [0, 32], sizes = [2, 32], strides = [1, 1]} : vector<2x96xf32> to vector<2x32xf32>
    %240 = vector.extract_strided_slice %235 {offsets = [0, 64], sizes = [2, 32], strides = [1, 1]} : vector<2x96xf32> to vector<2x32xf32>
    %c0_142 = arith.constant 0 : index
    %c0_143 = arith.constant 0 : index
    %c0_144 = arith.constant 0 : index
    %241 = vector.load %arg26[%c0_142, %c0_143, %c0_144] : memref<2x8x32xf32, #tpu.memory_space<vmem>>, vector<2x8x32xf32>
    %242 = vector.shape_cast %239 : vector<2x32xf32> to vector<2x1x32xf32>
    %243 = tpu.concatenate %241, %242 in 1 : vector<2x8x32xf32>, vector<2x1x32xf32> -> vector<2x9x32xf32>
    %c0_145 = arith.constant 0 : index
    %c0_146 = arith.constant 0 : index
    %c0_147 = arith.constant 0 : index
    %244 = vector.load %arg27[%c0_145, %c0_146, %c0_147] : memref<2x8x32xf32, #tpu.memory_space<vmem>>, vector<2x8x32xf32>
    %245 = vector.shape_cast %240 : vector<2x32xf32> to vector<2x1x32xf32>
    %246 = tpu.concatenate %244, %245 in 1 : vector<2x8x32xf32>, vector<2x1x32xf32> -> vector<2x9x32xf32>
    %247 = vector.shape_cast %238 : vector<2x32xf32> to vector<2x1x32xf32>
    %248 = vector.broadcast %247 : vector<2x1x32xf32> to vector<2x9x32xf32>
    %249 = arith.mulf %248, %243 : vector<2x9x32xf32>
    "tpu.trace_start"() <{level = 10 : i32, message = "bkd,bdh->bkh"}> : () -> ()
    %cst_148 = arith.constant dense<0.000000e+00> : vector<2x9x4xf32>
    %250 = tpu.matmul %249, %3, %cst_148 {dimension_numbers = #tpu.dot_dimension_numbers<[2], [1], [1], [2], [0, 0, 0, 1, 1, 2], [0], [0]>} : vector<2x9x32xf32>, vector<2x32x4xf32>, vector<2x9x4xf32> -> vector<2x9x4xf32>
    "tpu.trace_stop"() : () -> ()
    %cst_149 = arith.constant dense<0xFF800000> : vector<2x4xf32>
    %251 = vector.multi_reduction <maximumf>, %250, %cst_149 [1] : vector<2x9x4xf32> to vector<2x4xf32>
    %252 = vector.shape_cast %251 : vector<2x4xf32> to vector<2x1x4xf32>
    %253 = vector.broadcast %252 : vector<2x1x4xf32> to vector<2x9x4xf32>
    %254 = arith.subf %250, %253 : vector<2x9x4xf32>
    %255 = math.exp %254 : vector<2x9x4xf32>
    %cst_150 = arith.constant dense<0.000000e+00> : vector<2x4xf32>
    %256 = vector.multi_reduction <add>, %255, %cst_150 [1] : vector<2x9x4xf32> to vector<2x4xf32>
    %257 = vector.shape_cast %256 : vector<2x4xf32> to vector<2x1x4xf32>
    %258 = tpu.reciprocal %257 {approx = true} : vector<2x1x4xf32> -> vector<2x1x4xf32>
    %259 = vector.broadcast %258 : vector<2x1x4xf32> to vector<2x9x4xf32>
    %260 = arith.mulf %255, %259 : vector<2x9x4xf32>
    "tpu.trace_start"() <{level = 10 : i32, message = "bkh,bhd->bkd"}> : () -> ()
    %cst_151 = arith.constant dense<0.000000e+00> : vector<2x9x32xf32>
    %261 = tpu.matmul %260, %7, %cst_151 {dimension_numbers = #tpu.dot_dimension_numbers<[2], [1], [1], [2], [0, 0, 0, 1, 1, 2], [0], [0]>} : vector<2x9x4xf32>, vector<2x4x32xf32>, vector<2x9x32xf32> -> vector<2x9x32xf32>
    "tpu.trace_stop"() : () -> ()
    %262 = arith.mulf %261, %246 : vector<2x9x32xf32>
    %cst_152 = arith.constant dense<0.000000e+00> : vector<2x32xf32>
    %263 = vector.multi_reduction <add>, %262, %cst_152 [1] : vector<2x9x32xf32> to vector<2x32xf32>
    %c1_153 = arith.constant 1 : index
    %c0_154 = arith.constant 0 : index
    %c0_155 = arith.constant 0 : index
    %264 = vector.load %arg10[%c1_153, %c0_154, %c0_155] : memref<2x32x32xf32, #tpu.memory_space<vmem>>, vector<1x32x32xf32>
    %265 = vector.shape_cast %264 : vector<1x32x32xf32> to vector<32x32xf32>
    %cst_156 = arith.constant dense<0.000000e+00> : vector<2x32xf32>
    %266 = tpu.matmul %263, %265, %cst_156 {dimension_numbers = #tpu.dot_dimension_numbers<[1], [0], [0], [1], [0, 0, 1, 1], [], []>} : vector<2x32xf32>, vector<32x32xf32>, vector<2x32xf32> -> vector<2x32xf32>
    %c1_157 = arith.constant 1 : index
    %c0_158 = arith.constant 0 : index
    %c0_159 = arith.constant 0 : index
    %267 = vector.load %arg11[%c1_157, %c0_158, %c0_159] : memref<2x1x32xf32, #tpu.memory_space<vmem>>, vector<1x1x32xf32>
    %268 = vector.shape_cast %267 : vector<1x1x32xf32> to vector<1x32xf32>
    %269 = vector.broadcast %268 : vector<1x32xf32> to vector<2x32xf32>
    %270 = arith.addf %266, %269 : vector<2x32xf32>
    %271 = arith.addf %228, %270 : vector<2x32xf32>
    %c1_160 = arith.constant 1 : index
    %c0_161 = arith.constant 0 : index
    %c0_162 = arith.constant 0 : index
    %c0_163 = arith.constant 0 : index
    %272 = vector.load %arg20[%c1_160, %c0_161, %c0_162, %c0_163] : memref<2x3x1x32xf32, #tpu.memory_space<vmem>>, vector<1x1x1x32xf32>
    %273 = vector.shape_cast %272 : vector<1x1x1x32xf32> to vector<1x32xf32>
    %c1_164 = arith.constant 1 : index
    %c0_165 = arith.constant 0 : index
    %c0_166 = arith.constant 0 : index
    %c0_167 = arith.constant 0 : index
    %274 = vector.load %arg21[%c1_164, %c0_165, %c0_166, %c0_167] : memref<2x3x1x32xf32, #tpu.memory_space<vmem>>, vector<1x1x1x32xf32>
    %275 = vector.shape_cast %274 : vector<1x1x1x32xf32> to vector<1x32xf32>
    %cst_168 = arith.constant dense<0.000000e+00> : vector<2xf32>
    %276 = vector.multi_reduction <add>, %271, %cst_168 [1] : vector<2x32xf32> to vector<2xf32>
    %277 = vector.shape_cast %276 : vector<2xf32> to vector<2x1xf32>
    %cst_169 = arith.constant 3.200000e+01 : f32
    %278 = vector.broadcast %cst_169 : f32 to vector<2x1xf32>
    %279 = arith.divf %277, %278 : vector<2x1xf32>
    %280 = vector.broadcast %279 : vector<2x1xf32> to vector<2x32xf32>
    %281 = arith.subf %271, %280 : vector<2x32xf32>
    %282 = arith.mulf %281, %281 : vector<2x32xf32>
    %cst_170 = arith.constant dense<0.000000e+00> : vector<2xf32>
    %283 = vector.multi_reduction <add>, %282, %cst_170 [1] : vector<2x32xf32> to vector<2xf32>
    %284 = vector.shape_cast %283 : vector<2xf32> to vector<2x1xf32>
    %cst_171 = arith.constant 3.200000e+01 : f32
    %285 = vector.broadcast %cst_171 : f32 to vector<2x1xf32>
    %286 = arith.divf %284, %285 : vector<2x1xf32>
    %cst_172 = arith.constant 9.99999974E-6 : f32
    %287 = vector.broadcast %cst_172 : f32 to vector<2x1xf32>
    %288 = arith.addf %286, %287 : vector<2x1xf32>
    %289 = math.rsqrt %288 : vector<2x1xf32>
    %290 = vector.broadcast %289 : vector<2x1xf32> to vector<2x32xf32>
    %291 = arith.mulf %281, %290 : vector<2x32xf32>
    %292 = vector.broadcast %273 : vector<1x32xf32> to vector<2x32xf32>
    %293 = arith.mulf %291, %292 : vector<2x32xf32>
    %294 = vector.broadcast %275 : vector<1x32xf32> to vector<2x32xf32>
    %295 = arith.addf %293, %294 : vector<2x32xf32>
    %c0_173 = arith.constant 0 : index
    %c0_174 = arith.constant 0 : index
    %c0_175 = arith.constant 0 : index
    %296 = vector.load %arg33[%c0_173, %c0_174, %c0_175] : memref<2x9x32xf32, #tpu.memory_space<vmem>>, vector<2x9x32xf32>
    tpu.vector_store %arg33[%c0_173, %c0_174, %c0_175], %243 {strides = array<i32>} : memref<2x9x32xf32, #tpu.memory_space<vmem>>, vector<2x9x32xf32>,
    %c0_176 = arith.constant 0 : index
    %c0_177 = arith.constant 0 : index
    %c0_178 = arith.constant 0 : index
    %297 = vector.load %arg34[%c0_176, %c0_177, %c0_178] : memref<2x9x32xf32, #tpu.memory_space<vmem>>, vector<2x9x32xf32>
    tpu.vector_store %arg34[%c0_176, %c0_177, %c0_178], %246 {strides = array<i32>} : memref<2x9x32xf32, #tpu.memory_space<vmem>>, vector<2x9x32xf32>,
    %c1_179 = arith.constant 1 : index
    %c0_180 = arith.constant 0 : index
    %c0_181 = arith.constant 0 : index
    %298 = vector.load %arg12[%c1_179, %c0_180, %c0_181] : memref<2x32x32xf32, #tpu.memory_space<vmem>>, vector<1x32x32xf32>
    %299 = vector.shape_cast %298 : vector<1x32x32xf32> to vector<32x32xf32>
    %cst_182 = arith.constant dense<0.000000e+00> : vector<2x32xf32>
    %300 = tpu.matmul %295, %299, %cst_182 {dimension_numbers = #tpu.dot_dimension_numbers<[1], [0], [0], [1], [0, 0, 1, 1], [], []>} : vector<2x32xf32>, vector<32x32xf32>, vector<2x32xf32> -> vector<2x32xf32>
    %c1_183 = arith.constant 1 : index
    %c0_184 = arith.constant 0 : index
    %c0_185 = arith.constant 0 : index
    %301 = vector.load %arg13[%c1_183, %c0_184, %c0_185] : memref<2x1x32xf32, #tpu.memory_space<vmem>>, vector<1x1x32xf32>
    %302 = vector.shape_cast %301 : vector<1x1x32xf32> to vector<1x32xf32>
    %303 = vector.broadcast %302 : vector<1x32xf32> to vector<2x32xf32>
    %304 = arith.addf %300, %303 : vector<2x32xf32>
    %cst_186 = arith.constant 0.353553385 : f32
    %305 = vector.broadcast %cst_186 : f32 to vector<2x32xf32>
    %306 = arith.mulf %304, %305 : vector<2x32xf32>
    %c0_187 = arith.constant 0 : index
    %c0_188 = arith.constant 0 : index
    %c0_189 = arith.constant 0 : index
    %307 = vector.load %arg28[%c0_187, %c0_188, %c0_189] : memref<2x8x32xf32, #tpu.memory_space<vmem>>, vector<2x8x32xf32>
    %c0_190 = arith.constant 0 : index
    %c0_191 = arith.constant 0 : index
    %c0_192 = arith.constant 0 : index
    %308 = vector.load %arg29[%c0_190, %c0_191, %c0_192] : memref<2x8x32xf32, #tpu.memory_space<vmem>>, vector<2x8x32xf32>
    %309 = vector.shape_cast %306 : vector<2x32xf32> to vector<2x1x32xf32>
    %310 = vector.broadcast %309 : vector<2x1x32xf32> to vector<2x8x32xf32>
    %311 = arith.mulf %310, %307 : vector<2x8x32xf32>
    "tpu.trace_start"() <{level = 10 : i32, message = "bkd,bdh->bkh"}> : () -> ()
    %cst_193 = arith.constant dense<0.000000e+00> : vector<2x8x4xf32>
    %312 = tpu.matmul %311, %3, %cst_193 {dimension_numbers = #tpu.dot_dimension_numbers<[2], [1], [1], [2], [0, 0, 0, 1, 1, 2], [0], [0]>} : vector<2x8x32xf32>, vector<2x32x4xf32>, vector<2x8x4xf32> -> vector<2x8x4xf32>
    "tpu.trace_stop"() : () -> ()
    %313 = vector.shape_cast %44 : vector<2x8xf32> to vector<2x8x1xf32>
    %314 = vector.broadcast %313 : vector<2x8x1xf32> to vector<2x8x4xf32>
    %315 = arith.addf %312, %314 : vector<2x8x4xf32>
    %cst_194 = arith.constant dense<0xFF800000> : vector<2x4xf32>
    %316 = vector.multi_reduction <maximumf>, %315, %cst_194 [1] : vector<2x8x4xf32> to vector<2x4xf32>
    %317 = vector.shape_cast %316 : vector<2x4xf32> to vector<2x1x4xf32>
    %318 = vector.broadcast %317 : vector<2x1x4xf32> to vector<2x8x4xf32>
    %319 = arith.subf %315, %318 : vector<2x8x4xf32>
    %320 = math.exp %319 : vector<2x8x4xf32>
    %cst_195 = arith.constant dense<0.000000e+00> : vector<2x4xf32>
    %321 = vector.multi_reduction <add>, %320, %cst_195 [1] : vector<2x8x4xf32> to vector<2x4xf32>
    %322 = vector.shape_cast %321 : vector<2x4xf32> to vector<2x1x4xf32>
    %323 = tpu.reciprocal %322 {approx = true} : vector<2x1x4xf32> -> vector<2x1x4xf32>
    %324 = vector.broadcast %323 : vector<2x1x4xf32> to vector<2x8x4xf32>
    %325 = arith.mulf %320, %324 : vector<2x8x4xf32>
    "tpu.trace_start"() <{level = 10 : i32, message = "bkh,bhd->bkd"}> : () -> ()
    %cst_196 = arith.constant dense<0.000000e+00> : vector<2x8x32xf32>
    %326 = tpu.matmul %325, %7, %cst_196 {dimension_numbers = #tpu.dot_dimension_numbers<[2], [1], [1], [2], [0, 0, 0, 1, 1, 2], [0], [0]>} : vector<2x8x4xf32>, vector<2x4x32xf32>, vector<2x8x32xf32> -> vector<2x8x32xf32>
    "tpu.trace_stop"() : () -> ()
    %327 = arith.mulf %326, %308 : vector<2x8x32xf32>
    %cst_197 = arith.constant dense<0.000000e+00> : vector<2x32xf32>
    %328 = vector.multi_reduction <add>, %327, %cst_197 [1] : vector<2x8x32xf32> to vector<2x32xf32>
    %c1_198 = arith.constant 1 : index
    %c0_199 = arith.constant 0 : index
    %c0_200 = arith.constant 0 : index
    %329 = vector.load %arg14[%c1_198, %c0_199, %c0_200] : memref<2x32x32xf32, #tpu.memory_space<vmem>>, vector<1x32x32xf32>
    %330 = vector.shape_cast %329 : vector<1x32x32xf32> to vector<32x32xf32>
    %cst_201 = arith.constant dense<0.000000e+00> : vector<2x32xf32>
    %331 = tpu.matmul %328, %330, %cst_201 {dimension_numbers = #tpu.dot_dimension_numbers<[1], [0], [0], [1], [0, 0, 1, 1], [], []>} : vector<2x32xf32>, vector<32x32xf32>, vector<2x32xf32> -> vector<2x32xf32>
    %c1_202 = arith.constant 1 : index
    %c0_203 = arith.constant 0 : index
    %c0_204 = arith.constant 0 : index
    %332 = vector.load %arg15[%c1_202, %c0_203, %c0_204] : memref<2x1x32xf32, #tpu.memory_space<vmem>>, vector<1x1x32xf32>
    %333 = vector.shape_cast %332 : vector<1x1x32xf32> to vector<1x32xf32>
    %334 = vector.broadcast %333 : vector<1x32xf32> to vector<2x32xf32>
    %335 = arith.addf %331, %334 : vector<2x32xf32>
    %336 = arith.addf %295, %335 : vector<2x32xf32>
    %c1_205 = arith.constant 1 : index
    %c1_206 = arith.constant 1 : index
    %c0_207 = arith.constant 0 : index
    %c0_208 = arith.constant 0 : index
    %337 = vector.load %arg20[%c1_205, %c1_206, %c0_207, %c0_208] : memref<2x3x1x32xf32, #tpu.memory_space<vmem>>, vector<1x1x1x32xf32>
    %338 = vector.shape_cast %337 : vector<1x1x1x32xf32> to vector<1x32xf32>
    %c1_209 = arith.constant 1 : index
    %c1_210 = arith.constant 1 : index
    %c0_211 = arith.constant 0 : index
    %c0_212 = arith.constant 0 : index
    %339 = vector.load %arg21[%c1_209, %c1_210, %c0_211, %c0_212] : memref<2x3x1x32xf32, #tpu.memory_space<vmem>>, vector<1x1x1x32xf32>
    %340 = vector.shape_cast %339 : vector<1x1x1x32xf32> to vector<1x32xf32>
    %cst_213 = arith.constant dense<0.000000e+00> : vector<2xf32>
    %341 = vector.multi_reduction <add>, %336, %cst_213 [1] : vector<2x32xf32> to vector<2xf32>
    %342 = vector.shape_cast %341 : vector<2xf32> to vector<2x1xf32>
    %cst_214 = arith.constant 3.200000e+01 : f32
    %343 = vector.broadcast %cst_214 : f32 to vector<2x1xf32>
    %344 = arith.divf %342, %343 : vector<2x1xf32>
    %345 = vector.broadcast %344 : vector<2x1xf32> to vector<2x32xf32>
    %346 = arith.subf %336, %345 : vector<2x32xf32>
    %347 = arith.mulf %346, %346 : vector<2x32xf32>
    %cst_215 = arith.constant dense<0.000000e+00> : vector<2xf32>
    %348 = vector.multi_reduction <add>, %347, %cst_215 [1] : vector<2x32xf32> to vector<2xf32>
    %349 = vector.shape_cast %348 : vector<2xf32> to vector<2x1xf32>
    %cst_216 = arith.constant 3.200000e+01 : f32
    %350 = vector.broadcast %cst_216 : f32 to vector<2x1xf32>
    %351 = arith.divf %349, %350 : vector<2x1xf32>
    %cst_217 = arith.constant 9.99999974E-6 : f32
    %352 = vector.broadcast %cst_217 : f32 to vector<2x1xf32>
    %353 = arith.addf %351, %352 : vector<2x1xf32>
    %354 = math.rsqrt %353 : vector<2x1xf32>
    %355 = vector.broadcast %354 : vector<2x1xf32> to vector<2x32xf32>
    %356 = arith.mulf %346, %355 : vector<2x32xf32>
    %357 = vector.broadcast %338 : vector<1x32xf32> to vector<2x32xf32>
    %358 = arith.mulf %356, %357 : vector<2x32xf32>
    %359 = vector.broadcast %340 : vector<1x32xf32> to vector<2x32xf32>
    %360 = arith.addf %358, %359 : vector<2x32xf32>
    %c1_218 = arith.constant 1 : index
    %c0_219 = arith.constant 0 : index
    %c0_220 = arith.constant 0 : index
    %361 = vector.load %arg16[%c1_218, %c0_219, %c0_220] : memref<2x32x64xf32, #tpu.memory_space<vmem>>, vector<1x32x64xf32>
    %362 = vector.shape_cast %361 : vector<1x32x64xf32> to vector<32x64xf32>
    %cst_221 = arith.constant dense<0.000000e+00> : vector<2x64xf32>
    %363 = tpu.matmul %360, %362, %cst_221 {dimension_numbers = #tpu.dot_dimension_numbers<[1], [0], [0], [1], [0, 0, 1, 1], [], []>} : vector<2x32xf32>, vector<32x64xf32>, vector<2x64xf32> -> vector<2x64xf32>
    %c1_222 = arith.constant 1 : index
    %c0_223 = arith.constant 0 : index
    %c0_224 = arith.constant 0 : index
    %364 = vector.load %arg17[%c1_222, %c0_223, %c0_224] : memref<2x1x64xf32, #tpu.memory_space<vmem>>, vector<1x1x64xf32>
    %365 = vector.shape_cast %364 : vector<1x1x64xf32> to vector<1x64xf32>
    %366 = vector.broadcast %365 : vector<1x64xf32> to vector<2x64xf32>
    %367 = arith.addf %363, %366 : vector<2x64xf32>
    %368 = arith.mulf %367, %367 : vector<2x64xf32>
    %369 = arith.mulf %367, %368 : vector<2x64xf32>
    %cst_225 = arith.constant 4.471500e-02 : f32
    %370 = vector.broadcast %cst_225 : f32 to vector<2x64xf32>
    %371 = arith.mulf %370, %369 : vector<2x64xf32>
    %372 = arith.addf %367, %371 : vector<2x64xf32>
    %cst_226 = arith.constant 0.797884583 : f32
    %373 = vector.broadcast %cst_226 : f32 to vector<2x64xf32>
    %374 = arith.mulf %373, %372 : vector<2x64xf32>
    %375 = math.tanh %374 : vector<2x64xf32>
    %cst_227 = arith.constant 1.000000e+00 : f32
    %376 = vector.broadcast %cst_227 : f32 to vector<2x64xf32>
    %377 = arith.addf %376, %375 : vector<2x64xf32>
    %cst_228 = arith.constant 5.000000e-01 : f32
    %378 = vector.broadcast %cst_228 : f32 to vector<2x64xf32>
    %379 = arith.mulf %378, %377 : vector<2x64xf32>
    %380 = arith.mulf %367, %379 : vector<2x64xf32>
    %c1_229 = arith.constant 1 : index
    %c0_230 = arith.constant 0 : index
    %c0_231 = arith.constant 0 : index
    %381 = vector.load %arg18[%c1_229, %c0_230, %c0_231] : memref<2x64x32xf32, #tpu.memory_space<vmem>>, vector<1x64x32xf32>
    %382 = vector.shape_cast %381 : vector<1x64x32xf32> to vector<64x32xf32>
    %cst_232 = arith.constant dense<0.000000e+00> : vector<2x32xf32>
    %383 = tpu.matmul %380, %382, %cst_232 {dimension_numbers = #tpu.dot_dimension_numbers<[1], [0], [0], [1], [0, 0, 1, 1], [], []>} : vector<2x64xf32>, vector<64x32xf32>, vector<2x32xf32> -> vector<2x32xf32>
    %c1_233 = arith.constant 1 : index
    %c0_234 = arith.constant 0 : index
    %c0_235 = arith.constant 0 : index
    %384 = vector.load %arg19[%c1_233, %c0_234, %c0_235] : memref<2x1x32xf32, #tpu.memory_space<vmem>>, vector<1x1x32xf32>
    %385 = vector.shape_cast %384 : vector<1x1x32xf32> to vector<1x32xf32>
    %386 = vector.broadcast %385 : vector<1x32xf32> to vector<2x32xf32>
    %387 = arith.addf %383, %386 : vector<2x32xf32>
    %388 = arith.addf %360, %387 : vector<2x32xf32>
    %c1_236 = arith.constant 1 : index
    %c2_237 = arith.constant 2 : index
    %c0_238 = arith.constant 0 : index
    %c0_239 = arith.constant 0 : index
    %389 = vector.load %arg20[%c1_236, %c2_237, %c0_238, %c0_239] : memref<2x3x1x32xf32, #tpu.memory_space<vmem>>, vector<1x1x1x32xf32>
    %390 = vector.shape_cast %389 : vector<1x1x1x32xf32> to vector<1x32xf32>
    %c1_240 = arith.constant 1 : index
    %c2_241 = arith.constant 2 : index
    %c0_242 = arith.constant 0 : index
    %c0_243 = arith.constant 0 : index
    %391 = vector.load %arg21[%c1_240, %c2_241, %c0_242, %c0_243] : memref<2x3x1x32xf32, #tpu.memory_space<vmem>>, vector<1x1x1x32xf32>
    %392 = vector.shape_cast %391 : vector<1x1x1x32xf32> to vector<1x32xf32>
    %cst_244 = arith.constant dense<0.000000e+00> : vector<2xf32>
    %393 = vector.multi_reduction <add>, %388, %cst_244 [1] : vector<2x32xf32> to vector<2xf32>
    %394 = vector.shape_cast %393 : vector<2xf32> to vector<2x1xf32>
    %cst_245 = arith.constant 3.200000e+01 : f32
    %395 = vector.broadcast %cst_245 : f32 to vector<2x1xf32>
    %396 = arith.divf %394, %395 : vector<2x1xf32>
    %397 = vector.broadcast %396 : vector<2x1xf32> to vector<2x32xf32>
    %398 = arith.subf %388, %397 : vector<2x32xf32>
    %399 = arith.mulf %398, %398 : vector<2x32xf32>
    %cst_246 = arith.constant dense<0.000000e+00> : vector<2xf32>
    %400 = vector.multi_reduction <add>, %399, %cst_246 [1] : vector<2x32xf32> to vector<2xf32>
    %401 = vector.shape_cast %400 : vector<2xf32> to vector<2x1xf32>
    %cst_247 = arith.constant 3.200000e+01 : f32
    %402 = vector.broadcast %cst_247 : f32 to vector<2x1xf32>
    %403 = arith.divf %401, %402 : vector<2x1xf32>
    %cst_248 = arith.constant 9.99999974E-6 : f32
    %404 = vector.broadcast %cst_248 : f32 to vector<2x1xf32>
    %405 = arith.addf %403, %404 : vector<2x1xf32>
    %406 = math.rsqrt %405 : vector<2x1xf32>
    %407 = vector.broadcast %406 : vector<2x1xf32> to vector<2x32xf32>
    %408 = arith.mulf %398, %407 : vector<2x32xf32>
    %409 = vector.broadcast %390 : vector<1x32xf32> to vector<2x32xf32>
    %410 = arith.mulf %408, %409 : vector<2x32xf32>
    %411 = vector.broadcast %392 : vector<1x32xf32> to vector<2x32xf32>
    %412 = arith.addf %410, %411 : vector<2x32xf32>
    %c0_249 = arith.constant 0 : index
    %c0_250 = arith.constant 0 : index
    %413 = vector.load %arg2[%c0_249, %c0_250] : memref<128x32xf32, #tpu.memory_space<vmem>>, vector<128x32xf32>
    "tpu.trace_start"() <{level = 10 : i32, message = "td,vd->tv"}> : () -> ()
    %cst_251 = arith.constant dense<0.000000e+00> : vector<2x128xf32>
    %414 = tpu.matmul %412, %413, %cst_251 {dimension_numbers = #tpu.dot_dimension_numbers<[1], [1], [0], [0], [0, 0, 1, 0], [], []>} : vector<2x32xf32>, vector<128x32xf32>, vector<2x128xf32> -> vector<2x128xf32>
    "tpu.trace_stop"() : () -> ()
    %c0_252 = arith.constant 0 : index
    %c0_253 = arith.constant 0 : index
    %415 = vector.load %arg30[%c0_252, %c0_253] : memref<2x128xf32, #tpu.memory_space<vmem>>, vector<2x128xf32>
    tpu.vector_store %arg30[%c0_252, %c0_253], %414 {strides = array<i32>} : memref<2x128xf32, #tpu.memory_space<vmem>>, vector<2x128xf32>,
    return
  }
}

</mosaic_0001>

<bundles_post_ra>
// kernel: bart_decoder_forward.1
= control target key start
LH: loop header
LB: loop body
LE: loop exit
PB: predicated region body
PF: predicated region fallthrough
CT: control target
= control target key end

     0   :  { %s4737_s6 = smov 1   ;;  %s4738_s10 = smov 2   ;;  %s5570_s0 = inlined_call_operand.smem [shape: u32[35], index: -1, kind: input, shape index: {}] }
   0x1   :  { %s4806_s5 = sld [smem:[%s5570_s0]]   ;;  %s4739_s14 = smov 3  }
   0x2   :  { %s4811_s9 = sld [smem:[%s5570_s0 + %s4737_s6]]   ;;  %s4740_s18 = smov 4  }
   0x3   :  { %s4816_s13 = sld [smem:[%s5570_s0 + %s4738_s10]]   ;;  %s4741_s22 = smov 5  }
   0x4   :  { %s4821_s17 = sld [smem:[%s5570_s0 + %s4739_s14]]   ;;  %s4742_s26 = smov 6  }
   0x5   :  { %s4826_s21 = sld [smem:[%s5570_s0 + %s4740_s18]]   ;;  %s4743_s30 = smov 7  }
   0x6   :  { %s4831_s25 = sld [smem:[%s5570_s0 + %s4741_s22]]   ;;  %s4744_s4 = smov 8  }
   0x7   :  { %s4836_s29 = sld [smem:[%s5570_s0 + %s4742_s26]]   ;;  %s4745_s10 = smov 9  }
   0x8   :  { %5582 = sst [smem:[#allocation42_spill]] %s4811_s9  ;;  %s4746_s15 = smov 10  }
   0x9   :  { %5583 = sst [smem:[#allocation43_spill]] %s4816_s13  ;;  %s4747_s20 = smov 11  }
   0xa   :  { %5584 = sst [smem:[#allocation44_spill]] %s4821_s17  ;;  %s4748_s26 = smov 12  }
   0xb   :  { %5585 = sst [smem:[#allocation45_spill]] %s4826_s21  ;;  %s4749_s1 = smov 13  }
   0xc   :  { %s4841_s3 = sld [smem:[%s5570_s0 + %s4743_s30]]   ;;  %s4750_s7 = smov 14  }
   0xd   :  { %s4846_s8 = sld [smem:[%s5570_s0 + %s4744_s4]]   ;;  %s4752_s22 = smov 16  }
   0xe   :  { %s4851_s14 = sld [smem:[%s5570_s0 + %s4745_s10]]   ;;  %s4753_s28 = smov 17  }
   0xf   :  { %s4856_s19 = sld [smem:[%s5570_s0 + %s4746_s15]]   ;;  %s4751_s15 = smov 15  }
  0x10   :  { %s4861_s24 = sld [smem:[%s5570_s0 + %s4747_s20]]  }
  0x11   :  { %s4866_s30 = sld [smem:[%s5570_s0 + %s4748_s26]]  }
  0x12   :  { %s4871_s6 = sld [smem:[%s5570_s0 + %s4749_s1]]  }
  0x13   :  { %5586 = sst [smem:[#allocation46_spill]] %s4846_s8 }
  0x14   :  { %s4876_s12 = sld [smem:[%s5570_s0 + %s4750_s7]]   ;;  %s4754_s7 = smov 18  }
  0x15   :  { %5587 = sst [smem:[#allocation47_spill]] %s4856_s19 }
  0x16   :  { %s4881_s20 = sld [smem:[%s5570_s0 + %s4751_s15]]   ;;  %s4755_s15 = smov 19  }
  0x17   :  { %5588 = sst [smem:[#allocation48_spill]] %s4866_s30 }
  0x18   :  { %s4886_s27 = sld [smem:[%s5570_s0 + %s4752_s22]]   ;;  %s4756_s22 = smov 20  }
  0x19   :  { %s4891_s4 = sld [smem:[%s5570_s0 + %s4753_s28]]   ;;  %s4757_s28 = smov 21  }
  0x1a   :  { %5589 = sst [smem:[#allocation49_spill]] %s4876_s12 }
  0x1b   :  { %s4896_s12 = sld [smem:[%s5570_s0 + %s4754_s7]]   ;;  %s4758_s7 = smov 22  }
  0x1c   :  { %s4901_s9 = sld [smem:[%s5570_s0 + %s4755_s15]]   ;;  %s4759_s15 = smov 23  }
  0x1d   :  { %s4911_s30 = sld [smem:[%s5570_s0 + %s4757_s28]]   ;;  %s4761_s28 = smov 25  }
  0x1e   :  { %5590 = sst [smem:[#allocation50_spill]] %s4886_s27 }
  0x1f   :  { %s4906_s27 = sld [smem:[%s5570_s0 + %s4756_s22]]   ;;  %s4760_s22 = smov 24  }
  0x20   :  { %s4921_s19 = sld [smem:[%s5570_s0 + %s4759_s15]]   ;;  %s4763_s15 = smov 27  }
  0x21   :  { %5591 = sst [smem:[#allocation51_spill]] %s4896_s12 }
  0x22   :  { %s4916_s12 = sld [smem:[%s5570_s0 + %s4758_s7]]   ;;  %s4762_s7 = smov 26  }
  0x23   :  { %5593 = sst [smem:[#allocation53_spill]] %s4911_s30 }
  0x24   :  { %s4931_s30 = sld [smem:[%s5570_s0 + %s4761_s28]]   ;;  %s4765_s28 = smov 29  }
  0x25   :  { %5592 = sst [smem:[#allocation52_spill]] %s4906_s27 }
  0x26   :  { %s4926_s27 = sld [smem:[%s5570_s0 + %s4760_s22]]   ;;  %s4764_s22 = smov 28  }
  0x27   :  { %s4936_s21 = sld [smem:[%s5570_s0 + %s4762_s7]]   ;;  %s4766_s7 = smov 30  }
  0x28   :  { %s4941_s8 = sld [smem:[%s5570_s0 + %s4763_s15]]   ;;  %s4767_s15 = smov 31  }
  0x29   :  { %s4951_s17 = sld [smem:[%s5570_s0 + %s4765_s28]]   ;;  %s4769_s28 = smov 33  }
  0x2a   :  { %s4956_s13 = sld [smem:[%s5570_s0 + %s4766_s7]]   ;;  %s4770_s7 = smov 34  }
  0x2c   :  { %5594 = sst [smem:[#allocation54_spill]] %s4926_s27 }
  0x2d   :  { %5595 = sst [smem:[#allocation55_spill]] %s4936_s21 }
  0x2e   :  { %s4946_s27 = sld [smem:[%s5570_s0 + %s4764_s22]]   ;;  %s4768_s22 = smov 32  }
  0x2f   :  { %5597 = sst [smem:[#allocation57_spill]] %s4951_s17 }
  0x30   :  { %5598 = sst [smem:[#allocation58_spill]] %s4956_s13 }
  0x31   :  { %s4961_s21 = sld [smem:[%s5570_s0 + %s4767_s15]]  }
  0x32   :  { %s4971_s17 = sld [smem:[%s5570_s0 + %s4769_s28]]  }
  0x33   :  { %s4976_s13 = sld [smem:[%s5570_s0 + %s4770_s7]]  }
  0x34   :  { %5596 = sst [smem:[#allocation56_spill]] %s4946_s27 }
  0x35   :  { %s4966_s27 = sld [smem:[%s5570_s0 + %s4768_s22]]  }
  0x36   :  { %75 = vsyncpa [#allocation5], 0 }
  0x37   :  { %76 = vsyncpa [#allocation3], 0 }
  0x38   :  { %77 = vsyncpa [#allocation8], 0 }
  0x39   :  { %78 = vsyncpa [#allocation11], 0 }
  0x3a   :  { %79 = vsyncpa [#allocation14], 0 }
  0x3b   :  { %80 = vsyncpa [#allocation17], 0 }
  0x3c   :  { %81 = vsyncpa [#allocation20], 0 }
  0x3d   :  { %82 = vsyncpa [#allocation23], 0 }
  0x3e   :  { %83 = vsyncpa [#allocation26], 0 }
  0x3f   :  { %84 = vsyncpa [#allocation29], 0 }
  0x40   :  { %85 = vsyncpa [#allocation4], 0  ;;  %s4771_s15 = smov [#allocation7]   ;;  %s4772_s18 = smov [#allocation10]  }
  0x41   :  { %s118_s16 = sshll.u32 %s4771_s15, 4  ;;  %s139_s22 = sshll.u32 %s4772_s18, 4  ;;  %s119_s16 = int_to_ptr.vmem [resolvable:$true] %s118_s16  ;;  %s140_s22 = int_to_ptr.vmem [resolvable:$true] %s139_s22 }
  0x42   :  { %s4375_s23 = scalar_lea.vmem %s119_s16, 16  ;;  %s4379_s0 = scalar_lea.vmem %s119_s16, 32 }
  0x43   :  { %p4376_p0 = scmp.ne.s32.totalorder %s119_s16, %s4375_s23  ;;  %p4380_p1 = scmp.lt.s32.totalorder %s119_s16, %s119_s16 }
  0x44   :  { %p4381_p2 = scmp.lt.s32.totalorder %s4379_s0, %s4375_s23 }
  0x46   :  { %p4382_p3 = por %p4381_p2, %p4380_p1 }
  0x48   :  { %p4383_p4 = pnand %p4382_p3, %p4376_p0 }
  0x4a   :  { %4386 = shalt.err (!%p4383_p4)
}
  0x4b   :  { %121 = dma.hbm_to_vmem [thread:$0]  %s4836_s29, 16, %s119_s16, [#allocation8]  }
  0x4c   :  { %s4395_s26 = scalar_lea.vmem %s140_s22, 32  ;;  %p4400_p6 = scmp.lt.s32.totalorder %s140_s22, %s140_s22 }
  0x4d   :  { %p4396_p5 = scmp.ne.s32.totalorder %s140_s22, %s4395_s26  ;;  %p4401_p7 = scmp.lt.s32.totalorder %s4395_s26, %s4395_s26 }
  0x4f   :  { %p4402_p8 = por %p4401_p7, %p4400_p6 }
  0x51   :  { %p4403_p9 = pnand %p4402_p8, %p4396_p5 }
  0x53   :  { %4406 = shalt.err (!%p4403_p9)
}
  0x54   :  { %s4773_s28 = smov 16   ;;  %s4774_s1 = smov 1  }
  0x55   :  { %145 = dma.hbm_to_vmem [thread:$0]  %s4851_s14, 32, %s140_s22, [#allocation11], %s4773_s28, %s4773_s28, %s4774_s1  }
  0x56   :  { %s4775_s2 = smov [#allocation13]   ;;  %s4776_s10 = smov [#allocation16]  }
  0x57   :  { %s167_s7 = sshll.u32 %s4775_s2, 4  ;;  %s195_s11 = sshll.u32 %s4776_s10, 4  ;;  %s168_s7 = int_to_ptr.vmem [resolvable:$true] %s167_s7  ;;  %s196_s11 = int_to_ptr.vmem [resolvable:$true] %s195_s11 }
  0x58   :  { %s4415_s29 = scalar_lea.vmem %s168_s7, 32  ;;  %p4420_p11 = scmp.lt.s32.totalorder %s168_s7, %s168_s7 }
  0x59   :  { %p4416_p10 = scmp.ne.s32.totalorder %s168_s7, %s4415_s29  ;;  %p4421_p12 = scmp.lt.s32.totalorder %s4415_s29, %s4415_s29 }
  0x5b   :  { %p4422_p13 = por %p4421_p12, %p4420_p11 }
  0x5d   :  { %p4423_p0 = pnand %p4422_p13, %p4416_p10 }
  0x5f   :  { %4426 = shalt.err (!%p4423_p0)
}
  0x60   :  { %173 = dma.hbm_to_vmem [thread:$0]  %s4871_s6, 32, %s168_s7, [#allocation14], %s4773_s28, %s4773_s28, %s4774_s1  }
  0x61   :  { %s4435_s15 = scalar_lea.vmem %s196_s11, 32  ;;  %p4440_p2 = scmp.lt.s32.totalorder %s196_s11, %s196_s11 }
  0x62   :  { %p4436_p1 = scmp.ne.s32.totalorder %s196_s11, %s4435_s15  ;;  %p4441_p3 = scmp.lt.s32.totalorder %s4435_s15, %s4435_s15 }
  0x64   :  { %p4442_p4 = por %p4441_p3, %p4440_p2 }
  0x66   :  { %p4443_p5 = pnand %p4442_p4, %p4436_p1 }
  0x68   :  { %4446 = shalt.err (!%p4443_p5)
}
  0x69   :  { %201 = dma.hbm_to_vmem [thread:$0]  %s4891_s4, 32, %s196_s11, [#allocation17], %s4773_s28, %s4773_s28, %s4774_s1  }
  0x6a   :  { %s4777_s14 = smov [#allocation19]  }
  0x6b   :  { %s225_s16 = sshll.u32 %s4777_s14, 4  ;;  %s226_s16 = int_to_ptr.vmem [resolvable:$true] %s225_s16 }
  0x6c   :  { %s4455_s18 = scalar_lea.vmem %s226_s16, 256  ;;  %p4460_p7 = scmp.lt.s32.totalorder %s226_s16, %s226_s16 }
  0x6d   :  { %p4456_p6 = scmp.ne.s32.totalorder %s226_s16, %s4455_s18  ;;  %p4461_p8 = scmp.lt.s32.totalorder %s4455_s18, %s4455_s18 }
  0x6f   :  { %p4462_p9 = por %p4461_p8, %p4460_p7 }
  0x71   :  { %p4463_p10 = pnand %p4462_p9, %p4456_p6 }
  0x73   :  { %4466 = shalt.err (!%p4463_p10)
}
  0x74   :  { %s4778_s6 = smov 128   ;;  %s4779_s22 = smov 8  }
  0x75   :  { %231 = dma.hbm_to_vmem [thread:$0]  %s4916_s12, 256, %s226_s16, [#allocation20], %s4778_s6, %s4778_s6, %s4779_s22  }
  0x76   :  { %s4780_s23 = smov [#allocation22]   ;;  %s4781_s4 = smov [#allocation25]  }
  0x77   :  { %s251_s0 = sshll.u32 %s4780_s23, 4  ;;  %s275_s26 = sshll.u32 %s4781_s4, 4  ;;  %s252_s0 = int_to_ptr.vmem [resolvable:$true] %s251_s0  ;;  %s276_s26 = int_to_ptr.vmem [resolvable:$true] %s275_s26 }
  0x78   :  { %s4475_s2 = scalar_lea.vmem %s252_s0, 256  ;;  %p4480_p12 = scmp.lt.s32.totalorder %s252_s0, %s252_s0 }
  0x79   :  { %p4476_p11 = scmp.ne.s32.totalorder %s252_s0, %s4475_s2  ;;  %p4481_p13 = scmp.lt.s32.totalorder %s4475_s2, %s4475_s2 }
  0x7b   :  { %p4482_p0 = por %p4481_p13, %p4480_p12 }
  0x7d   :  { %p4483_p1 = pnand %p4482_p0, %p4476_p11 }
  0x7f   :  { %4486 = shalt.err (!%p4483_p1)
}
  0x80   :  { %257 = dma.hbm_to_vmem [thread:$0]  %s4931_s30, 256, %s252_s0, [#allocation23], %s4778_s6, %s4778_s6, %s4779_s22  }
  0x81   :  { %s4495_s7 = scalar_lea.vmem %s276_s26, 256  ;;  %p4500_p3 = scmp.lt.s32.totalorder %s276_s26, %s276_s26 }
  0x82   :  { %p4496_p2 = scmp.ne.s32.totalorder %s276_s26, %s4495_s7  ;;  %p4501_p4 = scmp.lt.s32.totalorder %s4495_s7, %s4495_s7 }
  0x84   :  { %p4502_p5 = por %p4501_p4, %p4500_p3 }
  0x86   :  { %p4503_p6 = pnand %p4502_p5, %p4496_p2 }
  0x88   :  { %4506 = shalt.err (!%p4503_p6)
}
  0x89   :  { %281 = dma.hbm_to_vmem [thread:$0]  %s4941_s8, 256, %s276_s26, [#allocation26], %s4778_s6, %s4778_s6, %s4779_s22  }
  0x8a   :  { %s4782_s12 = smov [#allocation2]   ;;  %s4783_s10 = smov [#allocation6]  }
  0x8b   :  { %93 = dma.hbm_to_smem %s4806_s5, 16, %s4782_s12, [#allocation5]  }
  0x8c   :  { %s108_s11 = sshll.u32 %s4783_s10, 4  ;;  %s4784_s29 = smov [#allocation9]   ;;  %s109_s11 = int_to_ptr.vmem [resolvable:$true] %s108_s11 }
  0x8d   :  { %s128_s30 = sshll.u32 %s4784_s29, 4  ;;  %s4523_s15 = scalar_lea.vmem %s109_s11, 64  ;;  %s129_s30 = int_to_ptr.vmem [resolvable:$true] %s128_s30 }
  0x8e   :  { %p4524_p7 = scmp.ne.s32.totalorder %s109_s11, %s4523_s15  ;;  %p4528_p8 = scmp.lt.s32.totalorder %s109_s11, %s109_s11 }
  0x8f   :  { %p4529_p9 = scmp.lt.s32.totalorder %s4523_s15, %s4523_s15 }
  0x91   :  { %p4530_p10 = por %p4529_p9, %p4528_p8 }
  0x93   :  { %p4531_p11 = pnand %p4530_p10, %p4524_p7 }
  0x95   :  { %4534 = shalt.err (!%p4531_p11)
}
  0x96   :  { %111 = dma.hbm_to_vmem [thread:$0]  %s4831_s25, 64, %s109_s11, [#allocation3]  }
  0x97   :  { %s4543_s14 = scalar_lea.vmem %s129_s30, 16  ;;  %s4547_s8 = scalar_lea.vmem %s129_s30, 32 }
  0x98   :  { %p4544_p12 = scmp.ne.s32.totalorder %s129_s30, %s4543_s14  ;;  %p4548_p13 = scmp.lt.s32.totalorder %s129_s30, %s129_s30 }
  0x99   :  { %p4549_p0 = scmp.lt.s32.totalorder %s4547_s8, %s4543_s14 }
  0x9b   :  { %p4550_p1 = por %p4549_p0, %p4548_p13 }
  0x9d   :  { %p4551_p2 = pnand %p4550_p1, %p4544_p12 }
  0x9f   :  { %4554 = shalt.err (!%p4551_p2)
}
  0xa0   :  { %131 = dma.hbm_to_vmem [thread:$0]  %s4841_s3, 16, %s129_s30, [#allocation8]  }
  0xa1   :  { %s4785_s5 = smov [#allocation12]   ;;  %s4786_s18 = smov [#allocation15]  }
  0xa2   :  { %s153_s16 = sshll.u32 %s4785_s5, 4  ;;  %s181_s23 = sshll.u32 %s4786_s18, 4  ;;  %s154_s16 = int_to_ptr.vmem [resolvable:$true] %s153_s16  ;;  %s182_s23 = int_to_ptr.vmem [resolvable:$true] %s181_s23 }
  0xa3   :  { %s4563_s0 = scalar_lea.vmem %s154_s16, 32  ;;  %p4568_p4 = scmp.lt.s32.totalorder %s154_s16, %s154_s16 }
  0xa4   :  { %p4564_p3 = scmp.ne.s32.totalorder %s154_s16, %s4563_s0  ;;  %p4569_p5 = scmp.lt.s32.totalorder %s4563_s0, %s4563_s0 }
  0xa6   :  { %p4570_p6 = por %p4569_p5, %p4568_p4 }
  0xa8   :  { %p4571_p7 = pnand %p4570_p6, %p4564_p3 }
  0xaa   :  { %4574 = shalt.err (!%p4571_p7)
}
  0xab   :  { %159 = dma.hbm_to_vmem [thread:$0]  %s4861_s24, 32, %s154_s16, [#allocation11], %s4773_s28, %s4773_s28, %s4774_s1  }
  0xac   :  { %s4583_s25 = scalar_lea.vmem %s182_s23, 32  ;;  %p4588_p9 = scmp.lt.s32.totalorder %s182_s23, %s182_s23 }
  0xad   :  { %p4584_p8 = scmp.ne.s32.totalorder %s182_s23, %s4583_s25  ;;  %p4589_p10 = scmp.lt.s32.totalorder %s4583_s25, %s4583_s25 }
  0xaf   :  { %p4590_p11 = por %p4589_p10, %p4588_p9 }
  0xb1   :  { %p4591_p12 = pnand %p4590_p11, %p4584_p8 }
  0xb3   :  { %4594 = shalt.err (!%p4591_p12)
}
  0xb4   :  { %187 = dma.hbm_to_vmem [thread:$0]  %s4881_s20, 32, %s182_s23, [#allocation14], %s4773_s28, %s4773_s28, %s4774_s1  }
  0xb5   :  { %s4787_s3 = smov [#allocation18]   ;;  %s4788_s26 = smov [#allocation21]  }
  0xb6   :  { %s209_s4 = sshll.u32 %s4787_s3, 4  ;;  %s237_s2 = sshll.u32 %s4788_s26, 4  ;;  %s210_s4 = int_to_ptr.vmem [resolvable:$true] %s209_s4  ;;  %s238_s2 = int_to_ptr.vmem [resolvable:$true] %s237_s2 }
  0xb7   :  { %s4603_s7 = scalar_lea.vmem %s210_s4, 32  ;;  %p4608_p0 = scmp.lt.s32.totalorder %s210_s4, %s210_s4 }
  0xb8   :  { %p4604_p13 = scmp.ne.s32.totalorder %s210_s4, %s4603_s7  ;;  %p4609_p1 = scmp.lt.s32.totalorder %s4603_s7, %s4603_s7 }
  0xba   :  { %p4610_p2 = por %p4609_p1, %p4608_p0 }
  0xbc   :  { %p4611_p3 = pnand %p4610_p2, %p4604_p13 }
  0xbe   :  { %4614 = shalt.err (!%p4611_p3)
}
  0xbf   :  { %215 = dma.hbm_to_vmem [thread:$0]  %s4901_s9, 32, %s210_s4, [#allocation17], %s4773_s28, %s4773_s28, %s4774_s1  }
  0xc0   :  { %s4623_s24 = scalar_lea.vmem %s238_s2, 256  ;;  %p4628_p5 = scmp.lt.s32.totalorder %s238_s2, %s238_s2 }
  0xc1   :  { %p4624_p4 = scmp.ne.s32.totalorder %s238_s2, %s4623_s24  ;;  %p4629_p6 = scmp.lt.s32.totalorder %s4623_s24, %s4623_s24 }
  0xc3   :  { %p4630_p7 = por %p4629_p6, %p4628_p5 }
  0xc5   :  { %p4631_p8 = pnand %p4630_p7, %p4624_p4 }
  0xc7   :  { %4634 = shalt.err (!%p4631_p8)
}
  0xc8   :  { %243 = dma.hbm_to_vmem [thread:$0]  %s4921_s19, 256, %s238_s2, [#allocation20], %s4778_s6, %s4778_s6, %s4779_s22  }
  0xc9   :  { %s4789_s20 = smov [#allocation24]   ;;  %s4790_s10 = smov [#allocation27]  }
  0xca   :  { %s263_s12 = sshll.u32 %s4789_s20, 4  ;;  %s287_s11 = sshll.u32 %s4790_s10, 4  ;;  %s264_s12 = int_to_ptr.vmem [resolvable:$true] %s263_s12  ;;  %s288_s11 = int_to_ptr.vmem [resolvable:$true] %s287_s11 }
  0xcb   :  { %s4643_s29 = scalar_lea.vmem %s264_s12, 256  ;;  %p4648_p10 = scmp.lt.s32.totalorder %s264_s12, %s264_s12 }
  0xcc   :  { %p4644_p9 = scmp.ne.s32.totalorder %s264_s12, %s4643_s29  ;;  %p4649_p11 = scmp.lt.s32.totalorder %s4643_s29, %s4643_s29 }
  0xce   :  { %p4650_p12 = por %p4649_p11, %p4648_p10 }
  0xd0   :  { %p4651_p13 = pnand %p4650_p12, %p4644_p9 }
  0xd2   :  { %4654 = shalt.err (!%p4651_p13)
}
  0xd3   :  { %s5599_s9 = sld [smem:[#allocation55_spill]]  ;;  %s4663_s28 = scalar_lea.vmem %s288_s11, 256 }
  0xd4   :  { %p4664_p0 = scmp.ne.s32.totalorder %s288_s11, %s4663_s28  ;;  %p4668_p1 = scmp.lt.s32.totalorder %s288_s11, %s288_s11 }
  0xd5   :  { %p4669_p2 = scmp.lt.s32.totalorder %s4663_s28, %s4663_s28 }
  0xd7   :  { %p4670_p3 = por %p4669_p2, %p4668_p1 }
  0xd9   :  { %269 = dma.hbm_to_vmem [thread:$0]  %s5599_s9, 256, %s264_s12, [#allocation23], %s4778_s6, %s4778_s6, %s4779_s22  }
  0xda   :  { %p4671_p4 = pnand %p4670_p3, %p4664_p0 }
  0xdc   :  { %4674 = shalt.err (!%p4671_p4)
}
  0xdd   :  { %s5600_s19 = sld [smem:[#allocation56_spill]]  ;;  %s4791_s1 = smov [#allocation28]  }
  0xde   :  { %s299_s30 = sshll.u32 %s4791_s1, 4  ;;  %s300_s30 = int_to_ptr.vmem [resolvable:$true] %s299_s30 }
  0xdf   :  { %s4683_s15 = scalar_lea.vmem %s300_s30, 256  ;;  %p4688_p6 = scmp.lt.s32.totalorder %s300_s30, %s300_s30 }
  0xe0   :  { %p4684_p5 = scmp.ne.s32.totalorder %s300_s30, %s4683_s15  ;;  %p4689_p7 = scmp.lt.s32.totalorder %s4683_s15, %s4683_s15 }
  0xe2   :  { %p4690_p8 = por %p4689_p7, %p4688_p6 }
  0xe3   :  { %293 = dma.hbm_to_vmem [thread:$0]  %s5600_s19, 256, %s288_s11, [#allocation26], %s4778_s6, %s4778_s6, %s4779_s22  }
  0xe4   :  { %p4691_p9 = pnand %p4690_p8, %p4684_p5 }
  0xe6   :  { %4694 = shalt.err (!%p4691_p9)
}
  0xe7   :  { %s5601_s14 = sld [smem:[#allocation57_spill]] }
  0xed   :  { %305 = dma.hbm_to_vmem [thread:$0]  %s5601_s14, 256, %s300_s30, [#allocation29], %s4778_s6, %s4778_s6, %s4779_s22  }
  0xee   :  { %4715 = dma.done.wait [#allocation5], 16  }
  0xef   :  { %4716 = vsyncadd [#allocation5], 4294967280 }
  0xf0   :  { %4717 = dma.done.wait [#allocation3], 64  }
  0xf1   :  { %4718 = vsyncadd [#allocation3], 4294967232 }
  0xf2   :  { %4719 = dma.done.wait [#allocation8], 32  }
  0xf3   :  { %4720 = vsyncadd [#allocation8], 4294967264 }
  0xf4   :  { %4721 = dma.done.wait [#allocation11], 64  }
  0xf5   :  { %4722 = vsyncadd [#allocation11], 4294967232 }
  0xf6   :  { %4723 = dma.done.wait [#allocation14], 64  }
  0xf7   :  { %4724 = vsyncadd [#allocation14], 4294967232 }
  0xf8   :  { %4725 = dma.done.wait [#allocation17], 64  }
  0xf9   :  { %4726 = vsyncadd [#allocation17], 4294967232 }
  0xfa   :  { %4727 = dma.done.wait [#allocation20], 512  }
  0xfb   :  { %4728 = vsyncadd [#allocation20], 4294966784 }
  0xfc   :  { %4729 = dma.done.wait [#allocation23], 512  }
  0xfd   :  { %4730 = vsyncadd [#allocation23], 4294966784 }
  0xfe   :  { %4731 = dma.done.wait [#allocation26], 512  }
  0xff   :  { %4732 = vsyncadd [#allocation26], 4294966784 }
 0x100   :  { %4733 = dma.done.wait [#allocation29], 256  }
 0x101   :  { %4734 = vsyncadd [#allocation29], 4294967040 }
 0x102   :  { %357 = sfence }
 0x103   :  { %s363_s6 = sld [smem:[#allocation2]]  ;;  %vm372_vm0 = vcmask 1040384   ;;  %vm384_vm1 = vcmask 254976   ;;  %v4792_v13 = vmov 0.0   ;;  %vm4793_vm2 = vmmov 0   ;;  %v502_v26 = vld [vmem:[#allocation19] sm:$0xff] }
 0x104   :  { %s5602_s22 = sld [smem:[#allocation43_spill]]  ;;  %3932 = vmatprep.subr.mxu0 %v4792_v13  ;;  %3940 = vmatprep.mubr.msk.f32.mxu0 %vm4793_vm2, %v4792_v13  ;;  %v3658_v21 = vld [vmem:[#allocation7] ss:$0 sm:$0xff]  ;;  %v3659_v23 = vld [vmem:[#allocation9] ss:$0 sm:$0xff]  ;;  %vm427_vm3 = vcmask 261120   ;;  %v508_v33 = vlaneseq }
 0x105   :  { %s5603_s8 = sld [smem:[#allocation44_spill]]  ;;  %1110 = vst.msk [vmem:[%s4961_s21] sm:$0xff] %vm427_vm3, %v502_v26  ;;  %v503_v27 = vld [vmem:[#allocation19 + $0x8] sm:$0xff]  ;;  %v4794_v31 = vmov 1966171168   ;;  %s4795_s25 = smov 64  }
 0x106   :  { %s3656_s5 = sld [smem:[#allocation2 + $0x1]]  ;;  %1112 = vst.msk [vmem:[%s4961_s21 + $0x10] sm:$0xff] %vm427_vm3, %v503_v27  ;;  %v506_v32 = vunpack.c.l.s4 %v4794_v31  ;;  %v5075_v36 = vshrl.u32 %v508_v33, 7  ;;  %v3660_v37 = vld [vmem:[#allocation10] ss:$0 sm:$0xff]  ;;  %s4796_s3 = smov 96  }
 0x107   :  { %s5604_s23 = sld [smem:[#allocation46_spill]]  ;;  %vm975_vm4 = vcmask 253952   ;;  %vm810_vm5 = vcmask 1043456   ;;  %vm750_vm6 = vcmask 24576   ;;  %vm748_vm7 = vcmask 31744  }
 0x108   :  { %s5605_s0 = sld [smem:[#allocation45_spill]]  ;;  %v507_v35 = vunpack.c.0.s8 %v506_v32  ;;  %v5085_v44 = vsub.s32 0, %v5075_v36  ;;  %vm1006_vm8 = vcmask 1041409   ;;  %vm1828_vm9 = vcmask 523264  }
 0x109   :  { %s5608_s4 = sld [smem:[#allocation52_spill]] }
 0x10a   :  { %s364_s16 = scalar_lea.vmem %s5602_s22, %s363_s6  ;;  %v5081_v38 = vsub.s32 %v507_v35, %v5075_v36  ;;  %s5609_s26 = sld [smem:[#allocation53_spill]] }
 0x10b   :  { %v365_v0 = vld [vmem:[%s364_s16] sm:$0x1]  ;;  %s5610_s2 = sld [smem:[#allocation42_spill]] }
 0x10c   :  { %s367_s18 = scalar_lea.vmem %s5602_s22, %s3656_s5  ;;  %v3657_v3 = vld [vmem:[%s5603_s8] ss:$0 sm:$0xff]  ;;  %s5611_s7 = sld [smem:[#allocation54_spill]] }
 0x10d   :  { %v368_v1 = vld [vmem:[%s367_s18] sm:$0x1]  ;;  %v419_v12 = vld [vmem:[%s5604_s23 + $0x18] sm:$0xff]  ;;  %v418_v14 = vld [vmem:[%s5604_s23 + $0x10] sm:$0xff]  ;;  %s5612_s24 = sld [smem:[#allocation49_spill]] }
 0x10e   :  { %v370_v2 = vrot.slane %v368_v1, 7  ;;  %3933 = vmatpush3.msra.mxu0 %v419_v12  ;;  %v417_v15 = vld [vmem:[%s5604_s23 + $0x8] sm:$0xff]  ;;  %v416_v16 = vld [vmem:[%s5604_s23] sm:$0xff]  ;;  %v5058_v28 = vld [vmem:[%s5605_s0 + $0x18] sm:$0xff]  ;;  %s5613_s20 = sld [smem:[#allocation50_spill]] }
 0x10f   :  { %3934 = vmatprep.subr.mxu0 %v4792_v13  ;;  %v5061_v29 = vld [vmem:[%s5605_s0 + $0x10] sm:$0xff]  ;;  %v5066_v30 = vld [vmem:[%s5605_s0 + $0x8] sm:$0xff]  ;;  %v5073_v34 = vld [vmem:[%s5605_s0] sm:$0xff]  ;;  %s5614_s12 = sld [smem:[#allocation51_spill]] }
 0x110   :  { %v373_v4 = vsel %vm372_vm0, %v365_v0, %v370_v2  ;;  %3935 = vmatpush3.msra.mxu0 %v418_v14  ;;  %v5128_v0 = vld [vmem:[#allocation6] sm:$0xf] }
 0x111   :  { %v381_v5 = vadd.f32 %v3657_v3, %v373_v4  ;;  %3936 = vmatprep.subr.mxu0 %v4792_v13  ;;  %3965 = vmatprep.subr.msk.mxu1 %vm810_vm5, %v5128_v0 }
 0x112   :  { %3937 = vmatpush3.msra.mxu0 %v417_v15  ;;  %3966 = vmatpush3.msk.msra.mxu1 %vm810_vm5, %v5128_v0 }
 0x113   :  { %v385_v6 = vsel %vm384_vm1, %v381_v5, 0.0  ;;  %3938 = vmatprep.subr.mxu0 %v4792_v13  ;;  %3970 = vmatprep.subr.msk.mxu1 %vm810_vm5, %v5128_v0 }
 0x114   :  { %386 = vadd.xlane.f32.xlu0 %v385_v6  ;;  %3939 = vmatpush3.msra.mxu0 %v416_v16 }
 0x115   :  { %3943 = vmatprep.subr.mxu0 %v5058_v28 }
 0x19d   :  { %v387_v7 = vpop.xlane.xlu0 %386 }
 0x19e   :  { %v389_v8 = vmul.f32 0.03125, %v387_v7 }
 0x1a0   :  { %v390_v9 = vsub.f32 %v381_v5, %v389_v8 }
 0x1a2   :  { %v391_v10 = vmul.f32 %v390_v9, %v390_v9 }
 0x1a4   :  { %v392_v11 = vsel %vm384_vm1, %v391_v10, 0.0 }
 0x1a5   :  { %393 = vadd.xlane.f32.xlu0 %v392_v11 }
 0x22e   :  { %v394_v17 = vpop.xlane.xlu0 %393 }
 0x22f   :  { %v395_v18 = vmul.f32 0.03125, %v394_v17 }
 0x231   :  { %v396_v19 = vadd.f32 1e-05, %v395_v18 }
 0x233   :  { %4304 = vrsqrt.f32 %v396_v19 }
 0x240   :  { %v4305_v20 = vpop.eup %4304 }
 0x241   :  { %v398_v22 = vmul.f32 %v4305_v20, %v390_v9 }
 0x243   :  { %v405_v24 = vmul.f32 %v3658_v21, %v398_v22 }
 0x245   :  { %v5049_v25 = vadd.f32 %v3659_v23, %v405_v24 }
 0x247   :  { %3941 = vmatmul.mubr.msk.f32.vlgmr.msra.gmra.mxu0 %vm427_vm3, %v5049_v25 }
 0x248   :  { %3944 = vmatpush3.msra.mxu0 %v5058_v28 }
 0x249   :  { %3945 = vmatprep.subr.mxu0 %v5061_v29 }
 0x24a   :  { %3946 = vmatpush3.msra.mxu0 %v5061_v29 }
 0x24b   :  { %3947 = vmatprep.subr.mxu0 %v5066_v30 }
 0x24c   :  { %3948 = vmatpush3.msra.mxu0 %v5066_v30 }
 0x24d   :  { %3949 = vmatprep.subr.mxu0 %v5073_v34 }
 0x24e   :  { %3950 = vmatpush3.msra.mxu0 %v5073_v34 }
 0x24f   :  { %3954 = vmatprep.subr.mxu0 %v5058_v28 }
 0x307   :  { %v497_v39 = vpop.f32.mrf.mxu0 }
 0x308   :  { %v498_v40 = vadd.f32 %v3660_v37, %v497_v39 }
 0x309   :  { %v3942_v41 = vpop.f32.mrf.mxu0 }
 0x30a   :  { %v501_v42 = vmul.f32 0.35355338, %v498_v40  ;;  %v511_v43 = vrot.slane %v498_v40, %v5081_v38 }
 0x30c   :  { %v512_v45 = vcombine.high %v511_v43, %v511_v43  ;;  %v519_v46 = vrot.slane %v511_v43, %v5081_v38  ;;  %v556_v47 = vrot.slane %v501_v42, %v5081_v38 }
 0x30e   :  { %v564_v48 = vrot.slane %v556_v47, %v5081_v38  ;;  %v530_v49 = vrot.slane %v519_v46, %v5085_v44  ;;  %v526_v50 = vrot.slane %v512_v45, %v5081_v38  ;;  %v557_v54 = vcombine.high %v556_v47, %v556_v47 }
 0x310   :  { %v575_v51 = vrot.slane %v564_v48, %v5085_v44  ;;  %543 = vrot.lane.b32.xlu0 %v530_v49, %s4795_s25  ;;  %535 = vrot.lane.b32.xlu1 %v530_v49, %s4796_s3  ;;  %v534_v52 = vrot.slane %v526_v50, %v5085_v44  ;;  %v571_v55 = vrot.slane %v557_v54, %v5081_v38 }
 0x312   :  { %v582_v53 = vmul.f32 %v575_v51, %v502_v26  ;;  %v579_v56 = vrot.slane %v571_v55, %v5085_v44 }
 0x314   :  { %537 = vrot.lane.b32.xlu1 %v534_v52, %s4796_s3  ;;  %3951 = vmatprep.mubr.msk.f32.mxu0 %vm427_vm3, %v582_v53  ;;  %v584_v60 = vmul.f32 %v579_v56, %v503_v27 }
 0x318   :  { %545 = vrot.lane.b32.xlu1 %v534_v52, %s4795_s25 }
 0x382   :  { %v5101_v57 = vpop.permute.xlu0 %543  ;;  %v536_v58 = vpop.permute.xlu1 %535 }
 0x383   :  { %1115 = vst.msk [vmem:[%s4966_s27 + $0x8] sm:$0x1] %vm975_vm4, %v5101_v57  ;;  %v583_v59 = vmul.f32 %v575_v51, %v536_v58  ;;  %1111 = vst.msk [vmem:[%s4961_s21 + $0x8] sm:$0x1] %vm975_vm4, %v536_v58 }
 0x385   :  { %3952 = vmatmul.mubr.msk.f32.vlgmr.msra.gmra.mxu0 %vm427_vm3, %v583_v59 }
 0x386   :  { %3955 = vmatpush3.msra.mxu0 %v5058_v28  ;;  %v538_v61 = vpop.permute.xlu1 %537  ;;  %3962 = vmatprep.mubr.msk.f32.mxu0 %vm427_vm3, %v584_v60 }
 0x387   :  { %1113 = vst.msk [vmem:[%s4961_s21 + $0x18] sm:$0x1] %vm975_vm4, %v538_v61  ;;  %3956 = vmatprep.subr.mxu0 %v5061_v29  ;;  %v585_v63 = vmul.f32 %v579_v56, %v538_v61  ;;  %s5606_s21 = sld [smem:[#allocation47_spill]] }
 0x388   :  { %3957 = vmatpush3.msra.mxu0 %v5061_v29 }
 0x389   :  { %3958 = vmatprep.subr.mxu0 %v5066_v30 }
 0x38a   :  { %3959 = vmatpush3.msra.mxu0 %v5066_v30  ;;  %v5117_v62 = vpop.permute.xlu1 %545 }
 0x38b   :  { %1117 = vst.msk [vmem:[%s4966_s27 + $0x18] sm:$0x1] %vm975_vm4, %v5117_v62  ;;  %3960 = vmatprep.subr.mxu0 %v5073_v34 }
 0x38c   :  { %3961 = vmatpush3.msra.mxu0 %v5073_v34 }
 0x38d   :  { %3963 = vmatmul.mubr.msk.f32.vlgmr.msra.gmra.mxu0 %vm427_vm3, %v585_v63  ;;  %3975 = vmatprep.subr.mxu0 %v4792_v13 }
 0x38e   :  { %3983 = vmatprep.mubr.msk.f32.mxu0 %vm4793_vm2, %v4792_v13 }
 0x445   :  { %v3953_v1 = vpop.f32.mrf.mxu0 }
 0x446   :  { %v751_v3 = vsel %vm750_vm6, %v3953_v1, -inf }
 0x447   :  { %v658_v2 = vpop.f32.mrf.mxu0 }
 0x448   :  { %v749_v4 = vsel %vm748_vm7, %v658_v2, -inf }
 0x449   :  { %v752_v5 = vmax.f32 %v749_v4, %v751_v3 }
 0x44b   :  { %v753_v6 = vrot.slane %v752_v5, 4 }
 0x44d   :  { %v754_v7 = vmax.f32 %v752_v5, %v753_v6  ;;  %v3964_v8 = vpop.f32.mrf.mxu0 }
 0x44e   :  { %v760_v11 = vsel %vm750_vm6, %v3964_v8, -inf }
 0x44f   :  { %v755_v9 = vrot.slane %v754_v7, 2  ;;  %v739_v10 = vpop.f32.mrf.mxu0 }
 0x450   :  { %v759_v12 = vsel %vm748_vm7, %v739_v10, -inf }
 0x451   :  { %v756_v14 = vmax.f32 %v754_v7, %v755_v9  ;;  %v761_v15 = vmax.f32 %v759_v12, %v760_v11  ;;  %v541_v7 = vld [vmem:[#allocation21] sm:$0xff]  ;;  %v996_v9 = vld [vmem:[%s5606_s21 + $0x18] sm:$0xff] }
 0x452   :  { %1114 = vst.msk [vmem:[%s4966_s27] sm:$0xff] %vm427_vm3, %v541_v7  ;;  %3976 = vmatpush3.msra.mxu0 %v996_v9  ;;  %v994_v11 = vld [vmem:[%s5606_s21 + $0x8] sm:$0xff]  ;;  %v993_v12 = vld [vmem:[%s5606_s21] sm:$0xff] }
 0x453   :  { %v757_v16 = vrot.slane %v756_v14, 1  ;;  %v762_v17 = vrot.slane %v761_v15, 4  ;;  %3977 = vmatprep.subr.mxu0 %v4792_v13  ;;  %v413_v9 = vld [vmem:[%s5610_s2] sm:$0x3] }
 0x455   :  { %v758_v18 = vmax.f32 %v756_v14, %v757_v16  ;;  %v763_v19 = vmax.f32 %v761_v15, %v762_v17 }
 0x457   :  { %v768_v20 = vsub.f32 %v658_v2, %v758_v18  ;;  %v769_v21 = vsub.f32 %v3953_v1, %v758_v18  ;;  %v764_v22 = vrot.slane %v763_v19, 2 }
 0x459   :  { %v772_v23 = vmul.f32 1.442695, %v768_v20  ;;  %v774_v24 = vmul.f32 1.442695, %v769_v21  ;;  %v765_v26 = vmax.f32 %v763_v19, %v764_v22 }
 0x45b   :  { %4306 = vpow2.f32 %v772_v23  ;;  %v766_v27 = vrot.slane %v765_v26, 1 }
 0x45c   :  { %4308 = vpow2.f32 %v774_v24 }
 0x45d   :  { %v767_v31 = vmax.f32 %v765_v26, %v766_v27 }
 0x45f   :  { %v770_v32 = vsub.f32 %v739_v10, %v767_v31  ;;  %v771_v33 = vsub.f32 %v3964_v8, %v767_v31  ;;  %v542_v8 = vld [vmem:[#allocation21 + $0x8] sm:$0xff] }
 0x460   :  { %1116 = vst.msk [vmem:[%s4966_s27 + $0x10] sm:$0xff] %vm427_vm3, %v542_v8  ;;  %v995_v10 = vld [vmem:[%s5606_s21 + $0x10] sm:$0xff]  ;;  %s5607_s27 = sld [smem:[#allocation48_spill]] }
 0x461   :  { %v776_v35 = vmul.f32 1.442695, %v770_v32  ;;  %v778_v37 = vmul.f32 1.442695, %v771_v33  ;;  %3978 = vmatpush3.msra.mxu0 %v995_v10  ;;  %v414_v10 = vsub.f32 1.0, %v413_v9 }
 0x462   :  { %3979 = vmatprep.subr.mxu0 %v4792_v13 }
 0x463   :  { %4310 = vpow2.f32 %v776_v35  ;;  %3980 = vmatpush3.msra.mxu0 %v994_v11  ;;  %v1251_v11 = vsub.s32 1, %v5075_v36 }
 0x464   :  { %4312 = vpow2.f32 %v778_v37  ;;  %3981 = vmatprep.subr.mxu0 %v4792_v13 }
 0x465   :  { %3982 = vmatpush3.msra.mxu0 %v993_v12  ;;  %v415_v12 = vmul.f32 -1e+09, %v414_v10 }
 0x466   :  { %3986 = vmatprep.subr.mxu0 %v4792_v13 }
 0x468   :  { %v4307_v39 = vpop.eup %4306 }
 0x469   :  { %v4309_v40 = vpop.eup %4308  ;;  %v780_v41 = vsel %vm748_vm7, %v4307_v39, 0.0 }
 0x46a   :  { %v781_v42 = vsel %vm750_vm6, %v4309_v40, 0.0 }
 0x46b   :  { %v782_v43 = vadd.f32 %v781_v42, %v780_v41 }
 0x46d   :  { %v783_v45 = vrot.slane %v782_v43, 4 }
 0x46f   :  { %v784_v46 = vadd.f32 %v783_v45, %v782_v43 }
 0x470   :  { %v4311_v47 = vpop.eup %4310 }
 0x471   :  { %v4313_v48 = vpop.eup %4312  ;;  %v789_v49 = vsel %vm748_vm7, %v4311_v47, 0.0  ;;  %v785_v50 = vrot.slane %v784_v46, 2 }
 0x472   :  { %v790_v51 = vsel %vm750_vm6, %v4313_v48, 0.0 }
 0x473   :  { %v791_v52 = vadd.f32 %v790_v51, %v789_v49  ;;  %v786_v53 = vadd.f32 %v785_v50, %v784_v46 }
 0x475   :  { %v792_v54 = vrot.slane %v791_v52, 4  ;;  %v787_v55 = vrot.slane %v786_v53, 1 }
 0x477   :  { %v793_v56 = vadd.f32 %v792_v54, %v791_v52  ;;  %v788_v58 = vadd.f32 %v787_v55, %v786_v53 }
 0x479   :  { %v794_v59 = vrot.slane %v793_v56, 2  ;;  %4314 = vrcp.f32 %v788_v58 }
 0x47b   :  { %v795_v60 = vadd.f32 %v794_v59, %v793_v56  ;;  %v1121_v59 = vld [vmem:[%s5607_s27 + $0x18] sm:$0xff] }
 0x47d   :  { %v796_v61 = vrot.slane %v795_v60, 1 }
 0x47f   :  { %v797_v63 = vadd.f32 %v796_v61, %v795_v60  ;;  %v1120_v60 = vld [vmem:[%s5607_s27 + $0x10] sm:$0xff]  ;;  %v1119_v61 = vld [vmem:[%s5607_s27 + $0x8] sm:$0xff] }
 0x481   :  { %4316 = vrcp.f32 %v797_v63 }
 0x486   :  { %v4315_v1 = vpop.eup %4314 }
 0x487   :  { %v800_v2 = vmul.f32 %v4315_v1, %v4307_v39  ;;  %v801_v3 = vmul.f32 %v4315_v1, %v4309_v40 }
 0x489   :  { %3967 = vmatprep.mubr.msk.f32.mxu1 %vm748_vm7, %v800_v2 }
 0x48a   :  { %3968 = vmatmul.mubr.msk.f32.vlgmr.msra.gmra.mxu1 %vm748_vm7, %v801_v3 }
 0x48b   :  { %3971 = vmatpush3.msk.msra.mxu1 %vm810_vm5, %v5128_v0 }
 0x48c   :  { %4024 = vmatprep.subr.mxu1 %v4792_v13 }
 0x48e   :  { %v4317_v4 = vpop.eup %4316 }
 0x48f   :  { %v802_v5 = vmul.f32 %v4317_v4, %v4311_v47  ;;  %v803_v6 = vmul.f32 %v4317_v4, %v4313_v48  ;;  %v3672_v47 = vld [vmem:[#allocation12] ss:$0 sm:$0xff]  ;;  %v3674_v4 = vld [vmem:[%s5608_s4] ss:$0 sm:$0xff] }
 0x491   :  { %3972 = vmatprep.mubr.msk.f32.mxu1 %vm748_vm7, %v802_v5 }
 0x492   :  { %3973 = vmatmul.mubr.msk.f32.vlgmr.msra.gmra.mxu1 %vm748_vm7, %v803_v6  ;;  %v3675_v6 = vld [vmem:[%s5609_s26] ss:$0 sm:$0xff] }
 0x493   :  { %4025 = vmatpush3.msk.msra.mxu1 %vm810_vm5, %v5128_v0  ;;  %4026 = vmatprep.mubr.msk.f32.mxu1 %vm4793_vm2, %v4792_v13 }
 0x494   :  { %4040 = vmatprep.subr.mxu1 %v4792_v13 }
 0x54a   :  { %v3969_v14 = vpop.f32.mrf.mxu1 }
 0x54b   :  { %v971_v15 = vmul.f32 %v3969_v14, %v5101_v57  ;;  %v1245_v14 = vrot.slane %v415_v12, %v5085_v44 }
 0x54c   :  { %v880_v16 = vpop.f32.mrf.mxu1 }
 0x54d   :  { %v970_v17 = vmul.f32 %v880_v16, %v541_v7  ;;  %v976_v18 = vsel %vm975_vm4, %v971_v15, 0.0  ;;  %v1252_v15 = vrot.slane %v415_v12, %v1251_v11  ;;  %v3676_v16 = vld [vmem:[#allocation13] ss:$0 sm:$0xff] }
 0x54f   :  { %v974_v19 = vsel %vm427_vm3, %v970_v17, 0.0 }
 0x550   :  { %v977_v20 = vadd.f32 %v976_v18, %v974_v19 }
 0x552   :  { %v978_v21 = vrot.slane %v977_v20, 4  ;;  %v3974_v22 = vpop.f32.mrf.mxu1 }
 0x553   :  { %v973_v23 = vmul.f32 %v3974_v22, %v5117_v62 }
 0x554   :  { %v979_v24 = vadd.f32 %v978_v21, %v977_v20  ;;  %v961_v26 = vpop.f32.mrf.mxu1 }
 0x555   :  { %v972_v27 = vmul.f32 %v961_v26, %v542_v8  ;;  %v985_v31 = vsel %vm975_vm4, %v973_v23, 0.0 }
 0x556   :  { %v980_v33 = vrot.slane %v979_v24, 2 }
 0x557   :  { %v984_v32 = vsel %vm427_vm3, %v972_v27, 0.0 }
 0x558   :  { %v986_v57 = vadd.f32 %v985_v31, %v984_v32  ;;  %v981_v37 = vadd.f32 %v980_v33, %v979_v24  ;;  %v1203_v24 = vld [vmem:[%s5611_s7] sm:$0xff]  ;;  %v1204_v32 = vld [vmem:[%s5611_s7 + $0x8] sm:$0xff] }
 0x55a   :  { %v987_v35 = vrot.slane %v986_v57, 4  ;;  %v982_v41 = vrot.slane %v981_v37, 1 }
 0x55c   :  { %v988_v39 = vadd.f32 %v987_v35, %v986_v57  ;;  %v983_v45 = vadd.f32 %v982_v41, %v981_v37 }
 0x55e   :  { %v989_v40 = vrot.slane %v988_v39, 2 }
 0x560   :  { %v990_v42 = vadd.f32 %v989_v40, %v988_v39 }
 0x562   :  { %v991_v43 = vrot.slane %v990_v42, 1 }
 0x564   :  { %v992_v46 = vadd.f32 %v991_v43, %v990_v42 }
 0x566   :  { %v1007_v62 = vsel %vm1006_vm8, %v992_v46, %v983_v45 }
 0x567   :  { %3984 = vmatmul.mubr.msk.f32.vlgmr.msra.gmra.mxu0 %vm427_vm3, %v1007_v62 }
 0x568   :  { %3994 = vmatprep.mubr.msk.f32.mxu0 %vm4793_vm2, %v4792_v13  ;;  %3987 = vmatpush3.msra.mxu0 %v1121_v59 }
 0x569   :  { %3988 = vmatprep.subr.mxu0 %v4792_v13 }
 0x56a   :  { %3989 = vmatpush3.msra.mxu0 %v1120_v60 }
 0x56b   :  { %3990 = vmatprep.subr.mxu0 %v4792_v13 }
 0x56c   :  { %3991 = vmatpush3.msra.mxu0 %v1119_v61 }
 0x56d   :  { %3992 = vmatprep.subr.mxu0 %v4792_v13 }
 0x627   :  { %v1076_v48 = vpop.f32.mrf.mxu0 }
 0x628   :  { %v1077_v49 = vadd.f32 %v3672_v47, %v1076_v48 }
 0x629   :  { %v3985_v50 = vpop.f32.mrf.mxu0 }
 0x62a   :  { %v1080_v51 = vadd.f32 %v1077_v49, %v5049_v25  ;;  %v1118_v25 = vld [vmem:[%s5607_s27] sm:$0xff] }
 0x62b   :  { %3993 = vmatpush3.msra.mxu0 %v1118_v25 }
 0x62c   :  { %v1083_v52 = vsel %vm384_vm1, %v1080_v51, 0.0  ;;  %3997 = vmatprep.subr.mxu0 %v4792_v13 }
 0x62d   :  { %1084 = vadd.xlane.f32.xlu1 %v1083_v52 }
 0x63e   :  { %1247 = vbcast.lane.b32.xlu1 %v1245_v14, 256 }
 0x6b6   :  { %v1085_v53 = vpop.xlane.xlu1 %1084 }
 0x6b7   :  { %v1086_v54 = vmul.f32 0.03125, %v1085_v53 }
 0x6b9   :  { %v1087_v55 = vsub.f32 %v1080_v51, %v1086_v54 }
 0x6ba   :  { %v5232_v57 = vpop.permute.xlu1 %1247 }
 0x6bb   :  { %v1088_v56 = vmul.f32 %v1087_v55, %v1087_v55 }
 0x6bd   :  { %v1089_v58 = vsel %vm384_vm1, %v1088_v56, 0.0 }
 0x6be   :  { %1090 = vadd.xlane.f32.xlu0 %v1089_v58 }
 0x6d4   :  { %1254 = vbcast.lane.b32.xlu0 %v1252_v15, 256 }
 0x747   :  { %v1091_v63 = vpop.xlane.xlu0 %1090 }
 0x748   :  { %v1092_v1 = vmul.f32 0.03125, %v1091_v63 }
 0x74a   :  { %v1093_v2 = vadd.f32 1e-05, %v1092_v1 }
 0x74b   :  { %v5236_v43 = vpop.permute.xlu0 %1254 }
 0x74c   :  { %4318 = vrsqrt.f32 %v1093_v2 }
 0x759   :  { %v4319_v3 = vpop.eup %4318 }
 0x75a   :  { %v1095_v5 = vmul.f32 %v4319_v3, %v1087_v55 }
 0x75c   :  { %v1102_v7 = vmul.f32 %v3674_v4, %v1095_v5 }
 0x75e   :  { %v5191_v8 = vadd.f32 %v3675_v6, %v1102_v7 }
 0x760   :  { %3995 = vmatmul.mubr.msk.f32.vlgmr.msra.gmra.mxu0 %vm427_vm3, %v5191_v8 }
 0x761   :  { %3998 = vmatpush3.msra.mxu0 %v5058_v28  ;;  %4005 = vmatprep.mubr.msk.f32.mxu0 %vm4793_vm2, %v4792_v13 }
 0x762   :  { %3999 = vmatprep.subr.mxu0 %v4792_v13 }
 0x763   :  { %4000 = vmatpush3.msra.mxu0 %v5061_v29 }
 0x764   :  { %4001 = vmatprep.subr.mxu0 %v4792_v13 }
 0x765   :  { %4002 = vmatpush3.msra.mxu0 %v5066_v30 }
 0x766   :  { %4003 = vmatprep.subr.mxu0 %v4792_v13 }
 0x767   :  { %4004 = vmatpush3.msra.mxu0 %v5073_v34 }
 0x768   :  { %4008 = vmatprep.subr.mxu0 %v4792_v13 }
 0x820   :  { %v1198_v17 = vpop.f32.mrf.mxu0 }
 0x821   :  { %v1199_v18 = vadd.f32 %v3676_v16, %v1198_v17 }
 0x822   :  { %v3996_v19 = vpop.f32.mrf.mxu0 }
 0x823   :  { %v1202_v20 = vmul.f32 0.35355338, %v1199_v18 }
 0x825   :  { %v1214_v21 = vrot.slane %v1202_v20, %v5081_v38 }
 0x827   :  { %v1215_v22 = vcombine.high %v1214_v21, %v1214_v21  ;;  %v1222_v23 = vrot.slane %v1214_v21, %v5081_v38 }
 0x829   :  { %v1233_v36 = vrot.slane %v1222_v23, %v5085_v44  ;;  %v1229_v26 = vrot.slane %v1215_v22, %v5081_v38  ;;  %v1605_v22 = vld [vmem:[%s5612_s24 + $0x18] sm:$0xff]  ;;  %v1604_v23 = vld [vmem:[%s5612_s24 + $0x10] sm:$0xff] }
 0x82b   :  { %v1240_v27 = vmul.f32 %v1233_v36, %v1203_v24  ;;  %v1237_v31 = vrot.slane %v1229_v26, %v5085_v44  ;;  %v1603_v24 = vld [vmem:[%s5612_s24 + $0x8] sm:$0xff]  ;;  %v1602_v36 = vld [vmem:[%s5612_s24] sm:$0xff]  ;;  %v1205_v26 = vld [vmem:[#allocation22] sm:$0xff] }
 0x82d   :  { %4006 = vmatmul.mubr.msk.f32.vlgmr.msra.gmra.mxu0 %vm427_vm3, %v1240_v27  ;;  %v1241_v33 = vmul.f32 %v1237_v31, %v1204_v32 }
 0x82e   :  { %4009 = vmatpush3.msra.mxu0 %v5058_v28  ;;  %4016 = vmatprep.mubr.msk.f32.mxu0 %vm4793_vm2, %v4792_v13 }
 0x82f   :  { %4010 = vmatprep.subr.mxu0 %v4792_v13 }
 0x830   :  { %4011 = vmatpush3.msra.mxu0 %v5061_v29 }
 0x831   :  { %4012 = vmatprep.subr.mxu0 %v4792_v13 }
 0x832   :  { %4013 = vmatpush3.msra.mxu0 %v5066_v30 }
 0x833   :  { %4014 = vmatprep.subr.mxu0 %v4792_v13 }
 0x834   :  { %4015 = vmatpush3.msra.mxu0 %v5073_v34 }
 0x835   :  { %4017 = vmatmul.mubr.msk.f32.vlgmr.msra.gmra.mxu0 %vm427_vm3, %v1241_v33  ;;  %4019 = vmatprep.subr.mxu0 %v4792_v13 }
 0x836   :  { %4020 = vmatpush3.msk.msra.mxu0 %vm810_vm5, %v5128_v0  ;;  %4021 = vmatprep.mubr.msk.f32.mxu0 %vm4793_vm2, %v4792_v13 }
 0x837   :  { %4029 = vmatprep.subr.mxu0 %v4792_v13 }
 0x8ed   :  { %v1325_v35 = vpop.f32.mrf.mxu0 }
 0x8ee   :  { %v1326_v37 = vadd.f32 %v1325_v35, %v5232_v57 }
 0x8ef   :  { %v4007_v39 = vpop.f32.mrf.mxu0 }
 0x8f0   :  { %v1402_v40 = vsel %vm748_vm7, %v1326_v37, -inf  ;;  %v1206_v39 = vld [vmem:[#allocation22 + $0x8] sm:$0xff] }
 0x8f1   :  { %v1403_v41 = vrot.slane %v1402_v40, 4 }
 0x8f3   :  { %v1404_v42 = vmax.f32 %v1402_v40, %v1403_v41 }
 0x8f5   :  { %v1405_v45 = vrot.slane %v1404_v42, 2  ;;  %v1398_v46 = vpop.f32.mrf.mxu0 }
 0x8f6   :  { %v1399_v62 = vadd.f32 %v1398_v46, %v5236_v43 }
 0x8f7   :  { %v1406_v47 = vmax.f32 %v1404_v42, %v1405_v45  ;;  %v4018_v48 = vpop.f32.mrf.mxu0 }
 0x8f8   :  { %v1409_v49 = vsel %vm748_vm7, %v1399_v62, -inf }
 0x8f9   :  { %v1407_v50 = vrot.slane %v1406_v47, 1  ;;  %v1410_v51 = vrot.slane %v1409_v49, 4 }
 0x8fb   :  { %v1408_v52 = vmax.f32 %v1406_v47, %v1407_v50  ;;  %v1411_v53 = vmax.f32 %v1409_v49, %v1410_v51 }
 0x8fd   :  { %v1416_v54 = vsub.f32 %v1326_v37, %v1408_v52  ;;  %v1412_v55 = vrot.slane %v1411_v53, 2 }
 0x8ff   :  { %v1418_v56 = vmul.f32 1.442695, %v1416_v54  ;;  %v1413_v58 = vmax.f32 %v1411_v53, %v1412_v55 }
 0x901   :  { %4320 = vpow2.f32 %v1418_v56  ;;  %v1414_v59 = vrot.slane %v1413_v58, 1  ;;  %v3684_v56 = vld [vmem:[#allocation15] ss:$0 sm:$0xff] }
 0x903   :  { %v1415_v60 = vmax.f32 %v1413_v58, %v1414_v59 }
 0x905   :  { %v1417_v61 = vsub.f32 %v1399_v62, %v1415_v60 }
 0x907   :  { %v1420_v25 = vmul.f32 1.442695, %v1417_v61 }
 0x909   :  { %4322 = vpow2.f32 %v1420_v25 }
 0x90e   :  { %v4321_v63 = vpop.eup %4320 }
 0x90f   :  { %v1422_v1 = vsel %vm748_vm7, %v4321_v63, 0.0 }
 0x910   :  { %v1423_v2 = vrot.slane %v1422_v1, 4 }
 0x912   :  { %v1424_v3 = vadd.f32 %v1423_v2, %v1422_v1 }
 0x914   :  { %v1425_v4 = vrot.slane %v1424_v3, 2 }
 0x916   :  { %v4323_v5 = vpop.eup %4322  ;;  %v1426_v6 = vadd.f32 %v1425_v4, %v1424_v3 }
 0x917   :  { %v1429_v7 = vsel %vm748_vm7, %v4323_v5, 0.0 }
 0x918   :  { %v1427_v9 = vrot.slane %v1426_v6, 1  ;;  %v1430_v10 = vrot.slane %v1429_v7, 4 }
 0x91a   :  { %v1428_v11 = vadd.f32 %v1427_v9, %v1426_v6  ;;  %v1431_v12 = vadd.f32 %v1430_v10, %v1429_v7  ;;  %v1722_v6 = vld [vmem:[%s5613_s20 + $0x10] sm:$0xff]  ;;  %v1721_v7 = vld [vmem:[%s5613_s20 + $0x8] sm:$0xff] }
 0x91c   :  { %4324 = vrcp.f32 %v1428_v11  ;;  %v1432_v14 = vrot.slane %v1431_v12, 2 }
 0x91e   :  { %v1433_v15 = vadd.f32 %v1432_v14, %v1431_v12  ;;  %v3688_v14 = vld [vmem:[%s5608_s4 + $0x1] ss:$0 sm:$0xff] }
 0x920   :  { %v1434_v16 = vrot.slane %v1433_v15, 1 }
 0x922   :  { %v1435_v17 = vadd.f32 %v1434_v16, %v1433_v15  ;;  %v3689_v16 = vld [vmem:[%s5609_s26 + $0x1] ss:$0 sm:$0xff] }
 0x924   :  { %4326 = vrcp.f32 %v1435_v17 }
 0x929   :  { %v4325_v18 = vpop.eup %4324 }
 0x92a   :  { %v1438_v19 = vmul.f32 %v4325_v18, %v4321_v63 }
 0x92c   :  { %4022 = vmatmul.mubr.msk.f32.vlgmr.msra.gmra.mxu0 %vm748_vm7, %v1438_v19  ;;  %v1820_v19 = vld [vmem:[%s5614_s12 + $0x38] sm:$0xff] }
 0x92d   :  { %4037 = vmatprep.mubr.msk.f32.mxu0 %vm4793_vm2, %v4792_v13  ;;  %4030 = vmatpush3.msra.mxu0 %v1605_v22  ;;  %v1817_v22 = vld [vmem:[%s5614_s12 + $0x20] sm:$0xff] }
 0x92e   :  { %4031 = vmatprep.subr.mxu0 %v4792_v13 }
 0x92f   :  { %4032 = vmatpush3.msra.mxu0 %v1604_v23  ;;  %v1816_v23 = vld [vmem:[%s5614_s12 + $0x18] sm:$0xff] }
 0x930   :  { %4033 = vmatprep.subr.mxu0 %v4792_v13 }
 0x931   :  { %v4327_v20 = vpop.eup %4326  ;;  %4034 = vmatpush3.msra.mxu0 %v1603_v24  ;;  %v1815_v24 = vld [vmem:[%s5614_s12 + $0x10] sm:$0xff] }
 0x932   :  { %v1439_v21 = vmul.f32 %v4327_v20, %v4323_v5  ;;  %4035 = vmatprep.subr.mxu0 %v4792_v13  ;;  %v1723_v5 = vld [vmem:[%s5613_s20 + $0x18] sm:$0xff]  ;;  %v1819_v20 = vld [vmem:[%s5614_s12 + $0x30] sm:$0xff] }
 0x933   :  { %4036 = vmatpush3.msra.mxu0 %v1602_v36  ;;  %v1814_v36 = vld [vmem:[%s5614_s12 + $0x8] sm:$0xff] }
 0x934   :  { %4027 = vmatmul.mubr.msk.f32.vlgmr.msra.gmra.mxu1 %vm748_vm7, %v1439_v21  ;;  %4051 = vmatprep.subr.mxu0 %v4792_v13  ;;  %v1818_v21 = vld [vmem:[%s5614_s12 + $0x28] sm:$0xff] }
 0x935   :  { %4048 = vmatprep.mubr.msk.f32.mxu1 %vm4793_vm2, %v4792_v13  ;;  %4041 = vmatpush3.msra.mxu1 %v1723_v5 }
 0x936   :  { %4042 = vmatprep.subr.mxu1 %v4792_v13 }
 0x937   :  { %4043 = vmatpush3.msra.mxu1 %v1722_v6  ;;  %v3697_v6 = vld [vmem:[%s5609_s26 + $0x2] ss:$0 sm:$0xff] }
 0x938   :  { %4044 = vmatprep.subr.mxu1 %v4792_v13 }
 0x939   :  { %4045 = vmatpush3.msra.mxu1 %v1721_v7 }
 0x93a   :  { %4046 = vmatprep.subr.mxu1 %v4792_v13 }
 0x9ec   :  { %v1509_v27 = vpop.f32.mrf.mxu0 }
 0x9ed   :  { %v1586_v31 = vmul.f32 %v1509_v27, %v1205_v26  ;;  %v1813_v26 = vld [vmem:[%s5614_s12] sm:$0xff]  ;;  %v3690_v27 = vld [vmem:[#allocation16] ss:$0 sm:$0xff] }
 0x9ee   :  { %v4023_v32 = vpop.f32.mrf.mxu0 }
 0x9ef   :  { %v1588_v33 = vsel %vm427_vm3, %v1586_v31, 0.0 }
 0x9f0   :  { %v1589_v35 = vrot.slane %v1588_v33, 4 }
 0x9f2   :  { %v1590_v37 = vadd.f32 %v1589_v35, %v1588_v33 }
 0x9f4   :  { %v1582_v40 = vpop.f32.mrf.mxu1  ;;  %v1591_v42 = vrot.slane %v1590_v37, 2 }
 0x9f5   :  { %v1587_v41 = vmul.f32 %v1582_v40, %v1206_v39 }
 0x9f6   :  { %v4028_v45 = vpop.f32.mrf.mxu1  ;;  %v1592_v47 = vadd.f32 %v1591_v42, %v1590_v37 }
 0x9f7   :  { %v1595_v46 = vsel %vm427_vm3, %v1587_v41, 0.0 }
 0x9f8   :  { %v1596_v62 = vrot.slane %v1595_v46, 4  ;;  %v1593_v50 = vrot.slane %v1592_v47, 1 }
 0x9fa   :  { %v1597_v48 = vadd.f32 %v1596_v62, %v1595_v46  ;;  %v1594_v53 = vadd.f32 %v1593_v50, %v1592_v47  ;;  %v3692_v47 = vld [vmem:[#allocation18] ss:$0 sm:$0xff] }
 0x9fc   :  { %v1598_v49 = vrot.slane %v1597_v48, 2 }
 0x9fe   :  { %v1599_v51 = vadd.f32 %v1598_v49, %v1597_v48 }
 0xa00   :  { %v1600_v52 = vrot.slane %v1599_v51, 1 }
 0xa02   :  { %v1601_v54 = vadd.f32 %v1600_v52, %v1599_v51 }
 0xa04   :  { %v1615_v55 = vsel %vm1006_vm8, %v1601_v54, %v1594_v53 }
 0xa05   :  { %4038 = vmatmul.mubr.msk.f32.vlgmr.msra.gmra.mxu0 %vm427_vm3, %v1615_v55 }
 0xa06   :  { %4067 = vmatprep.mubr.msk.f32.mxu0 %vm4793_vm2, %v4792_v13  ;;  %4052 = vmatpush3.msra.mxu0 %v1820_v19 }
 0xa07   :  { %4053 = vmatprep.subr.mxu0 %v4792_v13 }
 0xa08   :  { %4054 = vmatpush3.msra.mxu0 %v1819_v20 }
 0xa09   :  { %4055 = vmatprep.subr.mxu0 %v4792_v13 }
 0xa0a   :  { %4056 = vmatpush3.msra.mxu0 %v1818_v21 }
 0xa0b   :  { %4057 = vmatprep.subr.mxu0 %v4792_v13 }
 0xa0c   :  { %4058 = vmatpush3.msra.mxu0 %v1817_v22 }
 0xa0d   :  { %4059 = vmatprep.subr.mxu0 %v4792_v13 }
 0xa0e   :  { %4060 = vmatpush3.msra.mxu0 %v1816_v23 }
 0xa0f   :  { %4061 = vmatprep.subr.mxu0 %v4792_v13 }
 0xa10   :  { %4062 = vmatpush3.msra.mxu0 %v1815_v24 }
 0xa11   :  { %4063 = vmatprep.subr.mxu0 %v4792_v13 }
 0xa12   :  { %4064 = vmatpush3.msra.mxu0 %v1814_v36 }
 0xa13   :  { %4065 = vmatprep.subr.mxu0 %v4792_v13 }
 0xa14   :  { %4066 = vmatpush3.msra.mxu0 %v1813_v26 }
 0xa15   :  { %4092 = vmatprep.subr.mxu0 %v5058_v28 }
 0xac5   :  { %v1684_v58 = vpop.f32.mrf.mxu0 }
 0xac6   :  { %v1685_v59 = vadd.f32 %v3684_v56, %v1684_v58 }
 0xac7   :  { %v4039_v60 = vpop.f32.mrf.mxu0 }
 0xac8   :  { %v1688_v61 = vadd.f32 %v1685_v59, %v5191_v8  ;;  %v1720_v8 = vld [vmem:[%s5613_s20] sm:$0xff]  ;;  %v3701_v59 = vld [vmem:[%s5604_s23 + $0x38] sm:$0xff]  ;;  %v3700_v60 = vld [vmem:[%s5604_s23 + $0x30] sm:$0xff] }
 0xac9   :  { %4047 = vmatpush3.msra.mxu1 %v1720_v8 }
 0xaca   :  { %v1693_v25 = vsel %vm384_vm1, %v1688_v61, 0.0  ;;  %4070 = vmatprep.subr.mxu1 %v4792_v13 }
 0xacb   :  { %1694 = vadd.xlane.f32.xlu1 %v1693_v25  ;;  %v3698_v25 = vld [vmem:[%s5604_s23 + $0x20] sm:$0xff] }
 0xb54   :  { %v1695_v63 = vpop.xlane.xlu1 %1694 }
 0xb55   :  { %v1696_v1 = vmul.f32 0.03125, %v1695_v63 }
 0xb57   :  { %v1697_v2 = vsub.f32 %v1688_v61, %v1696_v1  ;;  %v3699_v61 = vld [vmem:[%s5604_s23 + $0x28] sm:$0xff] }
 0xb59   :  { %v1698_v3 = vmul.f32 %v1697_v2, %v1697_v2 }
 0xb5b   :  { %v1699_v4 = vsel %vm384_vm1, %v1698_v3, 0.0 }
 0xb5c   :  { %1700 = vadd.xlane.f32.xlu0 %v1699_v4  ;;  %v3696_v4 = vld [vmem:[%s5608_s4 + $0x2] ss:$0 sm:$0xff] }
 0xbe5   :  { %v1701_v9 = vpop.xlane.xlu0 %1700 }
 0xbe6   :  { %v1702_v10 = vmul.f32 0.03125, %v1701_v9  ;;  %v2021_v9 = vld [vmem:[#allocation24] sm:$0xff] }
 0xbe7   :  { %2625 = vst.msk [vmem:[%s4971_s17] sm:$0xff] %vm427_vm3, %v2021_v9 }
 0xbe8   :  { %v1703_v11 = vadd.f32 1e-05, %v1702_v10  ;;  %v2022_v10 = vld [vmem:[#allocation24 + $0x8] sm:$0xff] }
 0xbe9   :  { %2627 = vst.msk [vmem:[%s4971_s17 + $0x10] sm:$0xff] %vm427_vm3, %v2022_v10 }
 0xbea   :  { %4328 = vrsqrt.f32 %v1703_v11 }
 0xbf7   :  { %v4329_v12 = vpop.eup %4328 }
 0xbf8   :  { %v1705_v15 = vmul.f32 %v4329_v12, %v1697_v2 }
 0xbfa   :  { %v1712_v17 = vmul.f32 %v3688_v14, %v1705_v15 }
 0xbfc   :  { %v1719_v18 = vadd.f32 %v3689_v16, %v1712_v17 }
 0xbfe   :  { %4049 = vmatmul.mubr.msk.f32.vlgmr.msra.gmra.mxu1 %vm427_vm3, %v1719_v18 }
 0xbff   :  { %4078 = vmatprep.mubr.msk.f32.mxu1 %vm4793_vm2, %v4792_v13  ;;  %4071 = vmatpush3.msra.mxu1 %v3701_v59 }
 0xc00   :  { %4072 = vmatprep.subr.mxu1 %v4792_v13 }
 0xc01   :  { %4073 = vmatpush3.msra.mxu1 %v3700_v60 }
 0xc02   :  { %4074 = vmatprep.subr.mxu1 %v4792_v13 }
 0xc03   :  { %4075 = vmatpush3.msra.mxu1 %v3699_v61 }
 0xc04   :  { %4076 = vmatprep.subr.mxu1 %v4792_v13 }
 0xc05   :  { %4077 = vmatpush3.msra.mxu1 %v3698_v25 }
 0xc06   :  { %4081 = vmatprep.subr.mxu1 %v5058_v28 }
 0xcbe   :  { %v1800_v31 = vpop.f32.mrf.mxu1 }
 0xcbf   :  { %v1801_v32 = vadd.f32 %v3690_v27, %v1800_v31 }
 0xcc0   :  { %v4050_v33 = vpop.f32.mrf.mxu1 }
 0xcc1   :  { %v1804_v35 = vmul.f32 %v1801_v32, %v1801_v32 }
 0xcc3   :  { %v1805_v37 = vmul.f32 %v1804_v35, %v1801_v32 }
 0xcc5   :  { %v1806_v39 = vmul.f32 0.044715, %v1805_v37 }
 0xcc7   :  { %v1807_v40 = vadd.f32 %v1806_v39, %v1801_v32 }
 0xcc9   :  { %v1808_v41 = vmul.f32 0.7978846, %v1807_v40 }
 0xccb   :  { %4330 = vtanh.f32 %v1808_v41 }
 0xcd8   :  { %v4331_v42 = vpop.eup %4330 }
 0xcd9   :  { %v1810_v45 = vadd.f32 1.0, %v4331_v42 }
 0xcdb   :  { %v1811_v46 = vmul.f32 0.5, %v1810_v45 }
 0xcdd   :  { %v1812_v62 = vmul.f32 %v1811_v46, %v1801_v32 }
 0xcdf   :  { %4068 = vmatmul.mubr.msk.f32.vlgmr.msra.gmra.mxu0 %vm1828_vm9, %v1812_v62 }
 0xce0   :  { %4093 = vmatpush3.msra.mxu0 %v5058_v28 }
 0xce1   :  { %4094 = vmatprep.subr.mxu0 %v5061_v29 }
 0xce2   :  { %4095 = vmatpush3.msra.mxu0 %v5061_v29 }
 0xce3   :  { %4096 = vmatprep.subr.mxu0 %v5066_v30 }
 0xce4   :  { %4097 = vmatpush3.msra.mxu0 %v5066_v30 }
 0xce5   :  { %4098 = vmatprep.subr.mxu0 %v5073_v34 }
 0xce6   :  { %4099 = vmatpush3.msra.mxu0 %v5073_v34 }
 0xce7   :  { %4113 = vmatprep.subr.mxu0 %v4792_v13 }
 0xd9f   :  { %v1898_v48 = vpop.f32.mrf.mxu0 }
 0xda0   :  { %v1899_v49 = vadd.f32 %v3692_v47, %v1898_v48 }
 0xda1   :  { %v4069_v50 = vpop.f32.mrf.mxu0 }
 0xda2   :  { %v1902_v51 = vadd.f32 %v1899_v49, %v1719_v18 }
 0xda4   :  { %v1907_v52 = vsel %vm384_vm1, %v1902_v51, 0.0 }
 0xda5   :  { %1908 = vadd.xlane.f32.xlu1 %v1907_v52 }
 0xe2e   :  { %v1909_v53 = vpop.xlane.xlu1 %1908 }
 0xe2f   :  { %v1910_v54 = vmul.f32 0.03125, %v1909_v53 }
 0xe31   :  { %v1911_v55 = vsub.f32 %v1902_v51, %v1910_v54 }
 0xe33   :  { %v1912_v56 = vmul.f32 %v1911_v55, %v1911_v55 }
 0xe35   :  { %v1913_v58 = vsel %vm384_vm1, %v1912_v56, 0.0 }
 0xe36   :  { %1914 = vadd.xlane.f32.xlu1 %v1913_v58 }
 0xebf   :  { %v1915_v63 = vpop.xlane.xlu1 %1914 }
 0xec0   :  { %v1916_v1 = vmul.f32 0.03125, %v1915_v63 }
 0xec2   :  { %v1917_v2 = vadd.f32 1e-05, %v1916_v1 }
 0xec4   :  { %4332 = vrsqrt.f32 %v1917_v2 }
 0xed1   :  { %v4333_v3 = vpop.eup %4332 }
 0xed2   :  { %v1919_v5 = vmul.f32 %v4333_v3, %v1911_v55 }
 0xed4   :  { %v1926_v7 = vmul.f32 %v3696_v4, %v1919_v5 }
 0xed6   :  { %v5315_v8 = vadd.f32 %v3697_v6, %v1926_v7 }
 0xed8   :  { %4079 = vmatmul.mubr.msk.f32.vlgmr.msra.gmra.mxu1 %vm427_vm3, %v5315_v8 }
 0xed9   :  { %4082 = vmatpush3.msra.mxu1 %v5058_v28  ;;  %v3702_v28 = vld [vmem:[#allocation10 + $0x1] ss:$0 sm:$0xff] }
 0xeda   :  { %4083 = vmatprep.subr.mxu1 %v5061_v29 }
 0xedb   :  { %4084 = vmatpush3.msra.mxu1 %v5061_v29 }
 0xedc   :  { %4085 = vmatprep.subr.mxu1 %v5066_v30 }
 0xedd   :  { %4086 = vmatpush3.msra.mxu1 %v5066_v30 }
 0xede   :  { %4087 = vmatprep.subr.mxu1 %v5073_v34 }
 0xedf   :  { %4088 = vmatpush3.msra.mxu1 %v5073_v34 }
 0xee0   :  { %4103 = vmatprep.subr.msk.mxu1 %vm810_vm5, %v5128_v0 }
 0xf98   :  { %v2016_v11 = vpop.f32.mrf.mxu1 }
 0xf99   :  { %v2017_v29 = vadd.f32 %v3702_v28, %v2016_v11 }
 0xf9a   :  { %v4080_v12 = vpop.f32.mrf.mxu1 }
 0xf9b   :  { %v2020_v14 = vmul.f32 0.35355338, %v2017_v29  ;;  %v2030_v30 = vrot.slane %v2017_v29, %v5081_v38 }
 0xf9d   :  { %v2031_v15 = vcombine.high %v2030_v30, %v2030_v30  ;;  %v2038_v16 = vrot.slane %v2030_v30, %v5081_v38  ;;  %v2075_v34 = vrot.slane %v2020_v14, %v5081_v38 }
 0xf9f   :  { %v2076_v17 = vcombine.high %v2075_v34, %v2075_v34  ;;  %v2083_v18 = vrot.slane %v2075_v34, %v5081_v38  ;;  %v2049_v19 = vrot.slane %v2038_v16, %v5085_v44  ;;  %v2045_v20 = vrot.slane %v2031_v15, %v5081_v38 }
 0xfa1   :  { %v2090_v21 = vrot.slane %v2076_v17, %v5081_v38  ;;  %v2094_v22 = vrot.slane %v2083_v18, %v5085_v44  ;;  %2054 = vrot.lane.b32.xlu1 %v2049_v19, %s4796_s3  ;;  %v2053_v23 = vrot.slane %v2045_v20, %v5085_v44 }
 0xfa3   :  { %2056 = vrot.lane.b32.xlu0 %v2053_v23, %s4796_s3  ;;  %v2101_v24 = vmul.f32 %v2094_v22, %v2021_v9  ;;  %v2098_v36 = vrot.slane %v2090_v21, %v5085_v44 }
 0xfa5   :  { %2062 = vrot.lane.b32.xlu1 %v2049_v19, %s4795_s25  ;;  %4089 = vmatprep.mubr.msk.f32.mxu1 %vm427_vm3, %v2101_v24  ;;  %v2103_v26 = vmul.f32 %v2098_v36, %v2022_v10 }
 0xfa7   :  { %4100 = vmatprep.mubr.msk.f32.mxu0 %vm427_vm3, %v2103_v26 }
 0xfa9   :  { %2064 = vrot.lane.b32.xlu1 %v2053_v23, %s4795_s25 }
0x1013   :  { %v2055_v27 = vpop.permute.xlu1 %2054 }
0x1014   :  { %v2102_v31 = vmul.f32 %v2094_v22, %v2055_v27  ;;  %2626 = vst.msk [vmem:[%s4971_s17 + $0x8] sm:$0x1] %vm975_vm4, %v2055_v27 }
0x1015   :  { %v2057_v32 = vpop.permute.xlu0 %2056 }
0x1016   :  { %v2104_v33 = vmul.f32 %v2098_v36, %v2057_v32  ;;  %2628 = vst.msk [vmem:[%s4971_s17 + $0x18] sm:$0x1] %vm975_vm4, %v2057_v32  ;;  %4090 = vmatmul.mubr.msk.f32.vlgmr.msra.gmra.mxu1 %vm427_vm3, %v2102_v31 }
0x1017   :  { %v5353_v35 = vpop.permute.xlu1 %2062  ;;  %4104 = vmatpush3.msk.msra.mxu1 %vm810_vm5, %v5128_v0 }
0x1018   :  { %2630 = vst.msk [vmem:[%s4976_s13 + $0x8] sm:$0x1] %vm975_vm4, %v5353_v35  ;;  %4101 = vmatmul.mubr.msk.f32.vlgmr.msra.gmra.mxu0 %vm427_vm3, %v2104_v33  ;;  %4108 = vmatprep.subr.msk.mxu1 %vm810_vm5, %v5128_v0 }
0x1019   :  { %4121 = vmatprep.mubr.msk.f32.mxu0 %vm4793_vm2, %v4792_v13 }
0x101b   :  { %v5365_v37 = vpop.permute.xlu1 %2064 }
0x101c   :  { %2632 = vst.msk [vmem:[%s4976_s13 + $0x18] sm:$0x1] %vm975_vm4, %v5365_v37 }
0x10d6   :  { %v4091_v39 = vpop.f32.mrf.mxu1 }
0x10d7   :  { %v2268_v42 = vsel %vm750_vm6, %v4091_v39, -inf }
0x10d8   :  { %v2177_v40 = vpop.f32.mrf.mxu1  ;;  %v4102_v41 = vpop.f32.mrf.mxu0 }
0x10d9   :  { %v2267_v45 = vsel %vm748_vm7, %v2177_v40, -inf  ;;  %v2277_v47 = vsel %vm750_vm6, %v4102_v41, -inf }
0x10da   :  { %v2269_v46 = vmax.f32 %v2267_v45, %v2268_v42  ;;  %v2258_v62 = vpop.f32.mrf.mxu0  ;;  %v2060_v42 = vld [vmem:[#allocation25] sm:$0xff]  ;;  %v2061_v45 = vld [vmem:[#allocation25 + $0x8] sm:$0xff] }
0x10db   :  { %v2276_v0 = vsel %vm748_vm7, %v2258_v62, -inf  ;;  %2629 = vst.msk [vmem:[%s4976_s13] sm:$0xff] %vm427_vm3, %v2060_v42  ;;  %2631 = vst.msk [vmem:[%s4976_s13 + $0x10] sm:$0xff] %vm427_vm3, %v2061_v45  ;;  %s4797_s13 = smov [#allocation30]  }
0x10dc   :  { %v2270_v48 = vrot.slane %v2269_v46, 4  ;;  %v2278_v49 = vmax.f32 %v2276_v0, %v2277_v47  ;;  %v3715_v47 = vld [vmem:[%s5606_s21 + $0x28] sm:$0xff]  ;;  %v3714_v0 = vld [vmem:[%s5606_s21 + $0x20] sm:$0xff]  ;;  %s3586_s17 = sshll.u32 %s4797_s13, 4  ;;  %s3587_s17 = int_to_ptr.vmem [resolvable:$true] %s3586_s17 }
0x10dd   :  { %s4695_s10 = scalar_lea.vmem %s3587_s17, 32  ;;  %p4700_p11 = scmp.lt.s32.totalorder %s3587_s17, %s3587_s17 }
0x10de   :  { %v2271_v50 = vmax.f32 %v2269_v46, %v2270_v48  ;;  %v2279_v51 = vrot.slane %v2278_v49, 4  ;;  %v3717_v46 = vld [vmem:[%s5606_s21 + $0x38] sm:$0xff]  ;;  %p4696_p10 = scmp.ne.s32.totalorder %s3587_s17, %s4695_s10  ;;  %p4701_p12 = scmp.lt.s32.totalorder %s4695_s10, %s4695_s10 }
0x10df   :  { %4114 = vmatpush3.msra.mxu0 %v3717_v46 }
0x10e0   :  { %v2272_v52 = vrot.slane %v2271_v50, 2  ;;  %v2280_v53 = vmax.f32 %v2278_v49, %v2279_v51  ;;  %4115 = vmatprep.subr.mxu0 %v4792_v13  ;;  %p4702_p13 = por %p4701_p12, %p4700_p11 }
0x10e2   :  { %v2273_v54 = vmax.f32 %v2271_v50, %v2272_v52  ;;  %v2281_v55 = vrot.slane %v2280_v53, 2  ;;  %p4703_p0 = pnand %p4702_p13, %p4696_p10 }
0x10e4   :  { %v2274_v56 = vrot.slane %v2273_v54, 1  ;;  %v2282_v58 = vmax.f32 %v2280_v53, %v2281_v55 }
0x10e6   :  { %v2275_v59 = vmax.f32 %v2273_v54, %v2274_v56  ;;  %v2283_v60 = vrot.slane %v2282_v58, 1 }
0x10e8   :  { %v2285_v61 = vsub.f32 %v2177_v40, %v2275_v59  ;;  %v2286_v25 = vsub.f32 %v4091_v39, %v2275_v59  ;;  %v2284_v63 = vmax.f32 %v2282_v58, %v2283_v60  ;;  %v5380_v40 = vld [vmem:[#allocation6] sm:$0xf] }
0x10ea   :  { %v2289_v1 = vmul.f32 1.442695, %v2285_v61  ;;  %v2291_v2 = vmul.f32 1.442695, %v2286_v25  ;;  %v2287_v3 = vsub.f32 %v2258_v62, %v2284_v63  ;;  %v2288_v4 = vsub.f32 %v4102_v41, %v2284_v63  ;;  %v3716_v62 = vld [vmem:[%s5606_s21 + $0x30] sm:$0xff] }
0x10eb   :  { %4116 = vmatpush3.msra.mxu0 %v3716_v62  ;;  %v3728_v62 = vld [vmem:[#allocation13 + $0x1] ss:$0 sm:$0xff] }
0x10ec   :  { %4334 = vpow2.f32 %v2289_v1  ;;  %v2293_v5 = vmul.f32 1.442695, %v2287_v3  ;;  %v2295_v6 = vmul.f32 1.442695, %v2288_v4  ;;  %4117 = vmatprep.subr.mxu0 %v4792_v13 }
0x10ed   :  { %4336 = vpow2.f32 %v2291_v2  ;;  %4118 = vmatpush3.msra.mxu0 %v3715_v47 }
0x10ee   :  { %4338 = vpow2.f32 %v2293_v5  ;;  %4119 = vmatprep.subr.mxu0 %v4792_v13 }
0x10ef   :  { %4340 = vpow2.f32 %v2295_v6  ;;  %4120 = vmatpush3.msra.mxu0 %v3714_v0 }
0x10f0   :  { %4135 = vmatprep.subr.mxu0 %v4792_v13 }
0x10f9   :  { %v4335_v7 = vpop.eup %4334 }
0x10fa   :  { %v4337_v9 = vpop.eup %4336  ;;  %v2297_v10 = vsel %vm748_vm7, %v4335_v7, 0.0 }
0x10fb   :  { %v4339_v28 = vpop.eup %4338  ;;  %v2298_v11 = vsel %vm750_vm6, %v4337_v9, 0.0 }
0x10fc   :  { %v4341_v29 = vpop.eup %4340  ;;  %v2299_v12 = vadd.f32 %v2298_v11, %v2297_v10  ;;  %v2306_v14 = vsel %vm748_vm7, %v4339_v28, 0.0  ;;  %v4363_v11 = vld [vmem:[%s5605_s0 + $0x18] sm:$0xff] }
0x10fd   :  { %v2307_v30 = vsel %vm750_vm6, %v4341_v29, 0.0 }
0x10fe   :  { %v2300_v15 = vrot.slane %v2299_v12, 4  ;;  %v2308_v16 = vadd.f32 %v2307_v30, %v2306_v14  ;;  %v4366_v14 = vld [vmem:[%s5605_s0] sm:$0xff]  ;;  %v3718_v30 = vld [vmem:[#allocation12 + $0x1] ss:$0 sm:$0xff] }
0x1100   :  { %v2301_v34 = vadd.f32 %v2300_v15, %v2299_v12  ;;  %v2309_v17 = vrot.slane %v2308_v16, 4  ;;  %v4365_v12 = vld [vmem:[%s5605_s0 + $0x8] sm:$0xff] }
0x1102   :  { %v2302_v18 = vrot.slane %v2301_v34, 2  ;;  %v2310_v19 = vadd.f32 %v2309_v17, %v2308_v16 }
0x1104   :  { %v2303_v20 = vadd.f32 %v2302_v18, %v2301_v34  ;;  %v2311_v21 = vrot.slane %v2310_v19, 2 }
0x1106   :  { %v2304_v22 = vrot.slane %v2303_v20, 1  ;;  %v2312_v23 = vadd.f32 %v2311_v21, %v2310_v19 }
0x1108   :  { %v2313_v24 = vrot.slane %v2312_v23, 1  ;;  %v2305_v36 = vadd.f32 %v2304_v22, %v2303_v20 }
0x110a   :  { %4342 = vrcp.f32 %v2305_v36  ;;  %v2314_v26 = vadd.f32 %v2313_v24, %v2312_v23  ;;  %v3727_v24 = vld [vmem:[%s5607_s27 + $0x38] sm:$0xff]  ;;  %v3726_v36 = vld [vmem:[%s5607_s27 + $0x30] sm:$0xff] }
0x110c   :  { %4344 = vrcp.f32 %v2314_v26  ;;  %v3725_v26 = vld [vmem:[%s5607_s27 + $0x28] sm:$0xff] }
0x1117   :  { %v4343_v27 = vpop.eup %4342 }
0x1118   :  { %v2317_v31 = vmul.f32 %v4343_v27, %v4335_v7  ;;  %v2318_v32 = vmul.f32 %v4343_v27, %v4337_v9 }
0x1119   :  { %v4345_v33 = vpop.eup %4344 }
0x111a   :  { %4105 = vmatprep.mubr.msk.f32.mxu1 %vm748_vm7, %v2317_v31  ;;  %v2319_v39 = vmul.f32 %v4345_v33, %v4339_v28  ;;  %v2320_v41 = vmul.f32 %v4345_v33, %v4341_v29  ;;  %v4364_v29 = vld [vmem:[%s5605_s0 + $0x10] sm:$0xff] }
0x111b   :  { %4106 = vmatmul.mubr.msk.f32.vlgmr.msra.gmra.mxu1 %vm748_vm7, %v2318_v32 }
0x111c   :  { %4109 = vmatpush3.msk.msra.mxu1 %vm810_vm5, %v5380_v40  ;;  %4110 = vmatprep.mubr.msk.f32.mxu1 %vm748_vm7, %v2319_v39  ;;  %v3722_v39 = vld [vmem:[%s5608_s4 + $0x3] ss:$0 sm:$0xff] }
0x111d   :  { %4124 = vmatprep.subr.mxu1 %v4792_v13 }
0x111f   :  { %4111 = vmatmul.mubr.msk.f32.vlgmr.msra.gmra.mxu1 %vm748_vm7, %v2320_v41 }
0x1120   :  { %4132 = vmatprep.mubr.msk.f32.mxu1 %vm4793_vm2, %v4792_v13  ;;  %4125 = vmatpush3.msra.mxu1 %v3727_v24 }
0x1121   :  { %4126 = vmatprep.subr.mxu1 %v4792_v13 }
0x1122   :  { %4127 = vmatpush3.msra.mxu1 %v3726_v36 }
0x1123   :  { %4128 = vmatprep.subr.mxu1 %v4792_v13 }
0x1124   :  { %4129 = vmatpush3.msra.mxu1 %v3725_v26 }
0x1125   :  { %4130 = vmatprep.subr.mxu1 %v4792_v13 }
0x11db   :  { %v4107_v48 = vpop.f32.mrf.mxu1 }
0x11dc   :  { %v2484_v49 = vmul.f32 %v4107_v48, %v5353_v35 }
0x11dd   :  { %v2393_v50 = vpop.f32.mrf.mxu1 }
0x11de   :  { %v2483_v51 = vmul.f32 %v2393_v50, %v2060_v42  ;;  %v2488_v53 = vsel %vm975_vm4, %v2484_v49, 0.0  ;;  %v3723_v42 = vld [vmem:[%s5609_s26 + $0x3] ss:$0 sm:$0xff] }
0x11df   :  { %v4112_v52 = vpop.f32.mrf.mxu1 }
0x11e0   :  { %v2487_v54 = vsel %vm427_vm3, %v2483_v51, 0.0  ;;  %v2486_v55 = vmul.f32 %v4112_v52, %v5365_v37 }
0x11e1   :  { %v2489_v56 = vadd.f32 %v2488_v53, %v2487_v54  ;;  %v2474_v58 = vpop.f32.mrf.mxu1  ;;  %v2720_v53 = vld [vmem:[#allocation27] sm:$0xff] }
0x11e2   :  { %v2485_v59 = vmul.f32 %v2474_v58, %v2061_v45  ;;  %v2497_v61 = vsel %vm975_vm4, %v2486_v55, 0.0 }
0x11e3   :  { %v2490_v60 = vrot.slane %v2489_v56, 4 }
0x11e4   :  { %v2496_v25 = vsel %vm427_vm3, %v2485_v59, 0.0 }
0x11e5   :  { %v2491_v63 = vadd.f32 %v2490_v60, %v2489_v56  ;;  %v2498_v35 = vadd.f32 %v2497_v61, %v2496_v25  ;;  %v2721_v56 = vld [vmem:[#allocation27 + $0x8] sm:$0xff] }
0x11e7   :  { %v2492_v1 = vrot.slane %v2491_v63, 2  ;;  %v2499_v2 = vrot.slane %v2498_v35, 4 }
0x11e9   :  { %v2493_v3 = vadd.f32 %v2492_v1, %v2491_v63  ;;  %v2500_v4 = vadd.f32 %v2499_v2, %v2498_v35 }
0x11eb   :  { %v2501_v5 = vrot.slane %v2500_v4, 2  ;;  %v2494_v6 = vrot.slane %v2493_v3, 1 }
0x11ed   :  { %v2502_v37 = vadd.f32 %v2501_v5, %v2500_v4  ;;  %v2495_v9 = vadd.f32 %v2494_v6, %v2493_v3 }
0x11ef   :  { %v2503_v7 = vrot.slane %v2502_v37, 1 }
0x11f1   :  { %v2504_v10 = vadd.f32 %v2503_v7, %v2502_v37 }
0x11f3   :  { %v2520_v28 = vsel %vm1006_vm8, %v2504_v10, %v2495_v9 }
0x11f4   :  { %4122 = vmatmul.mubr.msk.f32.vlgmr.msra.gmra.mxu0 %vm427_vm3, %v2520_v28 }
0x11f5   :  { %4136 = vmatpush3.msra.mxu0 %v4363_v11  ;;  %4143 = vmatprep.mubr.msk.f32.mxu0 %vm4793_vm2, %v4792_v13 }
0x11f6   :  { %4137 = vmatprep.subr.mxu0 %v4792_v13 }
0x11f7   :  { %4138 = vmatpush3.msra.mxu0 %v4364_v29 }
0x11f8   :  { %4139 = vmatprep.subr.mxu0 %v4792_v13 }
0x11f9   :  { %4140 = vmatpush3.msra.mxu0 %v4365_v12 }
0x11fa   :  { %4141 = vmatprep.subr.mxu0 %v4792_v13 }
0x11fb   :  { %4142 = vmatpush3.msra.mxu0 %v4366_v14 }
0x11fc   :  { %4157 = vmatprep.subr.mxu0 %v4792_v13 }
0x12b4   :  { %v2589_v15 = vpop.f32.mrf.mxu0 }
0x12b5   :  { %v2590_v16 = vadd.f32 %v3718_v30, %v2589_v15 }
0x12b6   :  { %v4123_v34 = vpop.f32.mrf.mxu0 }
0x12b7   :  { %v2593_v17 = vadd.f32 %v2590_v16, %v5315_v8  ;;  %v3724_v8 = vld [vmem:[%s5607_s27 + $0x20] sm:$0xff] }
0x12b8   :  { %4131 = vmatpush3.msra.mxu1 %v3724_v8 }
0x12b9   :  { %v2598_v18 = vsel %vm384_vm1, %v2593_v17, 0.0  ;;  %4146 = vmatprep.subr.mxu1 %v4792_v13 }
0x12ba   :  { %2599 = vadd.xlane.f32.xlu1 %v2598_v18 }
0x1343   :  { %v2600_v19 = vpop.xlane.xlu1 %2599 }
0x1344   :  { %v2601_v20 = vmul.f32 0.03125, %v2600_v19 }
0x1346   :  { %v2602_v21 = vsub.f32 %v2593_v17, %v2601_v20 }
0x1348   :  { %v2603_v22 = vmul.f32 %v2602_v21, %v2602_v21 }
0x134a   :  { %v2604_v23 = vsel %vm384_vm1, %v2603_v22, 0.0 }
0x134b   :  { %2605 = vadd.xlane.f32.xlu0 %v2604_v23 }
0x13d4   :  { %v2606_v27 = vpop.xlane.xlu0 %2605 }
0x13d5   :  { %v2607_v31 = vmul.f32 0.03125, %v2606_v27 }
0x13d7   :  { %v2608_v32 = vadd.f32 1e-05, %v2607_v31 }
0x13d9   :  { %4346 = vrsqrt.f32 %v2608_v32 }
0x13e6   :  { %v4347_v33 = vpop.eup %4346 }
0x13e7   :  { %v2610_v41 = vmul.f32 %v4347_v33, %v2602_v21 }
0x13e9   :  { %v2617_v45 = vmul.f32 %v3722_v39, %v2610_v41  ;;  %v3739_v41 = vld [vmem:[%s5612_s24 + $0x38] sm:$0xff] }
0x13eb   :  { %v5432_v46 = vadd.f32 %v3723_v42, %v2617_v45  ;;  %v3738_v42 = vld [vmem:[%s5612_s24 + $0x30] sm:$0xff]  ;;  %v3737_v45 = vld [vmem:[%s5612_s24 + $0x28] sm:$0xff] }
0x13ed   :  { %4133 = vmatmul.mubr.msk.f32.vlgmr.msra.gmra.mxu1 %vm427_vm3, %v5432_v46 }
0x13ee   :  { %4147 = vmatpush3.msra.mxu1 %v4363_v11  ;;  %4154 = vmatprep.mubr.msk.f32.mxu1 %vm4793_vm2, %v4792_v13 }
0x13ef   :  { %4148 = vmatprep.subr.mxu1 %v4792_v13 }
0x13f0   :  { %4149 = vmatpush3.msra.mxu1 %v4364_v29 }
0x13f1   :  { %4150 = vmatprep.subr.mxu1 %v4792_v13 }
0x13f2   :  { %4151 = vmatpush3.msra.mxu1 %v4365_v12 }
0x13f3   :  { %4152 = vmatprep.subr.mxu1 %v4792_v13 }
0x13f4   :  { %4153 = vmatpush3.msra.mxu1 %v4366_v14 }
0x13f5   :  { %4162 = vmatprep.subr.mxu1 %v4792_v13 }
0x14ad   :  { %v2715_v47 = vpop.f32.mrf.mxu1 }
0x14ae   :  { %v2716_v0 = vadd.f32 %v3728_v62, %v2715_v47  ;;  %v3736_v62 = vld [vmem:[%s5612_s24 + $0x20] sm:$0xff]  ;;  %v2722_v47 = vld [vmem:[#allocation28] sm:$0xff] }
0x14af   :  { %v4134_v48 = vpop.f32.mrf.mxu1 }
0x14b0   :  { %v2719_v49 = vmul.f32 0.35355338, %v2716_v0  ;;  %v2723_v48 = vld [vmem:[#allocation28 + $0x8] sm:$0xff] }
0x14b2   :  { %v2731_v50 = vrot.slane %v2719_v49, %v5081_v38 }
0x14b4   :  { %v2732_v51 = vcombine.high %v2731_v50, %v2731_v50  ;;  %v2739_v52 = vrot.slane %v2731_v50, %v5081_v38 }
0x14b6   :  { %v2746_v54 = vrot.slane %v2732_v51, %v5081_v38  ;;  %v2750_v55 = vrot.slane %v2739_v52, %v5085_v44 }
0x14b8   :  { %v2754_v58 = vrot.slane %v2746_v54, %v5085_v44  ;;  %v2757_v59 = vmul.f32 %v2750_v55, %v2720_v53 }
0x14ba   :  { %v2758_v60 = vmul.f32 %v2754_v58, %v2721_v56  ;;  %4144 = vmatmul.mubr.msk.f32.vlgmr.msra.gmra.mxu0 %vm427_vm3, %v2757_v59 }
0x14bb   :  { %4158 = vmatpush3.msk.msra.mxu0 %vm810_vm5, %v5380_v40  ;;  %4159 = vmatprep.mubr.msk.f32.mxu0 %vm4793_vm2, %v4792_v13 }
0x14bc   :  { %4155 = vmatmul.mubr.msk.f32.vlgmr.msra.gmra.mxu1 %vm427_vm3, %v2758_v60  ;;  %4167 = vmatprep.subr.mxu0 %v4792_v13 }
0x14bd   :  { %4163 = vmatpush3.msk.msra.mxu1 %vm810_vm5, %v5380_v40  ;;  %4164 = vmatprep.mubr.msk.f32.mxu1 %vm4793_vm2, %v4792_v13 }
0x14be   :  { %4178 = vmatprep.subr.mxu1 %v4792_v13 }
0x157a   :  { %v2828_v38 = vpop.f32.mrf.mxu0 }
0x157b   :  { %v2829_v44 = vadd.f32 %v2828_v38, %v5232_v57 }
0x157c   :  { %v4145_v61 = vpop.f32.mrf.mxu0  ;;  %v2901_v25 = vpop.f32.mrf.mxu1 }
0x157d   :  { %v2905_v63 = vsel %vm748_vm7, %v2829_v44, -inf  ;;  %v2902_v35 = vadd.f32 %v2901_v25, %v5236_v43 }
0x157e   :  { %v2906_v1 = vrot.slane %v2905_v63, 4  ;;  %v4156_v2 = vpop.f32.mrf.mxu1 }
0x157f   :  { %v2912_v3 = vsel %vm748_vm7, %v2902_v35, -inf }
0x1580   :  { %v2907_v4 = vmax.f32 %v2905_v63, %v2906_v1  ;;  %v2913_v40 = vrot.slane %v2912_v3, 4 }
0x1582   :  { %v2908_v5 = vrot.slane %v2907_v4, 2  ;;  %v2914_v6 = vmax.f32 %v2912_v3, %v2913_v40 }
0x1584   :  { %v2909_v37 = vmax.f32 %v2907_v4, %v2908_v5  ;;  %v2915_v7 = vrot.slane %v2914_v6, 2  ;;  %v3740_v4 = vld [vmem:[#allocation15 + $0x1] ss:$0 sm:$0xff] }
0x1586   :  { %v2910_v9 = vrot.slane %v2909_v37, 1  ;;  %v2916_v10 = vmax.f32 %v2914_v6, %v2915_v7 }
0x1588   :  { %v2911_v28 = vmax.f32 %v2909_v37, %v2910_v9  ;;  %v2917_v57 = vrot.slane %v2916_v10, 1 }
0x158a   :  { %v2919_v11 = vsub.f32 %v2829_v44, %v2911_v28  ;;  %v2918_v29 = vmax.f32 %v2916_v10, %v2917_v57 }
0x158c   :  { %v2921_v12 = vmul.f32 1.442695, %v2919_v11  ;;  %v2920_v14 = vsub.f32 %v2902_v35, %v2918_v29  ;;  %v3749_v29 = vld [vmem:[%s5613_s20 + $0x38] sm:$0xff] }
0x158e   :  { %4348 = vpow2.f32 %v2921_v12  ;;  %v2923_v43 = vmul.f32 1.442695, %v2920_v14  ;;  %v3748_v12 = vld [vmem:[%s5613_s20 + $0x30] sm:$0xff]  ;;  %v3747_v14 = vld [vmem:[%s5613_s20 + $0x28] sm:$0xff] }
0x1590   :  { %4350 = vpow2.f32 %v2923_v43 }
0x159b   :  { %v4349_v30 = vpop.eup %4348 }
0x159c   :  { %v2925_v15 = vsel %vm748_vm7, %v4349_v30, 0.0 }
0x159d   :  { %v4351_v16 = vpop.eup %4350  ;;  %v2926_v34 = vrot.slane %v2925_v15, 4 }
0x159e   :  { %v2932_v17 = vsel %vm748_vm7, %v4351_v16, 0.0 }
0x159f   :  { %v2927_v18 = vadd.f32 %v2926_v34, %v2925_v15  ;;  %v2933_v19 = vrot.slane %v2932_v17, 4  ;;  %v3744_v34 = vld [vmem:[%s5608_s4 + $0x4] ss:$0 sm:$0xff] }
0x15a1   :  { %v2928_v20 = vrot.slane %v2927_v18, 2  ;;  %v2934_v21 = vadd.f32 %v2933_v19, %v2932_v17 }
0x15a3   :  { %v2929_v22 = vadd.f32 %v2928_v20, %v2927_v18  ;;  %v2935_v23 = vrot.slane %v2934_v21, 2  ;;  %v3745_v18 = vld [vmem:[%s5609_s26 + $0x4] ss:$0 sm:$0xff] }
0x15a5   :  { %v2930_v24 = vrot.slane %v2929_v22, 1  ;;  %v2936_v36 = vadd.f32 %v2935_v23, %v2934_v21  ;;  %v3759_v21 = vld [vmem:[%s5614_s12 + $0x78] sm:$0xff]  ;;  %v3757_v23 = vld [vmem:[%s5614_s12 + $0x68] sm:$0xff] }
0x15a7   :  { %v2931_v26 = vadd.f32 %v2930_v24, %v2929_v22  ;;  %v2937_v8 = vrot.slane %v2936_v36, 1  ;;  %v3758_v22 = vld [vmem:[%s5614_s12 + $0x70] sm:$0xff]  ;;  %v3756_v24 = vld [vmem:[%s5614_s12 + $0x60] sm:$0xff] }
0x15a9   :  { %4352 = vrcp.f32 %v2931_v26  ;;  %v2938_v27 = vadd.f32 %v2937_v8, %v2936_v36  ;;  %v3755_v36 = vld [vmem:[%s5614_s12 + $0x58] sm:$0xff]  ;;  %v3754_v26 = vld [vmem:[%s5614_s12 + $0x50] sm:$0xff]  ;;  %v3753_v8 = vld [vmem:[%s5614_s12 + $0x48] sm:$0xff] }
0x15ab   :  { %4354 = vrcp.f32 %v2938_v27  ;;  %v3752_v27 = vld [vmem:[%s5614_s12 + $0x40] sm:$0xff] }
0x15b6   :  { %v4353_v31 = vpop.eup %4352 }
0x15b7   :  { %v2941_v32 = vmul.f32 %v4353_v31, %v4349_v30  ;;  %v3750_v31 = vld [vmem:[#allocation16 + $0x1] ss:$0 sm:$0xff] }
0x15b8   :  { %v4355_v33 = vpop.eup %4354 }
0x15b9   :  { %4160 = vmatmul.mubr.msk.f32.vlgmr.msra.gmra.mxu0 %vm748_vm7, %v2941_v32  ;;  %v2942_v39 = vmul.f32 %v4355_v33, %v4351_v16 }
0x15ba   :  { %4175 = vmatprep.mubr.msk.f32.mxu0 %vm4793_vm2, %v4792_v13  ;;  %4168 = vmatpush3.msra.mxu0 %v3739_v41 }
0x15bb   :  { %4165 = vmatmul.mubr.msk.f32.vlgmr.msra.gmra.mxu1 %vm748_vm7, %v2942_v39  ;;  %4169 = vmatprep.subr.mxu0 %v4792_v13 }
0x15bc   :  { %4186 = vmatprep.mubr.msk.f32.mxu1 %vm4793_vm2, %v4792_v13  ;;  %4170 = vmatpush3.msra.mxu0 %v3738_v42 }
0x15bd   :  { %4171 = vmatprep.subr.mxu0 %v4792_v13  ;;  %4179 = vmatpush3.msra.mxu1 %v3749_v29 }
0x15be   :  { %4172 = vmatpush3.msra.mxu0 %v3737_v45  ;;  %4180 = vmatprep.subr.mxu1 %v4792_v13 }
0x15bf   :  { %4173 = vmatprep.subr.mxu0 %v4792_v13  ;;  %4181 = vmatpush3.msra.mxu1 %v3748_v12 }
0x15c0   :  { %4174 = vmatpush3.msra.mxu0 %v3736_v62  ;;  %4182 = vmatprep.subr.mxu1 %v4792_v13 }
0x15c1   :  { %4189 = vmatprep.subr.mxu0 %v4792_v13  ;;  %4183 = vmatpush3.msra.mxu1 %v3747_v14  ;;  %v3764_v14 = vld [vmem:[%s5608_s4 + $0x5] ss:$0 sm:$0xff] }
0x15c2   :  { %4184 = vmatprep.subr.mxu1 %v4792_v13 }
0x1679   :  { %v3012_v0 = vpop.f32.mrf.mxu0 }
0x167a   :  { %v3089_v49 = vmul.f32 %v3012_v0, %v2722_v47 }
0x167b   :  { %v4161_v50 = vpop.f32.mrf.mxu0  ;;  %v3085_v51 = vpop.f32.mrf.mxu1 }
0x167c   :  { %v3091_v52 = vsel %vm427_vm3, %v3089_v49, 0.0  ;;  %v3090_v53 = vmul.f32 %v3085_v51, %v2723_v48  ;;  %v3760_v51 = vld [vmem:[#allocation18 + $0x1] ss:$0 sm:$0xff] }
0x167d   :  { %v3092_v54 = vrot.slane %v3091_v52, 4  ;;  %v4166_v55 = vpop.f32.mrf.mxu1 }
0x167e   :  { %v3098_v56 = vsel %vm427_vm3, %v3090_v53, 0.0 }
0x167f   :  { %v3093_v58 = vadd.f32 %v3092_v54, %v3091_v52  ;;  %v3099_v59 = vrot.slane %v3098_v56, 4 }
0x1681   :  { %v3094_v60 = vrot.slane %v3093_v58, 2  ;;  %v3100_v38 = vadd.f32 %v3099_v59, %v3098_v56  ;;  %v3456_v59 = vld [vmem:[%s5602_s22 + $0x70] sm:$0xff] }
0x1683   :  { %v3095_v44 = vadd.f32 %v3094_v60, %v3093_v58  ;;  %v3101_v61 = vrot.slane %v3100_v38, 2  ;;  %v3457_v58 = vld [vmem:[%s5602_s22 + $0x78] sm:$0xff]  ;;  %v3455_v60 = vld [vmem:[%s5602_s22 + $0x68] sm:$0xff] }
0x1685   :  { %v3096_v25 = vrot.slane %v3095_v44, 1  ;;  %v3102_v63 = vadd.f32 %v3101_v61, %v3100_v38  ;;  %v3454_v38 = vld [vmem:[%s5602_s22 + $0x60] sm:$0xff]  ;;  %v3452_v61 = vld [vmem:[%s5602_s22 + $0x50] sm:$0xff] }
0x1687   :  { %v3103_v35 = vrot.slane %v3102_v63, 1  ;;  %v3097_v1 = vadd.f32 %v3096_v25, %v3095_v44  ;;  %v3453_v44 = vld [vmem:[%s5602_s22 + $0x58] sm:$0xff]  ;;  %v3451_v25 = vld [vmem:[%s5602_s22 + $0x48] sm:$0xff] }
0x1689   :  { %v3104_v2 = vadd.f32 %v3103_v35, %v3102_v63  ;;  %v3450_v63 = vld [vmem:[%s5602_s22 + $0x40] sm:$0xff]  ;;  %v3449_v35 = vld [vmem:[%s5602_s22 + $0x38] sm:$0xff] }
0x168b   :  { %v3120_v3 = vsel %vm1006_vm8, %v3104_v2, %v3097_v1  ;;  %v3448_v1 = vld [vmem:[%s5602_s22 + $0x30] sm:$0xff] }
0x168c   :  { %4176 = vmatmul.mubr.msk.f32.vlgmr.msra.gmra.mxu0 %vm427_vm3, %v3120_v3 }
0x168d   :  { %4205 = vmatprep.mubr.msk.f32.mxu0 %vm4793_vm2, %v4792_v13  ;;  %4190 = vmatpush3.msra.mxu0 %v3759_v21 }
0x168e   :  { %4191 = vmatprep.subr.mxu0 %v4792_v13 }
0x168f   :  { %4192 = vmatpush3.msra.mxu0 %v3758_v22 }
0x1690   :  { %4193 = vmatprep.subr.mxu0 %v4792_v13 }
0x1691   :  { %4194 = vmatpush3.msra.mxu0 %v3757_v23 }
0x1692   :  { %4195 = vmatprep.subr.mxu0 %v4792_v13 }
0x1693   :  { %4196 = vmatpush3.msra.mxu0 %v3756_v24 }
0x1694   :  { %4197 = vmatprep.subr.mxu0 %v4792_v13 }
0x1695   :  { %4198 = vmatpush3.msra.mxu0 %v3755_v36 }
0x1696   :  { %4199 = vmatprep.subr.mxu0 %v4792_v13 }
0x1697   :  { %4200 = vmatpush3.msra.mxu0 %v3754_v26 }
0x1698   :  { %4201 = vmatprep.subr.mxu0 %v4792_v13 }
0x1699   :  { %4202 = vmatpush3.msra.mxu0 %v3753_v8 }
0x169a   :  { %4203 = vmatprep.subr.mxu0 %v4792_v13 }
0x169b   :  { %4204 = vmatpush3.msra.mxu0 %v3752_v27 }
0x174c   :  { %v3189_v40 = vpop.f32.mrf.mxu0 }
0x174d   :  { %v3190_v5 = vadd.f32 %v3740_v4, %v3189_v40 }
0x174e   :  { %v4177_v6 = vpop.f32.mrf.mxu0 }
0x174f   :  { %v3193_v37 = vadd.f32 %v3190_v5, %v5432_v46  ;;  %v3746_v46 = vld [vmem:[%s5613_s20 + $0x20] sm:$0xff]  ;;  %v3447_v6 = vld [vmem:[%s5602_s22 + $0x28] sm:$0xff] }
0x1750   :  { %4185 = vmatpush3.msra.mxu1 %v3746_v46 }
0x1751   :  { %v3198_v7 = vsel %vm384_vm1, %v3193_v37, 0.0  ;;  %4208 = vmatprep.subr.mxu1 %v4792_v13 }
0x1752   :  { %3199 = vadd.xlane.f32.xlu0 %v3198_v7  ;;  %v3445_v7 = vld [vmem:[%s5602_s22 + $0x18] sm:$0xff] }
0x17db   :  { %v3200_v9 = vpop.xlane.xlu0 %3199 }
0x17dc   :  { %v3201_v10 = vmul.f32 0.03125, %v3200_v9  ;;  %v3444_v9 = vld [vmem:[%s5602_s22 + $0x10] sm:$0xff] }
0x17de   :  { %v3202_v28 = vsub.f32 %v3193_v37, %v3201_v10  ;;  %v3446_v37 = vld [vmem:[%s5602_s22 + $0x20] sm:$0xff]  ;;  %v3443_v10 = vld [vmem:[%s5602_s22 + $0x8] sm:$0xff] }
0x17e0   :  { %v3203_v57 = vmul.f32 %v3202_v28, %v3202_v28 }
0x17e2   :  { %v3204_v11 = vsel %vm384_vm1, %v3203_v57, 0.0 }
0x17e3   :  { %3205 = vadd.xlane.f32.xlu1 %v3204_v11 }
0x186c   :  { %v3206_v43 = vpop.xlane.xlu1 %3205 }
0x186d   :  { %v3207_v30 = vmul.f32 0.03125, %v3206_v43  ;;  %v3765_v43 = vld [vmem:[%s5609_s26 + $0x5] ss:$0 sm:$0xff] }
0x186f   :  { %v3208_v15 = vadd.f32 1e-05, %v3207_v30 }
0x1871   :  { %4356 = vrsqrt.f32 %v3208_v15 }
0x187e   :  { %v4357_v16 = vpop.eup %4356 }
0x187f   :  { %v3210_v17 = vmul.f32 %v4357_v16, %v3202_v28  ;;  %v3442_v28 = vld [vmem:[%s5602_s22] sm:$0xff] }
0x1881   :  { %v3217_v19 = vmul.f32 %v3744_v34, %v3210_v17 }
0x1883   :  { %v3224_v20 = vadd.f32 %v3745_v18, %v3217_v19 }
0x1885   :  { %4187 = vmatmul.mubr.msk.f32.vlgmr.msra.gmra.mxu1 %vm427_vm3, %v3224_v20 }
0x1886   :  { %4240 = vmatprep.mubr.msk.f32.mxu1 %vm4793_vm2, %v4792_v13  ;;  %4209 = vmatpush3.xpose.msk.msra.mxu1 %vm427_vm3, %v3457_v58 }
0x1887   :  { %4210 = vmatprep.subr.mxu1 %v4792_v13 }
0x188a   :  { %4211 = vmatpush3.xpose.msk.msra.mxu1 %vm427_vm3, %v3456_v59 }
0x188b   :  { %4212 = vmatprep.subr.mxu1 %v4792_v13 }
0x188e   :  { %4213 = vmatpush3.xpose.msk.msra.mxu1 %vm427_vm3, %v3455_v60 }
0x188f   :  { %4214 = vmatprep.subr.mxu1 %v4792_v13 }
0x1892   :  { %4215 = vmatpush3.xpose.msk.msra.mxu1 %vm427_vm3, %v3454_v38 }
0x1893   :  { %4216 = vmatprep.subr.mxu1 %v4792_v13 }
0x1896   :  { %4217 = vmatpush3.xpose.msk.msra.mxu1 %vm427_vm3, %v3453_v44 }
0x1897   :  { %4218 = vmatprep.subr.mxu1 %v4792_v13 }
0x189a   :  { %4219 = vmatpush3.xpose.msk.msra.mxu1 %vm427_vm3, %v3452_v61 }
0x189b   :  { %4220 = vmatprep.subr.mxu1 %v4792_v13 }
0x189e   :  { %4221 = vmatpush3.xpose.msk.msra.mxu1 %vm427_vm3, %v3451_v25 }
0x189f   :  { %4222 = vmatprep.subr.mxu1 %v4792_v13 }
0x18a2   :  { %4223 = vmatpush3.xpose.msk.msra.mxu1 %vm427_vm3, %v3450_v63 }
0x18a3   :  { %4224 = vmatprep.subr.mxu1 %v4792_v13 }
0x18a6   :  { %4225 = vmatpush3.xpose.msk.msra.mxu1 %vm427_vm3, %v3449_v35 }
0x18a7   :  { %4226 = vmatprep.subr.mxu1 %v4792_v13 }
0x18aa   :  { %4227 = vmatpush3.xpose.msk.msra.mxu1 %vm427_vm3, %v3448_v1 }
0x18ab   :  { %4228 = vmatprep.subr.mxu1 %v4792_v13 }
0x18ae   :  { %4229 = vmatpush3.xpose.msk.msra.mxu1 %vm427_vm3, %v3447_v6 }
0x18af   :  { %4230 = vmatprep.subr.mxu1 %v4792_v13 }
0x18b2   :  { %4231 = vmatpush3.xpose.msk.msra.mxu1 %vm427_vm3, %v3446_v37 }
0x18b3   :  { %4232 = vmatprep.subr.mxu1 %v4792_v13 }
0x18b6   :  { %4233 = vmatpush3.xpose.msk.msra.mxu1 %vm427_vm3, %v3445_v7 }
0x18b7   :  { %4234 = vmatprep.subr.mxu1 %v4792_v13 }
0x18ba   :  { %4235 = vmatpush3.xpose.msk.msra.mxu1 %vm427_vm3, %v3444_v9 }
0x18bb   :  { %4236 = vmatprep.subr.mxu1 %v4792_v13 }
0x18be   :  { %4237 = vmatpush3.xpose.msk.msra.mxu1 %vm427_vm3, %v3443_v10 }
0x18bf   :  { %4238 = vmatprep.subr.mxu1 %v4792_v13 }
0x18c2   :  { %4239 = vmatpush3.xpose.msk.msra.mxu1 %vm427_vm3, %v3442_v28 }
0x1945   :  { %v3307_v32 = vpop.f32.mrf.mxu1 }
0x1946   :  { %v3308_v33 = vadd.f32 %v3750_v31, %v3307_v32 }
0x1947   :  { %v4188_v39 = vpop.f32.mrf.mxu1 }
0x1948   :  { %v3311_v41 = vmul.f32 %v3308_v33, %v3308_v33 }
0x194a   :  { %v3312_v42 = vmul.f32 %v3311_v41, %v3308_v33 }
0x194c   :  { %v3313_v45 = vmul.f32 0.044715, %v3312_v42 }
0x194e   :  { %v3314_v62 = vadd.f32 %v3313_v45, %v3308_v33 }
0x1950   :  { %v3315_v47 = vmul.f32 0.7978846, %v3314_v62 }
0x1952   :  { %4358 = vtanh.f32 %v3315_v47 }
0x195f   :  { %v4359_v0 = vpop.eup %4358 }
0x1960   :  { %v3317_v48 = vadd.f32 1.0, %v4359_v0 }
0x1962   :  { %v3318_v49 = vmul.f32 0.5, %v3317_v48 }
0x1964   :  { %v3319_v50 = vmul.f32 %v3318_v49, %v3308_v33 }
0x1966   :  { %4206 = vmatmul.mubr.msk.f32.vlgmr.msra.gmra.mxu0 %vm1828_vm9, %v3319_v50 }
0x1a26   :  { %v3406_v52 = vpop.f32.mrf.mxu0 }
0x1a27   :  { %v3407_v53 = vadd.f32 %v3760_v51, %v3406_v52 }
0x1a28   :  { %v4207_v54 = vpop.f32.mrf.mxu0 }
0x1a29   :  { %v3410_v55 = vadd.f32 %v3407_v53, %v3224_v20 }
0x1a2b   :  { %v3415_v56 = vsel %vm384_vm1, %v3410_v55, 0.0 }
0x1a2c   :  { %3416 = vadd.xlane.f32.xlu0 %v3415_v56 }
0x1ab5   :  { %v3417_v2 = vpop.xlane.xlu0 %3416 }
0x1ab6   :  { %v3418_v3 = vmul.f32 0.03125, %v3417_v2 }
0x1ab8   :  { %v3419_v4 = vsub.f32 %v3410_v55, %v3418_v3 }
0x1aba   :  { %v3420_v40 = vmul.f32 %v3419_v4, %v3419_v4 }
0x1abc   :  { %v3421_v5 = vsel %vm384_vm1, %v3420_v40, 0.0 }
0x1abd   :  { %3422 = vadd.xlane.f32.xlu1 %v3421_v5 }
0x1b46   :  { %v3423_v57 = vpop.xlane.xlu1 %3422 }
0x1b47   :  { %v3424_v11 = vmul.f32 0.03125, %v3423_v57 }
0x1b49   :  { %v3425_v29 = vadd.f32 1e-05, %v3424_v11 }
0x1b4b   :  { %4360 = vrsqrt.f32 %v3425_v29 }
0x1b58   :  { %v4361_v12 = vpop.eup %4360 }
0x1b59   :  { %v3427_v46 = vmul.f32 %v4361_v12, %v3419_v4 }
0x1b5b   :  { %v3434_v30 = vmul.f32 %v3764_v14, %v3427_v46 }
0x1b5d   :  { %v3441_v15 = vadd.f32 %v3765_v43, %v3434_v30 }
0x1b5f   :  { %4241 = vmatmul.mubr.msk.f32.vlgmr.msra.gmra.mxu1 %vm427_vm3, %v3441_v15 }
0x1c1f   :  { %v3575_v16 = vpop.f32.mrf.mxu1 }
0x1c20   :  { %3579 = vst [vmem:[#allocation30] sm:$0x3] %v3575_v16 }
0x1c21   :  { %v4242_v13 = vpop.f32.mrf.mxu1 }
0x1c22   :  { %4706 = shalt.err (!%p4703_p0)
}
0x1c23   :  { %s5615_s11 = sld [smem:[#allocation58_spill]] }
0x1c29   :  { %3589 = dma.vmem_to_hbm [thread:$0]  %s3587_s17, 32, %s5615_s11, [#allocation4]  }
0x1c2a   :  { %4735 = dma.done.wait [#allocation4], 32  }
0x1c2b   :  { %4736 = vsyncadd [#allocation4], 4294967264 }
0x1c2c   :  { %3609 = vsyncpa [#allocation3], 1 }
0x1c2d   :  { %3610 = vsyncpa [#allocation8], 1 }
0x1c2e   :  { %3611 = vsyncpa [#allocation11], 1 }
0x1c2f   :  { %3612 = vsyncpa [#allocation14], 1 }
0x1c30   :  { %3613 = vsyncpa [#allocation17], 1 }
0x1c31   :  { %3614 = vsyncpa [#allocation20], 1 }
0x1c32   :  { %3615 = vsyncpa [#allocation23], 1 }
0x1c33   :  { %3616 = vsyncpa [#allocation26], 1 }
0x1c34   :  { %3617 = vsyncpa [#allocation29], 1 }
0x1c35   :  { %3618 = vsyncpa [#allocation4], 1 }
0x1c36   :  { %3619 = vsyncpa [#allocation5], 1 }

</bundles_post_ra>
